<compile_context>
chip_gen: v5e
topology: v5e:2x2
jax: 0.10.0
libtpu: 0.0.40
codegen_flags: <defaults>
</compile_context>

<pallas_src>
import functools

import jax
import jax.numpy as jnp
from jax import lax
from jax.experimental import pallas as pl
from jax.experimental.pallas import tpu as pltpu

KH = KW = 7      # fused kernel footprint ("same" padding)
PAD = 3


def _round_up(x, m):
    return (x + m - 1) // m * m


# ---------------------------------------------------------------------------
# In-kernel helpers (all sizes are static Python ints baked in via closures).
# ---------------------------------------------------------------------------
def _conv_tile(x_ref, w_ref, patch_ref, *, th, wp, cin, h_tiles):
    """One (Coutp, TH*Wp) conv tile: scratch-assembled im2col + one matmul.

    x_ref    : (1, Cin, Lp)  flat padded image (per-channel row-major planes)
    w_ref    : (Coutp, K)    packed weight bank, K = 49*Cin, row r=(kh*7+kw)*Cin+ci
    patch_ref: (K, TH*Wp)    VMEM scratch
    """
    tmp_len = th * wp
    # Static base when the whole image is one tile (the common small case).
    base = 0 if h_tiles == 1 else pl.program_id(1) * tmp_len
    r = 0
    for kh in range(KH):
        for kw in range(KW):
            off = kh * wp + kw
            for ci in range(cin):
                patch_ref[r:r + 1, :] = x_ref[0, ci:ci + 1,
                                              pl.ds(base + off, tmp_len)]
                r += 1
    return jnp.dot(w_ref[...], patch_ref[...],
                   preferred_element_type=jnp.float32)


def _make_stats_kernel(th, w, wp, cin, h_tiles):
    tm = th * w                       # number of VALID positions per tile
    inv_tm = 1.0 / float(tm)

    def kernel(x_ref, w_ref, mask_ref, stats_ref, patch_ref):
        acc = _conv_tile(x_ref, w_ref, patch_ref,
                         th=th, wp=wp, cin=cin, h_tiles=h_tiles)
        m = mask_ref[...]                                    # (1, TH*Wp)
        s = jnp.sum(acc * m, axis=1, keepdims=True)          # (Coutp, 1)
        c = (acc - s * inv_tm) * m                           # tile-centered
        css = jnp.sum(c * c, axis=1, keepdims=True)          # (Coutp, 1)
        stats_ref[0, 0, :, 0:1] = s
        stats_ref[0, 0, :, 1:2] = css

    return kernel


def _make_out_kernel(th, w, wp, cin, cout, n, h_tiles, eps):
    tm = th * w
    m_total = float(n * h_tiles * tm)

    def kernel(x_ref, w_ref, stats_ref, gamma_ref, beta_ref, o_ref, patch_ref):
        acc = _conv_tile(x_ref, w_ref, patch_ref,
                         th=th, wp=wp, cin=cin, h_tiles=h_tiles)
        # Fold the BN-statistics combination into the kernel (the stats tensor
        # is only (N*h_tiles, Coutp, 2) f32) -> no XLA chain between passes.
        st = stats_ref[...]                                   # (NT, Coutp, 2)
        s = st[:, :, 0:1]                                     # (NT, Coutp, 1)
        css = st[:, :, 1:2]
        mean = jnp.sum(s, axis=0) / m_total                   # (Coutp, 1)
        m_t = s * (1.0 / tm)
        var = (jnp.sum(css, axis=0)
               + tm * jnp.sum((m_t - mean) ** 2, axis=0)) / m_total
        inv_std = lax.rsqrt(var + eps)
        scale = gamma_ref[...] * inv_std                      # (Coutp, 1)
        shift = beta_ref[...] - mean * scale
        y = jnp.maximum(acc * scale + shift, 0.0)             # (Coutp, TH*Wp)
        o_ref[0, 0, :, :] = y[:cout, :]                       # lane-dense store

    return kernel


# ---------------------------------------------------------------------------
# Wrapper
# ---------------------------------------------------------------------------
@functools.partial(jax.jit, static_argnames=("eps",))
def inception_block(x, w3, b3, w5, b5, w7, b7, gamma, beta, eps=1e-5):
    # Conv biases are unused: BatchNorm over batch statistics cancels a
    # constant per-channel bias exactly (forward output unchanged).
    del b3, b5, b7

    n, cin, h, w = x.shape
    c3, c5, c7 = w3.shape[0], w5.shape[0], w7.shape[0]
    cout = c3 + c5 + c7
    coutp = _round_up(max(cout, 8), 8)        # channels live on sublanes now
    k = cin * KH * KW
    hp, wp = h + 2 * PAD, w + 2 * PAD

    # ---- Row-tile size from an explicit VMEM budget (v7x has only 64 MiB).
    # Per output-position bytes: patch (K f32) + f32 accumulator + double-
    # buffered output block (+ mask).  The haloed image block is separate.
    bytes_per_pos = 4 * k + 4 * coutp + 8 * cout + 8
    budget = 8 * 1024 * 1024
    divisors = [d for d in range(1, h + 1) if h % d == 0]
    h_tiles = next((d for d in divisors
                    if (h // d) * wp * bytes_per_pos <= budget), h)
    if n * h_tiles < 2:                       # keep both v7x TensorCores busy
        h_tiles = max(h_tiles, next((d for d in divisors if d >= 2), h_tiles))
    th = h // h_tiles
    tmp_len = th * wp                         # positions/tile (incl. pad cols)
    nt = n * h_tiles

    # ---- Pack 3x3/5x5/7x7 into one zero-embedded, center-aligned 7x7 bank
    # padded to coutp rows; layout (Coutp, K) with K ordered (kh, kw, ci).
    # TODO(synk): for large Cout/Cin switch to three per-branch matmuls
    # (K = 9/25/49 * Cin) instead of the zero-embedded 7x7 bank.
    w_all = jnp.zeros((coutp, cin, KH, KW), jnp.float32)
    w_all = w_all.at[:c3, :, 2:5, 2:5].set(w3.astype(jnp.float32))
    w_all = w_all.at[c3:c3 + c5, :, 1:6, 1:6].set(w5.astype(jnp.float32))
    w_all = w_all.at[c3 + c5:cout, :, :, :].set(w7.astype(jnp.float32))
    w_mat = w_all.transpose(0, 2, 3, 1).reshape(coutp, k)

    # ---- Flat padded input: per-channel row-major planes + a zero tail so
    # the last tap of the last row never reads out of bounds.
    lp = _round_up(hp * wp + 2 * PAD, 128)
    xp = jnp.pad(x.astype(jnp.float32),
                 ((0, 0), (0, 0), (PAD, PAD), (PAD, PAD)))
    xflat = jnp.pad(xp.reshape(n, cin, hp * wp),
                    ((0, 0), (0, 0), (0, lp - hp * wp)))

    # Valid-column mask (columns w..wp-1 of every output row are pad columns).
    mask = (jnp.arange(tmp_len) % wp < w).astype(jnp.float32).reshape(1, tmp_len)

    gamma_p = jnp.concatenate(
        [gamma.astype(jnp.float32), jnp.ones((coutp - cout,), jnp.float32)]
    ).reshape(coutp, 1)
    beta_p = jnp.concatenate(
        [beta.astype(jnp.float32), jnp.zeros((coutp - cout,), jnp.float32)]
    ).reshape(coutp, 1)

    grid = (n, h_tiles)
    # Grid-invariant operands (w_mat, mask, stats, gamma, beta) keep a constant
    # index_map so Pallas skips their re-DMA across grid steps.
    x_spec = pl.BlockSpec((1, cin, lp), lambda i, j: (i, 0, 0))
    w_spec = pl.BlockSpec((coutp, k), lambda i, j: (0, 0))
    cparams = pltpu.CompilerParams(
        dimension_semantics=("parallel", "parallel"),
        vmem_limit_bytes=32 * 1024 * 1024)
    patch_scratch = pltpu.VMEM((k, tmp_len), jnp.float32)

    # --- Pass 1: per-tile partial BN stats (sum + tile-centered sum of sq).
    stats = pl.pallas_call(
        _make_stats_kernel(th, w, wp, cin, h_tiles),
        out_shape=jax.ShapeDtypeStruct((n, h_tiles, coutp, 2), jnp.float32),
        grid_spec=pltpu.PrefetchScalarGridSpec(
            num_scalar_prefetch=0, grid=grid,
            in_specs=[x_spec, w_spec,
                      pl.BlockSpec((1, tmp_len), lambda i, j: (0, 0))],
            out_specs=pl.BlockSpec((1, 1, coutp, 2), lambda i, j: (i, j, 0, 0)),
            scratch_shapes=[patch_scratch]),
        compiler_params=cparams,
    )(xflat, w_mat, mask)

    # --- Pass 2: recompute conv tile, combine stats in-kernel, fused BN
    # affine + ReLU, lane-dense channel-major stores.
    stats_nt = stats.reshape(nt, coutp, 2)        # metadata-only reshape
    out = pl.pallas_call(
        _make_out_kernel(th, w, wp, cin, cout, n, h_tiles, eps),
        out_shape=jax.ShapeDtypeStruct((n, h_tiles, cout, tmp_len), jnp.float32),
        grid_spec=pltpu.PrefetchScalarGridSpec(
            num_scalar_prefetch=0, grid=grid,
            in_specs=[x_spec, w_spec,
                      pl.BlockSpec((nt, coutp, 2), lambda i, j: (0, 0, 0)),
                      pl.BlockSpec((coutp, 1), lambda i, j: (0, 0)),
                      pl.BlockSpec((coutp, 1), lambda i, j: (0, 0))],
            out_specs=pl.BlockSpec((1, 1, cout, tmp_len),
                                   lambda i, j: (i, j, 0, 0)),
            scratch_shapes=[patch_scratch]),
        compiler_params=cparams,
    )(xflat, w_mat, stats_nt, gamma_p, beta_p)

    # (N, h_tiles, Cout, TH, Wp) -> (N, Cout, H, W): drop the pad columns.
    out = out.reshape(n, h_tiles, cout, th, wp)
    out = out.transpose(0, 2, 1, 3, 4).reshape(n, cout, h, wp)
    return out[:, :, :, :w]


# ---------------------------------------------------------------------------
# Pure-JAX reference (mirrors the PyTorch forward, biases included).
# ---------------------------------------------------------------------------
def inception_block_ref(x, w3, b3, w5, b5, w7, b7, gamma, beta, eps=1e-5):
    def conv(x, wgt, b, pad):
        y = lax.conv_general_dilated(
            x, wgt, window_strides=(1, 1), padding=[(pad, pad), (pad, pad)],
            dimension_numbers=("NCHW", "OIHW", "NCHW"))
        return y + b.reshape(1, -1, 1, 1)

    out = jnp.concatenate(
        [conv(x, w3, b3, 1), conv(x, w5, b5, 2), conv(x, w7, b7, 3)], axis=1)
    mean = out.mean(axis=(0, 2, 3), keepdims=True)
    var = out.var(axis=(0, 2, 3), keepdims=True)   # biased, like torch BN training
    out = (out - mean) / jnp.sqrt(var + eps)
    out = out * gamma.reshape(1, -1, 1, 1) + beta.reshape(1, -1, 1, 1)
    return jnp.maximum(out, 0.0)


if __name__ == "__main__":
    key = jax.random.PRNGKey(0)
    ks = jax.random.split(key, 9)

    N, Cin, H, W = 2, 1, 16, 16            # module defaults: in_channels=1
    nf = [12, 12, 12]

    x = jax.random.normal(ks[0], (N, Cin, H, W), jnp.float32)
    w3 = 0.2 * jax.random.normal(ks[1], (nf[0], Cin, 3, 3), jnp.float32)
    b3 = 0.1 * jax.random.normal(ks[2], (nf[0],), jnp.float32)
    w5 = 0.1 * jax.random.normal(ks[3], (nf[1], Cin, 5, 5), jnp.float32)
    b5 = 0.1 * jax.random.normal(ks[4], (nf[1],), jnp.float32)
    w7 = 0.05 * jax.random.normal(ks[5], (nf[2], Cin, 7, 7), jnp.float32)
    b7 = 0.1 * jax.random.normal(ks[6], (nf[2],), jnp.float32)
    gamma = 1.0 + 0.1 * jax.random.normal(ks[7], (sum(nf),), jnp.float32)
    beta = 0.1 * jax.random.normal(ks[8], (sum(nf),), jnp.float32)

    out = inception_block(x, w3, b3, w5, b5, w7, b7, gamma, beta)
    out = jax.block_until_ready(out)

    ref = inception_block_ref(x, w3, b3, w5, b5, w7, b7, gamma, beta)
    assert out.shape == (N, sum(nf), H, W), out.shape
    err = float(jnp.max(jnp.abs(out - ref)))
    # MXU matmul accumulation order / internal precision differs from the
    # all-XLA reference; keep a loose (but comfortably met) tolerance.
    assert err < 5e-2, f"max abs error {err}"

    print("KERNEL_OK")
</pallas_src>

<mosaic_0001>
module attributes {stable_mosaic.version = 11 : i64} {
  func.func @kernel(%arg0: i32, %arg1: i32, %arg2: memref<1x1x512xf32, #tpu.memory_space<vmem>>, %arg3: memref<40x49xf32, #tpu.memory_space<vmem>>, %arg4: memref<1x352xf32, #tpu.memory_space<vmem>>, %arg5: memref<1x1x40x2xf32, #tpu.memory_space<vmem>>, %arg6: memref<49x352xf32, #tpu.memory_space<vmem>>) attributes {dimension_semantics = [#tpu.dimension_semantics<parallel>, #tpu.dimension_semantics<parallel>], iteration_bounds = array<i64: 2, 1>, scalar_prefetch = 0 : i64, scratch_operands = 1 : i64, tpu.core_type = #tpu.core_type<tc>, window_params = [{transform_indices = @transform_0, window_bounds = array<i64: 1, 1, 512>}, {pipeline_mode = #tpu.pipeline_mode<synchronous>, transform_indices = @transform_1, window_bounds = array<i64: 40, 49>}, {pipeline_mode = #tpu.pipeline_mode<synchronous>, transform_indices = @transform_2, window_bounds = array<i64: 1, 352>}, {transform_indices = @transform_3, window_bounds = array<i64: 1, 1, 40, 2>}]} {
    %c0 = arith.constant 0 : index
    %c0_0 = arith.constant 0 : index
    %c0_1 = arith.constant 0 : index
    %0 = vector.load %arg2[%c0, %c0_0, %c0_1] : memref<1x1x512xf32, #tpu.memory_space<vmem>>, vector<1x1x352xf32>
    %1 = vector.shape_cast %0 : vector<1x1x352xf32> to vector<1x352xf32>
    %c0_2 = arith.constant 0 : index
    %c0_3 = arith.constant 0 : index
    %2 = vector.load %arg6[%c0_2, %c0_3] : memref<49x352xf32, #tpu.memory_space<vmem>>, vector<1x352xf32>
    tpu.vector_store %arg6[%c0_2, %c0_3], %1 {strides = array<i32>} : memref<49x352xf32, #tpu.memory_space<vmem>>, vector<1x352xf32>,
    %c0_4 = arith.constant 0 : index
    %c0_5 = arith.constant 0 : index
    %c1 = arith.constant 1 : index
    %3 = vector.load %arg2[%c0_4, %c0_5, %c1] : memref<1x1x512xf32, #tpu.memory_space<vmem>>, vector<1x1x352xf32>
    %4 = vector.shape_cast %3 : vector<1x1x352xf32> to vector<1x352xf32>
    %c1_6 = arith.constant 1 : index
    %c0_7 = arith.constant 0 : index
    %5 = vector.load %arg6[%c1_6, %c0_7] : memref<49x352xf32, #tpu.memory_space<vmem>>, vector<1x352xf32>
    tpu.vector_store %arg6[%c1_6, %c0_7], %4 {strides = array<i32>} : memref<49x352xf32, #tpu.memory_space<vmem>>, vector<1x352xf32>,
    %c0_8 = arith.constant 0 : index
    %c0_9 = arith.constant 0 : index
    %c2 = arith.constant 2 : index
    %6 = vector.load %arg2[%c0_8, %c0_9, %c2] : memref<1x1x512xf32, #tpu.memory_space<vmem>>, vector<1x1x352xf32>
    %7 = vector.shape_cast %6 : vector<1x1x352xf32> to vector<1x352xf32>
    %c2_10 = arith.constant 2 : index
    %c0_11 = arith.constant 0 : index
    %8 = vector.load %arg6[%c2_10, %c0_11] : memref<49x352xf32, #tpu.memory_space<vmem>>, vector<1x352xf32>
    tpu.vector_store %arg6[%c2_10, %c0_11], %7 {strides = array<i32>} : memref<49x352xf32, #tpu.memory_space<vmem>>, vector<1x352xf32>,
    %c0_12 = arith.constant 0 : index
    %c0_13 = arith.constant 0 : index
    %c3 = arith.constant 3 : index
    %9 = vector.load %arg2[%c0_12, %c0_13, %c3] : memref<1x1x512xf32, #tpu.memory_space<vmem>>, vector<1x1x352xf32>
    %10 = vector.shape_cast %9 : vector<1x1x352xf32> to vector<1x352xf32>
    %c3_14 = arith.constant 3 : index
    %c0_15 = arith.constant 0 : index
    %11 = vector.load %arg6[%c3_14, %c0_15] : memref<49x352xf32, #tpu.memory_space<vmem>>, vector<1x352xf32>
    tpu.vector_store %arg6[%c3_14, %c0_15], %10 {strides = array<i32>} : memref<49x352xf32, #tpu.memory_space<vmem>>, vector<1x352xf32>,
    %c0_16 = arith.constant 0 : index
    %c0_17 = arith.constant 0 : index
    %c4 = arith.constant 4 : index
    %12 = vector.load %arg2[%c0_16, %c0_17, %c4] : memref<1x1x512xf32, #tpu.memory_space<vmem>>, vector<1x1x352xf32>
    %13 = vector.shape_cast %12 : vector<1x1x352xf32> to vector<1x352xf32>
    %c4_18 = arith.constant 4 : index
    %c0_19 = arith.constant 0 : index
    %14 = vector.load %arg6[%c4_18, %c0_19] : memref<49x352xf32, #tpu.memory_space<vmem>>, vector<1x352xf32>
    tpu.vector_store %arg6[%c4_18, %c0_19], %13 {strides = array<i32>} : memref<49x352xf32, #tpu.memory_space<vmem>>, vector<1x352xf32>,
    %c0_20 = arith.constant 0 : index
    %c0_21 = arith.constant 0 : index
    %c5 = arith.constant 5 : index
    %15 = vector.load %arg2[%c0_20, %c0_21, %c5] : memref<1x1x512xf32, #tpu.memory_space<vmem>>, vector<1x1x352xf32>
    %16 = vector.shape_cast %15 : vector<1x1x352xf32> to vector<1x352xf32>
    %c5_22 = arith.constant 5 : index
    %c0_23 = arith.constant 0 : index
    %17 = vector.load %arg6[%c5_22, %c0_23] : memref<49x352xf32, #tpu.memory_space<vmem>>, vector<1x352xf32>
    tpu.vector_store %arg6[%c5_22, %c0_23], %16 {strides = array<i32>} : memref<49x352xf32, #tpu.memory_space<vmem>>, vector<1x352xf32>,
    %c0_24 = arith.constant 0 : index
    %c0_25 = arith.constant 0 : index
    %c6 = arith.constant 6 : index
    %18 = vector.load %arg2[%c0_24, %c0_25, %c6] : memref<1x1x512xf32, #tpu.memory_space<vmem>>, vector<1x1x352xf32>
    %19 = vector.shape_cast %18 : vector<1x1x352xf32> to vector<1x352xf32>
    %c6_26 = arith.constant 6 : index
    %c0_27 = arith.constant 0 : index
    %20 = vector.load %arg6[%c6_26, %c0_27] : memref<49x352xf32, #tpu.memory_space<vmem>>, vector<1x352xf32>
    tpu.vector_store %arg6[%c6_26, %c0_27], %19 {strides = array<i32>} : memref<49x352xf32, #tpu.memory_space<vmem>>, vector<1x352xf32>,
    %c0_28 = arith.constant 0 : index
    %c0_29 = arith.constant 0 : index
    %c22 = arith.constant 22 : index
    %21 = vector.load %arg2[%c0_28, %c0_29, %c22] : memref<1x1x512xf32, #tpu.memory_space<vmem>>, vector<1x1x352xf32>
    %22 = vector.shape_cast %21 : vector<1x1x352xf32> to vector<1x352xf32>
    %c7 = arith.constant 7 : index
    %c0_30 = arith.constant 0 : index
    %23 = vector.load %arg6[%c7, %c0_30] : memref<49x352xf32, #tpu.memory_space<vmem>>, vector<1x352xf32>
    tpu.vector_store %arg6[%c7, %c0_30], %22 {strides = array<i32>} : memref<49x352xf32, #tpu.memory_space<vmem>>, vector<1x352xf32>,
    %c0_31 = arith.constant 0 : index
    %c0_32 = arith.constant 0 : index
    %c23 = arith.constant 23 : index
    %24 = vector.load %arg2[%c0_31, %c0_32, %c23] : memref<1x1x512xf32, #tpu.memory_space<vmem>>, vector<1x1x352xf32>
    %25 = vector.shape_cast %24 : vector<1x1x352xf32> to vector<1x352xf32>
    %c8 = arith.constant 8 : index
    %c0_33 = arith.constant 0 : index
    %26 = vector.load %arg6[%c8, %c0_33] : memref<49x352xf32, #tpu.memory_space<vmem>>, vector<1x352xf32>
    tpu.vector_store %arg6[%c8, %c0_33], %25 {strides = array<i32>} : memref<49x352xf32, #tpu.memory_space<vmem>>, vector<1x352xf32>,
    %c0_34 = arith.constant 0 : index
    %c0_35 = arith.constant 0 : index
    %c24 = arith.constant 24 : index
    %27 = vector.load %arg2[%c0_34, %c0_35, %c24] : memref<1x1x512xf32, #tpu.memory_space<vmem>>, vector<1x1x352xf32>
    %28 = vector.shape_cast %27 : vector<1x1x352xf32> to vector<1x352xf32>
    %c9 = arith.constant 9 : index
    %c0_36 = arith.constant 0 : index
    %29 = vector.load %arg6[%c9, %c0_36] : memref<49x352xf32, #tpu.memory_space<vmem>>, vector<1x352xf32>
    tpu.vector_store %arg6[%c9, %c0_36], %28 {strides = array<i32>} : memref<49x352xf32, #tpu.memory_space<vmem>>, vector<1x352xf32>,
    %c0_37 = arith.constant 0 : index
    %c0_38 = arith.constant 0 : index
    %c25 = arith.constant 25 : index
    %30 = vector.load %arg2[%c0_37, %c0_38, %c25] : memref<1x1x512xf32, #tpu.memory_space<vmem>>, vector<1x1x352xf32>
    %31 = vector.shape_cast %30 : vector<1x1x352xf32> to vector<1x352xf32>
    %c10 = arith.constant 10 : index
    %c0_39 = arith.constant 0 : index
    %32 = vector.load %arg6[%c10, %c0_39] : memref<49x352xf32, #tpu.memory_space<vmem>>, vector<1x352xf32>
    tpu.vector_store %arg6[%c10, %c0_39], %31 {strides = array<i32>} : memref<49x352xf32, #tpu.memory_space<vmem>>, vector<1x352xf32>,
    %c0_40 = arith.constant 0 : index
    %c0_41 = arith.constant 0 : index
    %c26 = arith.constant 26 : index
    %33 = vector.load %arg2[%c0_40, %c0_41, %c26] : memref<1x1x512xf32, #tpu.memory_space<vmem>>, vector<1x1x352xf32>
    %34 = vector.shape_cast %33 : vector<1x1x352xf32> to vector<1x352xf32>
    %c11 = arith.constant 11 : index
    %c0_42 = arith.constant 0 : index
    %35 = vector.load %arg6[%c11, %c0_42] : memref<49x352xf32, #tpu.memory_space<vmem>>, vector<1x352xf32>
    tpu.vector_store %arg6[%c11, %c0_42], %34 {strides = array<i32>} : memref<49x352xf32, #tpu.memory_space<vmem>>, vector<1x352xf32>,
    %c0_43 = arith.constant 0 : index
    %c0_44 = arith.constant 0 : index
    %c27 = arith.constant 27 : index
    %36 = vector.load %arg2[%c0_43, %c0_44, %c27] : memref<1x1x512xf32, #tpu.memory_space<vmem>>, vector<1x1x352xf32>
    %37 = vector.shape_cast %36 : vector<1x1x352xf32> to vector<1x352xf32>
    %c12 = arith.constant 12 : index
    %c0_45 = arith.constant 0 : index
    %38 = vector.load %arg6[%c12, %c0_45] : memref<49x352xf32, #tpu.memory_space<vmem>>, vector<1x352xf32>
    tpu.vector_store %arg6[%c12, %c0_45], %37 {strides = array<i32>} : memref<49x352xf32, #tpu.memory_space<vmem>>, vector<1x352xf32>,
    %c0_46 = arith.constant 0 : index
    %c0_47 = arith.constant 0 : index
    %c28 = arith.constant 28 : index
    %39 = vector.load %arg2[%c0_46, %c0_47, %c28] : memref<1x1x512xf32, #tpu.memory_space<vmem>>, vector<1x1x352xf32>
    %40 = vector.shape_cast %39 : vector<1x1x352xf32> to vector<1x352xf32>
    %c13 = arith.constant 13 : index
    %c0_48 = arith.constant 0 : index
    %41 = vector.load %arg6[%c13, %c0_48] : memref<49x352xf32, #tpu.memory_space<vmem>>, vector<1x352xf32>
    tpu.vector_store %arg6[%c13, %c0_48], %40 {strides = array<i32>} : memref<49x352xf32, #tpu.memory_space<vmem>>, vector<1x352xf32>,
    %c0_49 = arith.constant 0 : index
    %c0_50 = arith.constant 0 : index
    %c44 = arith.constant 44 : index
    %42 = vector.load %arg2[%c0_49, %c0_50, %c44] : memref<1x1x512xf32, #tpu.memory_space<vmem>>, vector<1x1x352xf32>
    %43 = vector.shape_cast %42 : vector<1x1x352xf32> to vector<1x352xf32>
    %c14 = arith.constant 14 : index
    %c0_51 = arith.constant 0 : index
    %44 = vector.load %arg6[%c14, %c0_51] : memref<49x352xf32, #tpu.memory_space<vmem>>, vector<1x352xf32>
    tpu.vector_store %arg6[%c14, %c0_51], %43 {strides = array<i32>} : memref<49x352xf32, #tpu.memory_space<vmem>>, vector<1x352xf32>,
    %c0_52 = arith.constant 0 : index
    %c0_53 = arith.constant 0 : index
    %c45 = arith.constant 45 : index
    %45 = vector.load %arg2[%c0_52, %c0_53, %c45] : memref<1x1x512xf32, #tpu.memory_space<vmem>>, vector<1x1x352xf32>
    %46 = vector.shape_cast %45 : vector<1x1x352xf32> to vector<1x352xf32>
    %c15 = arith.constant 15 : index
    %c0_54 = arith.constant 0 : index
    %47 = vector.load %arg6[%c15, %c0_54] : memref<49x352xf32, #tpu.memory_space<vmem>>, vector<1x352xf32>
    tpu.vector_store %arg6[%c15, %c0_54], %46 {strides = array<i32>} : memref<49x352xf32, #tpu.memory_space<vmem>>, vector<1x352xf32>,
    %c0_55 = arith.constant 0 : index
    %c0_56 = arith.constant 0 : index
    %c46 = arith.constant 46 : index
    %48 = vector.load %arg2[%c0_55, %c0_56, %c46] : memref<1x1x512xf32, #tpu.memory_space<vmem>>, vector<1x1x352xf32>
    %49 = vector.shape_cast %48 : vector<1x1x352xf32> to vector<1x352xf32>
    %c16 = arith.constant 16 : index
    %c0_57 = arith.constant 0 : index
    %50 = vector.load %arg6[%c16, %c0_57] : memref<49x352xf32, #tpu.memory_space<vmem>>, vector<1x352xf32>
    tpu.vector_store %arg6[%c16, %c0_57], %49 {strides = array<i32>} : memref<49x352xf32, #tpu.memory_space<vmem>>, vector<1x352xf32>,
    %c0_58 = arith.constant 0 : index
    %c0_59 = arith.constant 0 : index
    %c47 = arith.constant 47 : index
    %51 = vector.load %arg2[%c0_58, %c0_59, %c47] : memref<1x1x512xf32, #tpu.memory_space<vmem>>, vector<1x1x352xf32>
    %52 = vector.shape_cast %51 : vector<1x1x352xf32> to vector<1x352xf32>
    %c17 = arith.constant 17 : index
    %c0_60 = arith.constant 0 : index
    %53 = vector.load %arg6[%c17, %c0_60] : memref<49x352xf32, #tpu.memory_space<vmem>>, vector<1x352xf32>
    tpu.vector_store %arg6[%c17, %c0_60], %52 {strides = array<i32>} : memref<49x352xf32, #tpu.memory_space<vmem>>, vector<1x352xf32>,
    %c0_61 = arith.constant 0 : index
    %c0_62 = arith.constant 0 : index
    %c48 = arith.constant 48 : index
    %54 = vector.load %arg2[%c0_61, %c0_62, %c48] : memref<1x1x512xf32, #tpu.memory_space<vmem>>, vector<1x1x352xf32>
    %55 = vector.shape_cast %54 : vector<1x1x352xf32> to vector<1x352xf32>
    %c18 = arith.constant 18 : index
    %c0_63 = arith.constant 0 : index
    %56 = vector.load %arg6[%c18, %c0_63] : memref<49x352xf32, #tpu.memory_space<vmem>>, vector<1x352xf32>
    tpu.vector_store %arg6[%c18, %c0_63], %55 {strides = array<i32>} : memref<49x352xf32, #tpu.memory_space<vmem>>, vector<1x352xf32>,
    %c0_64 = arith.constant 0 : index
    %c0_65 = arith.constant 0 : index
    %c49 = arith.constant 49 : index
    %57 = vector.load %arg2[%c0_64, %c0_65, %c49] : memref<1x1x512xf32, #tpu.memory_space<vmem>>, vector<1x1x352xf32>
    %58 = vector.shape_cast %57 : vector<1x1x352xf32> to vector<1x352xf32>
    %c19 = arith.constant 19 : index
    %c0_66 = arith.constant 0 : index
    %59 = vector.load %arg6[%c19, %c0_66] : memref<49x352xf32, #tpu.memory_space<vmem>>, vector<1x352xf32>
    tpu.vector_store %arg6[%c19, %c0_66], %58 {strides = array<i32>} : memref<49x352xf32, #tpu.memory_space<vmem>>, vector<1x352xf32>,
    %c0_67 = arith.constant 0 : index
    %c0_68 = arith.constant 0 : index
    %c50 = arith.constant 50 : index
    %60 = vector.load %arg2[%c0_67, %c0_68, %c50] : memref<1x1x512xf32, #tpu.memory_space<vmem>>, vector<1x1x352xf32>
    %61 = vector.shape_cast %60 : vector<1x1x352xf32> to vector<1x352xf32>
    %c20 = arith.constant 20 : index
    %c0_69 = arith.constant 0 : index
    %62 = vector.load %arg6[%c20, %c0_69] : memref<49x352xf32, #tpu.memory_space<vmem>>, vector<1x352xf32>
    tpu.vector_store %arg6[%c20, %c0_69], %61 {strides = array<i32>} : memref<49x352xf32, #tpu.memory_space<vmem>>, vector<1x352xf32>,
    %c0_70 = arith.constant 0 : index
    %c0_71 = arith.constant 0 : index
    %c66 = arith.constant 66 : index
    %63 = vector.load %arg2[%c0_70, %c0_71, %c66] : memref<1x1x512xf32, #tpu.memory_space<vmem>>, vector<1x1x352xf32>
    %64 = vector.shape_cast %63 : vector<1x1x352xf32> to vector<1x352xf32>
    %c21 = arith.constant 21 : index
    %c0_72 = arith.constant 0 : index
    %65 = vector.load %arg6[%c21, %c0_72] : memref<49x352xf32, #tpu.memory_space<vmem>>, vector<1x352xf32>
    tpu.vector_store %arg6[%c21, %c0_72], %64 {strides = array<i32>} : memref<49x352xf32, #tpu.memory_space<vmem>>, vector<1x352xf32>,
    %c0_73 = arith.constant 0 : index
    %c0_74 = arith.constant 0 : index
    %c67 = arith.constant 67 : index
    %66 = vector.load %arg2[%c0_73, %c0_74, %c67] : memref<1x1x512xf32, #tpu.memory_space<vmem>>, vector<1x1x352xf32>
    %67 = vector.shape_cast %66 : vector<1x1x352xf32> to vector<1x352xf32>
    %c22_75 = arith.constant 22 : index
    %c0_76 = arith.constant 0 : index
    %68 = vector.load %arg6[%c22_75, %c0_76] : memref<49x352xf32, #tpu.memory_space<vmem>>, vector<1x352xf32>
    tpu.vector_store %arg6[%c22_75, %c0_76], %67 {strides = array<i32>} : memref<49x352xf32, #tpu.memory_space<vmem>>, vector<1x352xf32>,
    %c0_77 = arith.constant 0 : index
    %c0_78 = arith.constant 0 : index
    %c68 = arith.constant 68 : index
    %69 = vector.load %arg2[%c0_77, %c0_78, %c68] : memref<1x1x512xf32, #tpu.memory_space<vmem>>, vector<1x1x352xf32>
    %70 = vector.shape_cast %69 : vector<1x1x352xf32> to vector<1x352xf32>
    %c23_79 = arith.constant 23 : index
    %c0_80 = arith.constant 0 : index
    %71 = vector.load %arg6[%c23_79, %c0_80] : memref<49x352xf32, #tpu.memory_space<vmem>>, vector<1x352xf32>
    tpu.vector_store %arg6[%c23_79, %c0_80], %70 {strides = array<i32>} : memref<49x352xf32, #tpu.memory_space<vmem>>, vector<1x352xf32>,
    %c0_81 = arith.constant 0 : index
    %c0_82 = arith.constant 0 : index
    %c69 = arith.constant 69 : index
    %72 = vector.load %arg2[%c0_81, %c0_82, %c69] : memref<1x1x512xf32, #tpu.memory_space<vmem>>, vector<1x1x352xf32>
    %73 = vector.shape_cast %72 : vector<1x1x352xf32> to vector<1x352xf32>
    %c24_83 = arith.constant 24 : index
    %c0_84 = arith.constant 0 : index
    %74 = vector.load %arg6[%c24_83, %c0_84] : memref<49x352xf32, #tpu.memory_space<vmem>>, vector<1x352xf32>
    tpu.vector_store %arg6[%c24_83, %c0_84], %73 {strides = array<i32>} : memref<49x352xf32, #tpu.memory_space<vmem>>, vector<1x352xf32>,
    %c0_85 = arith.constant 0 : index
    %c0_86 = arith.constant 0 : index
    %c70 = arith.constant 70 : index
    %75 = vector.load %arg2[%c0_85, %c0_86, %c70] : memref<1x1x512xf32, #tpu.memory_space<vmem>>, vector<1x1x352xf32>
    %76 = vector.shape_cast %75 : vector<1x1x352xf32> to vector<1x352xf32>
    %c25_87 = arith.constant 25 : index
    %c0_88 = arith.constant 0 : index
    %77 = vector.load %arg6[%c25_87, %c0_88] : memref<49x352xf32, #tpu.memory_space<vmem>>, vector<1x352xf32>
    tpu.vector_store %arg6[%c25_87, %c0_88], %76 {strides = array<i32>} : memref<49x352xf32, #tpu.memory_space<vmem>>, vector<1x352xf32>,
    %c0_89 = arith.constant 0 : index
    %c0_90 = arith.constant 0 : index
    %c71 = arith.constant 71 : index
    %78 = vector.load %arg2[%c0_89, %c0_90, %c71] : memref<1x1x512xf32, #tpu.memory_space<vmem>>, vector<1x1x352xf32>
    %79 = vector.shape_cast %78 : vector<1x1x352xf32> to vector<1x352xf32>
    %c26_91 = arith.constant 26 : index
    %c0_92 = arith.constant 0 : index
    %80 = vector.load %arg6[%c26_91, %c0_92] : memref<49x352xf32, #tpu.memory_space<vmem>>, vector<1x352xf32>
    tpu.vector_store %arg6[%c26_91, %c0_92], %79 {strides = array<i32>} : memref<49x352xf32, #tpu.memory_space<vmem>>, vector<1x352xf32>,
    %c0_93 = arith.constant 0 : index
    %c0_94 = arith.constant 0 : index
    %c72 = arith.constant 72 : index
    %81 = vector.load %arg2[%c0_93, %c0_94, %c72] : memref<1x1x512xf32, #tpu.memory_space<vmem>>, vector<1x1x352xf32>
    %82 = vector.shape_cast %81 : vector<1x1x352xf32> to vector<1x352xf32>
    %c27_95 = arith.constant 27 : index
    %c0_96 = arith.constant 0 : index
    %83 = vector.load %arg6[%c27_95, %c0_96] : memref<49x352xf32, #tpu.memory_space<vmem>>, vector<1x352xf32>
    tpu.vector_store %arg6[%c27_95, %c0_96], %82 {strides = array<i32>} : memref<49x352xf32, #tpu.memory_space<vmem>>, vector<1x352xf32>,
    %c0_97 = arith.constant 0 : index
    %c0_98 = arith.constant 0 : index
    %c88 = arith.constant 88 : index
    %84 = vector.load %arg2[%c0_97, %c0_98, %c88] : memref<1x1x512xf32, #tpu.memory_space<vmem>>, vector<1x1x352xf32>
    %85 = vector.shape_cast %84 : vector<1x1x352xf32> to vector<1x352xf32>
    %c28_99 = arith.constant 28 : index
    %c0_100 = arith.constant 0 : index
    %86 = vector.load %arg6[%c28_99, %c0_100] : memref<49x352xf32, #tpu.memory_space<vmem>>, vector<1x352xf32>
    tpu.vector_store %arg6[%c28_99, %c0_100], %85 {strides = array<i32>} : memref<49x352xf32, #tpu.memory_space<vmem>>, vector<1x352xf32>,
    %c0_101 = arith.constant 0 : index
    %c0_102 = arith.constant 0 : index
    %c89 = arith.constant 89 : index
    %87 = vector.load %arg2[%c0_101, %c0_102, %c89] : memref<1x1x512xf32, #tpu.memory_space<vmem>>, vector<1x1x352xf32>
    %88 = vector.shape_cast %87 : vector<1x1x352xf32> to vector<1x352xf32>
    %c29 = arith.constant 29 : index
    %c0_103 = arith.constant 0 : index
    %89 = vector.load %arg6[%c29, %c0_103] : memref<49x352xf32, #tpu.memory_space<vmem>>, vector<1x352xf32>
    tpu.vector_store %arg6[%c29, %c0_103], %88 {strides = array<i32>} : memref<49x352xf32, #tpu.memory_space<vmem>>, vector<1x352xf32>,
    %c0_104 = arith.constant 0 : index
    %c0_105 = arith.constant 0 : index
    %c90 = arith.constant 90 : index
    %90 = vector.load %arg2[%c0_104, %c0_105, %c90] : memref<1x1x512xf32, #tpu.memory_space<vmem>>, vector<1x1x352xf32>
    %91 = vector.shape_cast %90 : vector<1x1x352xf32> to vector<1x352xf32>
    %c30 = arith.constant 30 : index
    %c0_106 = arith.constant 0 : index
    %92 = vector.load %arg6[%c30, %c0_106] : memref<49x352xf32, #tpu.memory_space<vmem>>, vector<1x352xf32>
    tpu.vector_store %arg6[%c30, %c0_106], %91 {strides = array<i32>} : memref<49x352xf32, #tpu.memory_space<vmem>>, vector<1x352xf32>,
    %c0_107 = arith.constant 0 : index
    %c0_108 = arith.constant 0 : index
    %c91 = arith.constant 91 : index
    %93 = vector.load %arg2[%c0_107, %c0_108, %c91] : memref<1x1x512xf32, #tpu.memory_space<vmem>>, vector<1x1x352xf32>
    %94 = vector.shape_cast %93 : vector<1x1x352xf32> to vector<1x352xf32>
    %c31 = arith.constant 31 : index
    %c0_109 = arith.constant 0 : index
    %95 = vector.load %arg6[%c31, %c0_109] : memref<49x352xf32, #tpu.memory_space<vmem>>, vector<1x352xf32>
    tpu.vector_store %arg6[%c31, %c0_109], %94 {strides = array<i32>} : memref<49x352xf32, #tpu.memory_space<vmem>>, vector<1x352xf32>,
    %c0_110 = arith.constant 0 : index
    %c0_111 = arith.constant 0 : index
    %c92 = arith.constant 92 : index
    %96 = vector.load %arg2[%c0_110, %c0_111, %c92] : memref<1x1x512xf32, #tpu.memory_space<vmem>>, vector<1x1x352xf32>
    %97 = vector.shape_cast %96 : vector<1x1x352xf32> to vector<1x352xf32>
    %c32 = arith.constant 32 : index
    %c0_112 = arith.constant 0 : index
    %98 = vector.load %arg6[%c32, %c0_112] : memref<49x352xf32, #tpu.memory_space<vmem>>, vector<1x352xf32>
    tpu.vector_store %arg6[%c32, %c0_112], %97 {strides = array<i32>} : memref<49x352xf32, #tpu.memory_space<vmem>>, vector<1x352xf32>,
    %c0_113 = arith.constant 0 : index
    %c0_114 = arith.constant 0 : index
    %c93 = arith.constant 93 : index
    %99 = vector.load %arg2[%c0_113, %c0_114, %c93] : memref<1x1x512xf32, #tpu.memory_space<vmem>>, vector<1x1x352xf32>
    %100 = vector.shape_cast %99 : vector<1x1x352xf32> to vector<1x352xf32>
    %c33 = arith.constant 33 : index
    %c0_115 = arith.constant 0 : index
    %101 = vector.load %arg6[%c33, %c0_115] : memref<49x352xf32, #tpu.memory_space<vmem>>, vector<1x352xf32>
    tpu.vector_store %arg6[%c33, %c0_115], %100 {strides = array<i32>} : memref<49x352xf32, #tpu.memory_space<vmem>>, vector<1x352xf32>,
    %c0_116 = arith.constant 0 : index
    %c0_117 = arith.constant 0 : index
    %c94 = arith.constant 94 : index
    %102 = vector.load %arg2[%c0_116, %c0_117, %c94] : memref<1x1x512xf32, #tpu.memory_space<vmem>>, vector<1x1x352xf32>
    %103 = vector.shape_cast %102 : vector<1x1x352xf32> to vector<1x352xf32>
    %c34 = arith.constant 34 : index
    %c0_118 = arith.constant 0 : index
    %104 = vector.load %arg6[%c34, %c0_118] : memref<49x352xf32, #tpu.memory_space<vmem>>, vector<1x352xf32>
    tpu.vector_store %arg6[%c34, %c0_118], %103 {strides = array<i32>} : memref<49x352xf32, #tpu.memory_space<vmem>>, vector<1x352xf32>,
    %c0_119 = arith.constant 0 : index
    %c0_120 = arith.constant 0 : index
    %c110 = arith.constant 110 : index
    %105 = vector.load %arg2[%c0_119, %c0_120, %c110] : memref<1x1x512xf32, #tpu.memory_space<vmem>>, vector<1x1x352xf32>
    %106 = vector.shape_cast %105 : vector<1x1x352xf32> to vector<1x352xf32>
    %c35 = arith.constant 35 : index
    %c0_121 = arith.constant 0 : index
    %107 = vector.load %arg6[%c35, %c0_121] : memref<49x352xf32, #tpu.memory_space<vmem>>, vector<1x352xf32>
    tpu.vector_store %arg6[%c35, %c0_121], %106 {strides = array<i32>} : memref<49x352xf32, #tpu.memory_space<vmem>>, vector<1x352xf32>,
    %c0_122 = arith.constant 0 : index
    %c0_123 = arith.constant 0 : index
    %c111 = arith.constant 111 : index
    %108 = vector.load %arg2[%c0_122, %c0_123, %c111] : memref<1x1x512xf32, #tpu.memory_space<vmem>>, vector<1x1x352xf32>
    %109 = vector.shape_cast %108 : vector<1x1x352xf32> to vector<1x352xf32>
    %c36 = arith.constant 36 : index
    %c0_124 = arith.constant 0 : index
    %110 = vector.load %arg6[%c36, %c0_124] : memref<49x352xf32, #tpu.memory_space<vmem>>, vector<1x352xf32>
    tpu.vector_store %arg6[%c36, %c0_124], %109 {strides = array<i32>} : memref<49x352xf32, #tpu.memory_space<vmem>>, vector<1x352xf32>,
    %c0_125 = arith.constant 0 : index
    %c0_126 = arith.constant 0 : index
    %c112 = arith.constant 112 : index
    %111 = vector.load %arg2[%c0_125, %c0_126, %c112] : memref<1x1x512xf32, #tpu.memory_space<vmem>>, vector<1x1x352xf32>
    %112 = vector.shape_cast %111 : vector<1x1x352xf32> to vector<1x352xf32>
    %c37 = arith.constant 37 : index
    %c0_127 = arith.constant 0 : index
    %113 = vector.load %arg6[%c37, %c0_127] : memref<49x352xf32, #tpu.memory_space<vmem>>, vector<1x352xf32>
    tpu.vector_store %arg6[%c37, %c0_127], %112 {strides = array<i32>} : memref<49x352xf32, #tpu.memory_space<vmem>>, vector<1x352xf32>,
    %c0_128 = arith.constant 0 : index
    %c0_129 = arith.constant 0 : index
    %c113 = arith.constant 113 : index
    %114 = vector.load %arg2[%c0_128, %c0_129, %c113] : memref<1x1x512xf32, #tpu.memory_space<vmem>>, vector<1x1x352xf32>
    %115 = vector.shape_cast %114 : vector<1x1x352xf32> to vector<1x352xf32>
    %c38 = arith.constant 38 : index
    %c0_130 = arith.constant 0 : index
    %116 = vector.load %arg6[%c38, %c0_130] : memref<49x352xf32, #tpu.memory_space<vmem>>, vector<1x352xf32>
    tpu.vector_store %arg6[%c38, %c0_130], %115 {strides = array<i32>} : memref<49x352xf32, #tpu.memory_space<vmem>>, vector<1x352xf32>,
    %c0_131 = arith.constant 0 : index
    %c0_132 = arith.constant 0 : index
    %c114 = arith.constant 114 : index
    %117 = vector.load %arg2[%c0_131, %c0_132, %c114] : memref<1x1x512xf32, #tpu.memory_space<vmem>>, vector<1x1x352xf32>
    %118 = vector.shape_cast %117 : vector<1x1x352xf32> to vector<1x352xf32>
    %c39 = arith.constant 39 : index
    %c0_133 = arith.constant 0 : index
    %119 = vector.load %arg6[%c39, %c0_133] : memref<49x352xf32, #tpu.memory_space<vmem>>, vector<1x352xf32>
    tpu.vector_store %arg6[%c39, %c0_133], %118 {strides = array<i32>} : memref<49x352xf32, #tpu.memory_space<vmem>>, vector<1x352xf32>,
    %c0_134 = arith.constant 0 : index
    %c0_135 = arith.constant 0 : index
    %c115 = arith.constant 115 : index
    %120 = vector.load %arg2[%c0_134, %c0_135, %c115] : memref<1x1x512xf32, #tpu.memory_space<vmem>>, vector<1x1x352xf32>
    %121 = vector.shape_cast %120 : vector<1x1x352xf32> to vector<1x352xf32>
    %c40 = arith.constant 40 : index
    %c0_136 = arith.constant 0 : index
    %122 = vector.load %arg6[%c40, %c0_136] : memref<49x352xf32, #tpu.memory_space<vmem>>, vector<1x352xf32>
    tpu.vector_store %arg6[%c40, %c0_136], %121 {strides = array<i32>} : memref<49x352xf32, #tpu.memory_space<vmem>>, vector<1x352xf32>,
    %c0_137 = arith.constant 0 : index
    %c0_138 = arith.constant 0 : index
    %c116 = arith.constant 116 : index
    %123 = vector.load %arg2[%c0_137, %c0_138, %c116] : memref<1x1x512xf32, #tpu.memory_space<vmem>>, vector<1x1x352xf32>
    %124 = vector.shape_cast %123 : vector<1x1x352xf32> to vector<1x352xf32>
    %c41 = arith.constant 41 : index
    %c0_139 = arith.constant 0 : index
    %125 = vector.load %arg6[%c41, %c0_139] : memref<49x352xf32, #tpu.memory_space<vmem>>, vector<1x352xf32>
    tpu.vector_store %arg6[%c41, %c0_139], %124 {strides = array<i32>} : memref<49x352xf32, #tpu.memory_space<vmem>>, vector<1x352xf32>,
    %c0_140 = arith.constant 0 : index
    %c0_141 = arith.constant 0 : index
    %c132 = arith.constant 132 : index
    %126 = vector.load %arg2[%c0_140, %c0_141, %c132] : memref<1x1x512xf32, #tpu.memory_space<vmem>>, vector<1x1x352xf32>
    %127 = vector.shape_cast %126 : vector<1x1x352xf32> to vector<1x352xf32>
    %c42 = arith.constant 42 : index
    %c0_142 = arith.constant 0 : index
    %128 = vector.load %arg6[%c42, %c0_142] : memref<49x352xf32, #tpu.memory_space<vmem>>, vector<1x352xf32>
    tpu.vector_store %arg6[%c42, %c0_142], %127 {strides = array<i32>} : memref<49x352xf32, #tpu.memory_space<vmem>>, vector<1x352xf32>,
    %c0_143 = arith.constant 0 : index
    %c0_144 = arith.constant 0 : index
    %c133 = arith.constant 133 : index
    %129 = vector.load %arg2[%c0_143, %c0_144, %c133] : memref<1x1x512xf32, #tpu.memory_space<vmem>>, vector<1x1x352xf32>
    %130 = vector.shape_cast %129 : vector<1x1x352xf32> to vector<1x352xf32>
    %c43 = arith.constant 43 : index
    %c0_145 = arith.constant 0 : index
    %131 = vector.load %arg6[%c43, %c0_145] : memref<49x352xf32, #tpu.memory_space<vmem>>, vector<1x352xf32>
    tpu.vector_store %arg6[%c43, %c0_145], %130 {strides = array<i32>} : memref<49x352xf32, #tpu.memory_space<vmem>>, vector<1x352xf32>,
    %c0_146 = arith.constant 0 : index
    %c0_147 = arith.constant 0 : index
    %c134 = arith.constant 134 : index
    %132 = vector.load %arg2[%c0_146, %c0_147, %c134] : memref<1x1x512xf32, #tpu.memory_space<vmem>>, vector<1x1x352xf32>
    %133 = vector.shape_cast %132 : vector<1x1x352xf32> to vector<1x352xf32>
    %c44_148 = arith.constant 44 : index
    %c0_149 = arith.constant 0 : index
    %134 = vector.load %arg6[%c44_148, %c0_149] : memref<49x352xf32, #tpu.memory_space<vmem>>, vector<1x352xf32>
    tpu.vector_store %arg6[%c44_148, %c0_149], %133 {strides = array<i32>} : memref<49x352xf32, #tpu.memory_space<vmem>>, vector<1x352xf32>,
    %c0_150 = arith.constant 0 : index
    %c0_151 = arith.constant 0 : index
    %c135 = arith.constant 135 : index
    %135 = vector.load %arg2[%c0_150, %c0_151, %c135] : memref<1x1x512xf32, #tpu.memory_space<vmem>>, vector<1x1x352xf32>
    %136 = vector.shape_cast %135 : vector<1x1x352xf32> to vector<1x352xf32>
    %c45_152 = arith.constant 45 : index
    %c0_153 = arith.constant 0 : index
    %137 = vector.load %arg6[%c45_152, %c0_153] : memref<49x352xf32, #tpu.memory_space<vmem>>, vector<1x352xf32>
    tpu.vector_store %arg6[%c45_152, %c0_153], %136 {strides = array<i32>} : memref<49x352xf32, #tpu.memory_space<vmem>>, vector<1x352xf32>,
    %c0_154 = arith.constant 0 : index
    %c0_155 = arith.constant 0 : index
    %c136 = arith.constant 136 : index
    %138 = vector.load %arg2[%c0_154, %c0_155, %c136] : memref<1x1x512xf32, #tpu.memory_space<vmem>>, vector<1x1x352xf32>
    %139 = vector.shape_cast %138 : vector<1x1x352xf32> to vector<1x352xf32>
    %c46_156 = arith.constant 46 : index
    %c0_157 = arith.constant 0 : index
    %140 = vector.load %arg6[%c46_156, %c0_157] : memref<49x352xf32, #tpu.memory_space<vmem>>, vector<1x352xf32>
    tpu.vector_store %arg6[%c46_156, %c0_157], %139 {strides = array<i32>} : memref<49x352xf32, #tpu.memory_space<vmem>>, vector<1x352xf32>,
    %c0_158 = arith.constant 0 : index
    %c0_159 = arith.constant 0 : index
    %c137 = arith.constant 137 : index
    %141 = vector.load %arg2[%c0_158, %c0_159, %c137] : memref<1x1x512xf32, #tpu.memory_space<vmem>>, vector<1x1x352xf32>
    %142 = vector.shape_cast %141 : vector<1x1x352xf32> to vector<1x352xf32>
    %c47_160 = arith.constant 47 : index
    %c0_161 = arith.constant 0 : index
    %143 = vector.load %arg6[%c47_160, %c0_161] : memref<49x352xf32, #tpu.memory_space<vmem>>, vector<1x352xf32>
    tpu.vector_store %arg6[%c47_160, %c0_161], %142 {strides = array<i32>} : memref<49x352xf32, #tpu.memory_space<vmem>>, vector<1x352xf32>,
    %c0_162 = arith.constant 0 : index
    %c0_163 = arith.constant 0 : index
    %c138 = arith.constant 138 : index
    %144 = vector.load %arg2[%c0_162, %c0_163, %c138] : memref<1x1x512xf32, #tpu.memory_space<vmem>>, vector<1x1x352xf32>
    %145 = vector.shape_cast %144 : vector<1x1x352xf32> to vector<1x352xf32>
    %c48_164 = arith.constant 48 : index
    %c0_165 = arith.constant 0 : index
    %146 = vector.load %arg6[%c48_164, %c0_165] : memref<49x352xf32, #tpu.memory_space<vmem>>, vector<1x352xf32>
    tpu.vector_store %arg6[%c48_164, %c0_165], %145 {strides = array<i32>} : memref<49x352xf32, #tpu.memory_space<vmem>>, vector<1x352xf32>,
    %c0_166 = arith.constant 0 : index
    %c0_167 = arith.constant 0 : index
    %147 = vector.load %arg3[%c0_166, %c0_167] : memref<40x49xf32, #tpu.memory_space<vmem>>, vector<40x49xf32>
    %c0_168 = arith.constant 0 : index
    %c0_169 = arith.constant 0 : index
    %148 = vector.load %arg6[%c0_168, %c0_169] : memref<49x352xf32, #tpu.memory_space<vmem>>, vector<49x352xf32>
    %cst = arith.constant dense<0.000000e+00> : vector<40x352xf32>
    %149 = tpu.matmul %147, %148, %cst {dimension_numbers = #tpu.dot_dimension_numbers<[1], [0], [0], [1], [0, 0, 1, 1], [], []>} : vector<40x49xf32>, vector<49x352xf32>, vector<40x352xf32> -> vector<40x352xf32>
    %c0_170 = arith.constant 0 : index
    %c0_171 = arith.constant 0 : index
    %150 = vector.load %arg4[%c0_170, %c0_171] : memref<1x352xf32, #tpu.memory_space<vmem>>, vector<1x352xf32>
    %151 = vector.broadcast %150 : vector<1x352xf32> to vector<40x352xf32>
    %152 = arith.mulf %149, %151 : vector<40x352xf32>
    %cst_172 = arith.constant dense<0.000000e+00> : vector<40xf32>
    %153 = vector.multi_reduction <add>, %152, %cst_172 [1] : vector<40x352xf32> to vector<40xf32>
    %154 = vector.shape_cast %153 : vector<40xf32> to vector<40x1xf32>
    %cst_173 = arith.constant 3.906250e-03 : f32
    %155 = vector.broadcast %cst_173 : f32 to vector<40x1xf32>
    %156 = arith.mulf %154, %155 : vector<40x1xf32>
    %157 = vector.broadcast %156 : vector<40x1xf32> to vector<40x352xf32>
    %158 = arith.subf %149, %157 : vector<40x352xf32>
    %159 = vector.broadcast %150 : vector<1x352xf32> to vector<40x352xf32>
    %160 = arith.mulf %158, %159 : vector<40x352xf32>
    %161 = arith.mulf %160, %160 : vector<40x352xf32>
    %cst_174 = arith.constant dense<0.000000e+00> : vector<40xf32>
    %162 = vector.multi_reduction <add>, %161, %cst_174 [1] : vector<40x352xf32> to vector<40xf32>
    %163 = vector.shape_cast %162 : vector<40xf32> to vector<40x1xf32>
    %c0_175 = arith.constant 0 : index
    %c0_176 = arith.constant 0 : index
    %c0_177 = arith.constant 0 : index
    %c0_178 = arith.constant 0 : index
    %164 = vector.load %arg5[%c0_175, %c0_176, %c0_177, %c0_178] : memref<1x1x40x2xf32, #tpu.memory_space<vmem>>, vector<1x1x40x1xf32>
    %165 = vector.shape_cast %164 : vector<1x1x40x1xf32> to vector<40x1xf32>
    %166 = vector.shape_cast %154 : vector<40x1xf32> to vector<1x1x40x1xf32>
    tpu.vector_store %arg5[%c0_175, %c0_176, %c0_177, %c0_178], %166 {strides = array<i32>} : memref<1x1x40x2xf32, #tpu.memory_space<vmem>>, vector<1x1x40x1xf32>,
    %c0_179 = arith.constant 0 : index
    %c0_180 = arith.constant 0 : index
    %c0_181 = arith.constant 0 : index
    %c1_182 = arith.constant 1 : index
    %167 = vector.load %arg5[%c0_179, %c0_180, %c0_181, %c1_182] : memref<1x1x40x2xf32, #tpu.memory_space<vmem>>, vector<1x1x40x1xf32>
    %168 = vector.shape_cast %167 : vector<1x1x40x1xf32> to vector<40x1xf32>
    %169 = vector.shape_cast %163 : vector<40x1xf32> to vector<1x1x40x1xf32>
    tpu.vector_store %arg5[%c0_179, %c0_180, %c0_181, %c1_182], %169 {strides = array<i32>} : memref<1x1x40x2xf32, #tpu.memory_space<vmem>>, vector<1x1x40x1xf32>,
    return
  }
  func.func @transform_0(%arg0: i32, %arg1: i32) -> (i32, i32, i32) {
    %c0_i32 = arith.constant 0 : i32
    %c0_i32_0 = arith.constant 0 : i32
    %c0_i32_1 = arith.constant 0 : i32
    return %arg0, %c0_i32, %c0_i32_0 : i32, i32, i32
  }
  func.func @transform_1(%arg0: i32, %arg1: i32) -> (i32, i32) {
    %c0_i32 = arith.constant 0 : i32
    %c0_i32_0 = arith.constant 0 : i32
    %c0_i32_1 = arith.constant 0 : i32
    return %c0_i32, %c0_i32_0 : i32, i32
  }
  func.func @transform_2(%arg0: i32, %arg1: i32) -> (i32, i32) {
    %c0_i32 = arith.constant 0 : i32
    %c0_i32_0 = arith.constant 0 : i32
    %c0_i32_1 = arith.constant 0 : i32
    return %c0_i32, %c0_i32_0 : i32, i32
  }
  func.func @transform_3(%arg0: i32, %arg1: i32) -> (i32, i32, i32, i32) {
    %c0_i32 = arith.constant 0 : i32
    %c0_i32_0 = arith.constant 0 : i32
    %c0_i32_1 = arith.constant 0 : i32
    return %arg0, %arg1, %c0_i32, %c0_i32_0 : i32, i32, i32, i32
  }
}

module attributes {stable_mosaic.version = 11 : i64} {
  func.func @kernel(%arg0: i32, %arg1: i32, %arg2: memref<1x1x512xf32, #tpu.memory_space<vmem>>, %arg3: memref<40x49xf32, #tpu.memory_space<vmem>>, %arg4: memref<2x40x2xf32, #tpu.memory_space<vmem>>, %arg5: memref<40x1xf32, #tpu.memory_space<vmem>>, %arg6: memref<40x1xf32, #tpu.memory_space<vmem>>, %arg7: memref<1x1x36x352xf32, #tpu.memory_space<vmem>>, %arg8: memref<49x352xf32, #tpu.memory_space<vmem>>) attributes {dimension_semantics = [#tpu.dimension_semantics<parallel>, #tpu.dimension_semantics<parallel>], iteration_bounds = array<i64: 2, 1>, scalar_prefetch = 0 : i64, scratch_operands = 1 : i64, tpu.core_type = #tpu.core_type<tc>, window_params = [{transform_indices = @transform_0, window_bounds = array<i64: 1, 1, 512>}, {pipeline_mode = #tpu.pipeline_mode<synchronous>, transform_indices = @transform_1, window_bounds = array<i64: 40, 49>}, {pipeline_mode = #tpu.pipeline_mode<synchronous>, transform_indices = @transform_2, window_bounds = array<i64: 2, 40, 2>}, {pipeline_mode = #tpu.pipeline_mode<synchronous>, transform_indices = @transform_3, window_bounds = array<i64: 40, 1>}, {pipeline_mode = #tpu.pipeline_mode<synchronous>, transform_indices = @transform_4, window_bounds = array<i64: 40, 1>}, {transform_indices = @transform_5, window_bounds = array<i64: 1, 1, 36, 352>}]} {
    %c0 = arith.constant 0 : index
    %c0_0 = arith.constant 0 : index
    %c0_1 = arith.constant 0 : index
    %0 = vector.load %arg2[%c0, %c0_0, %c0_1] : memref<1x1x512xf32, #tpu.memory_space<vmem>>, vector<1x1x352xf32>
    %1 = vector.shape_cast %0 : vector<1x1x352xf32> to vector<1x352xf32>
    %c0_2 = arith.constant 0 : index
    %c0_3 = arith.constant 0 : index
    %2 = vector.load %arg8[%c0_2, %c0_3] : memref<49x352xf32, #tpu.memory_space<vmem>>, vector<1x352xf32>
    tpu.vector_store %arg8[%c0_2, %c0_3], %1 {strides = array<i32>} : memref<49x352xf32, #tpu.memory_space<vmem>>, vector<1x352xf32>,
    %c0_4 = arith.constant 0 : index
    %c0_5 = arith.constant 0 : index
    %c1 = arith.constant 1 : index
    %3 = vector.load %arg2[%c0_4, %c0_5, %c1] : memref<1x1x512xf32, #tpu.memory_space<vmem>>, vector<1x1x352xf32>
    %4 = vector.shape_cast %3 : vector<1x1x352xf32> to vector<1x352xf32>
    %c1_6 = arith.constant 1 : index
    %c0_7 = arith.constant 0 : index
    %5 = vector.load %arg8[%c1_6, %c0_7] : memref<49x352xf32, #tpu.memory_space<vmem>>, vector<1x352xf32>
    tpu.vector_store %arg8[%c1_6, %c0_7], %4 {strides = array<i32>} : memref<49x352xf32, #tpu.memory_space<vmem>>, vector<1x352xf32>,
    %c0_8 = arith.constant 0 : index
    %c0_9 = arith.constant 0 : index
    %c2 = arith.constant 2 : index
    %6 = vector.load %arg2[%c0_8, %c0_9, %c2] : memref<1x1x512xf32, #tpu.memory_space<vmem>>, vector<1x1x352xf32>
    %7 = vector.shape_cast %6 : vector<1x1x352xf32> to vector<1x352xf32>
    %c2_10 = arith.constant 2 : index
    %c0_11 = arith.constant 0 : index
    %8 = vector.load %arg8[%c2_10, %c0_11] : memref<49x352xf32, #tpu.memory_space<vmem>>, vector<1x352xf32>
    tpu.vector_store %arg8[%c2_10, %c0_11], %7 {strides = array<i32>} : memref<49x352xf32, #tpu.memory_space<vmem>>, vector<1x352xf32>,
    %c0_12 = arith.constant 0 : index
    %c0_13 = arith.constant 0 : index
    %c3 = arith.constant 3 : index
    %9 = vector.load %arg2[%c0_12, %c0_13, %c3] : memref<1x1x512xf32, #tpu.memory_space<vmem>>, vector<1x1x352xf32>
    %10 = vector.shape_cast %9 : vector<1x1x352xf32> to vector<1x352xf32>
    %c3_14 = arith.constant 3 : index
    %c0_15 = arith.constant 0 : index
    %11 = vector.load %arg8[%c3_14, %c0_15] : memref<49x352xf32, #tpu.memory_space<vmem>>, vector<1x352xf32>
    tpu.vector_store %arg8[%c3_14, %c0_15], %10 {strides = array<i32>} : memref<49x352xf32, #tpu.memory_space<vmem>>, vector<1x352xf32>,
    %c0_16 = arith.constant 0 : index
    %c0_17 = arith.constant 0 : index
    %c4 = arith.constant 4 : index
    %12 = vector.load %arg2[%c0_16, %c0_17, %c4] : memref<1x1x512xf32, #tpu.memory_space<vmem>>, vector<1x1x352xf32>
    %13 = vector.shape_cast %12 : vector<1x1x352xf32> to vector<1x352xf32>
    %c4_18 = arith.constant 4 : index
    %c0_19 = arith.constant 0 : index
    %14 = vector.load %arg8[%c4_18, %c0_19] : memref<49x352xf32, #tpu.memory_space<vmem>>, vector<1x352xf32>
    tpu.vector_store %arg8[%c4_18, %c0_19], %13 {strides = array<i32>} : memref<49x352xf32, #tpu.memory_space<vmem>>, vector<1x352xf32>,
    %c0_20 = arith.constant 0 : index
    %c0_21 = arith.constant 0 : index
    %c5 = arith.constant 5 : index
    %15 = vector.load %arg2[%c0_20, %c0_21, %c5] : memref<1x1x512xf32, #tpu.memory_space<vmem>>, vector<1x1x352xf32>
    %16 = vector.shape_cast %15 : vector<1x1x352xf32> to vector<1x352xf32>
    %c5_22 = arith.constant 5 : index
    %c0_23 = arith.constant 0 : index
    %17 = vector.load %arg8[%c5_22, %c0_23] : memref<49x352xf32, #tpu.memory_space<vmem>>, vector<1x352xf32>
    tpu.vector_store %arg8[%c5_22, %c0_23], %16 {strides = array<i32>} : memref<49x352xf32, #tpu.memory_space<vmem>>, vector<1x352xf32>,
    %c0_24 = arith.constant 0 : index
    %c0_25 = arith.constant 0 : index
    %c6 = arith.constant 6 : index
    %18 = vector.load %arg2[%c0_24, %c0_25, %c6] : memref<1x1x512xf32, #tpu.memory_space<vmem>>, vector<1x1x352xf32>
    %19 = vector.shape_cast %18 : vector<1x1x352xf32> to vector<1x352xf32>
    %c6_26 = arith.constant 6 : index
    %c0_27 = arith.constant 0 : index
    %20 = vector.load %arg8[%c6_26, %c0_27] : memref<49x352xf32, #tpu.memory_space<vmem>>, vector<1x352xf32>
    tpu.vector_store %arg8[%c6_26, %c0_27], %19 {strides = array<i32>} : memref<49x352xf32, #tpu.memory_space<vmem>>, vector<1x352xf32>,
    %c0_28 = arith.constant 0 : index
    %c0_29 = arith.constant 0 : index
    %c22 = arith.constant 22 : index
    %21 = vector.load %arg2[%c0_28, %c0_29, %c22] : memref<1x1x512xf32, #tpu.memory_space<vmem>>, vector<1x1x352xf32>
    %22 = vector.shape_cast %21 : vector<1x1x352xf32> to vector<1x352xf32>
    %c7 = arith.constant 7 : index
    %c0_30 = arith.constant 0 : index
    %23 = vector.load %arg8[%c7, %c0_30] : memref<49x352xf32, #tpu.memory_space<vmem>>, vector<1x352xf32>
    tpu.vector_store %arg8[%c7, %c0_30], %22 {strides = array<i32>} : memref<49x352xf32, #tpu.memory_space<vmem>>, vector<1x352xf32>,
    %c0_31 = arith.constant 0 : index
    %c0_32 = arith.constant 0 : index
    %c23 = arith.constant 23 : index
    %24 = vector.load %arg2[%c0_31, %c0_32, %c23] : memref<1x1x512xf32, #tpu.memory_space<vmem>>, vector<1x1x352xf32>
    %25 = vector.shape_cast %24 : vector<1x1x352xf32> to vector<1x352xf32>
    %c8 = arith.constant 8 : index
    %c0_33 = arith.constant 0 : index
    %26 = vector.load %arg8[%c8, %c0_33] : memref<49x352xf32, #tpu.memory_space<vmem>>, vector<1x352xf32>
    tpu.vector_store %arg8[%c8, %c0_33], %25 {strides = array<i32>} : memref<49x352xf32, #tpu.memory_space<vmem>>, vector<1x352xf32>,
    %c0_34 = arith.constant 0 : index
    %c0_35 = arith.constant 0 : index
    %c24 = arith.constant 24 : index
    %27 = vector.load %arg2[%c0_34, %c0_35, %c24] : memref<1x1x512xf32, #tpu.memory_space<vmem>>, vector<1x1x352xf32>
    %28 = vector.shape_cast %27 : vector<1x1x352xf32> to vector<1x352xf32>
    %c9 = arith.constant 9 : index
    %c0_36 = arith.constant 0 : index
    %29 = vector.load %arg8[%c9, %c0_36] : memref<49x352xf32, #tpu.memory_space<vmem>>, vector<1x352xf32>
    tpu.vector_store %arg8[%c9, %c0_36], %28 {strides = array<i32>} : memref<49x352xf32, #tpu.memory_space<vmem>>, vector<1x352xf32>,
    %c0_37 = arith.constant 0 : index
    %c0_38 = arith.constant 0 : index
    %c25 = arith.constant 25 : index
    %30 = vector.load %arg2[%c0_37, %c0_38, %c25] : memref<1x1x512xf32, #tpu.memory_space<vmem>>, vector<1x1x352xf32>
    %31 = vector.shape_cast %30 : vector<1x1x352xf32> to vector<1x352xf32>
    %c10 = arith.constant 10 : index
    %c0_39 = arith.constant 0 : index
    %32 = vector.load %arg8[%c10, %c0_39] : memref<49x352xf32, #tpu.memory_space<vmem>>, vector<1x352xf32>
    tpu.vector_store %arg8[%c10, %c0_39], %31 {strides = array<i32>} : memref<49x352xf32, #tpu.memory_space<vmem>>, vector<1x352xf32>,
    %c0_40 = arith.constant 0 : index
    %c0_41 = arith.constant 0 : index
    %c26 = arith.constant 26 : index
    %33 = vector.load %arg2[%c0_40, %c0_41, %c26] : memref<1x1x512xf32, #tpu.memory_space<vmem>>, vector<1x1x352xf32>
    %34 = vector.shape_cast %33 : vector<1x1x352xf32> to vector<1x352xf32>
    %c11 = arith.constant 11 : index
    %c0_42 = arith.constant 0 : index
    %35 = vector.load %arg8[%c11, %c0_42] : memref<49x352xf32, #tpu.memory_space<vmem>>, vector<1x352xf32>
    tpu.vector_store %arg8[%c11, %c0_42], %34 {strides = array<i32>} : memref<49x352xf32, #tpu.memory_space<vmem>>, vector<1x352xf32>,
    %c0_43 = arith.constant 0 : index
    %c0_44 = arith.constant 0 : index
    %c27 = arith.constant 27 : index
    %36 = vector.load %arg2[%c0_43, %c0_44, %c27] : memref<1x1x512xf32, #tpu.memory_space<vmem>>, vector<1x1x352xf32>
    %37 = vector.shape_cast %36 : vector<1x1x352xf32> to vector<1x352xf32>
    %c12 = arith.constant 12 : index
    %c0_45 = arith.constant 0 : index
    %38 = vector.load %arg8[%c12, %c0_45] : memref<49x352xf32, #tpu.memory_space<vmem>>, vector<1x352xf32>
    tpu.vector_store %arg8[%c12, %c0_45], %37 {strides = array<i32>} : memref<49x352xf32, #tpu.memory_space<vmem>>, vector<1x352xf32>,
    %c0_46 = arith.constant 0 : index
    %c0_47 = arith.constant 0 : index
    %c28 = arith.constant 28 : index
    %39 = vector.load %arg2[%c0_46, %c0_47, %c28] : memref<1x1x512xf32, #tpu.memory_space<vmem>>, vector<1x1x352xf32>
    %40 = vector.shape_cast %39 : vector<1x1x352xf32> to vector<1x352xf32>
    %c13 = arith.constant 13 : index
    %c0_48 = arith.constant 0 : index
    %41 = vector.load %arg8[%c13, %c0_48] : memref<49x352xf32, #tpu.memory_space<vmem>>, vector<1x352xf32>
    tpu.vector_store %arg8[%c13, %c0_48], %40 {strides = array<i32>} : memref<49x352xf32, #tpu.memory_space<vmem>>, vector<1x352xf32>,
    %c0_49 = arith.constant 0 : index
    %c0_50 = arith.constant 0 : index
    %c44 = arith.constant 44 : index
    %42 = vector.load %arg2[%c0_49, %c0_50, %c44] : memref<1x1x512xf32, #tpu.memory_space<vmem>>, vector<1x1x352xf32>
    %43 = vector.shape_cast %42 : vector<1x1x352xf32> to vector<1x352xf32>
    %c14 = arith.constant 14 : index
    %c0_51 = arith.constant 0 : index
    %44 = vector.load %arg8[%c14, %c0_51] : memref<49x352xf32, #tpu.memory_space<vmem>>, vector<1x352xf32>
    tpu.vector_store %arg8[%c14, %c0_51], %43 {strides = array<i32>} : memref<49x352xf32, #tpu.memory_space<vmem>>, vector<1x352xf32>,
    %c0_52 = arith.constant 0 : index
    %c0_53 = arith.constant 0 : index
    %c45 = arith.constant 45 : index
    %45 = vector.load %arg2[%c0_52, %c0_53, %c45] : memref<1x1x512xf32, #tpu.memory_space<vmem>>, vector<1x1x352xf32>
    %46 = vector.shape_cast %45 : vector<1x1x352xf32> to vector<1x352xf32>
    %c15 = arith.constant 15 : index
    %c0_54 = arith.constant 0 : index
    %47 = vector.load %arg8[%c15, %c0_54] : memref<49x352xf32, #tpu.memory_space<vmem>>, vector<1x352xf32>
    tpu.vector_store %arg8[%c15, %c0_54], %46 {strides = array<i32>} : memref<49x352xf32, #tpu.memory_space<vmem>>, vector<1x352xf32>,
    %c0_55 = arith.constant 0 : index
    %c0_56 = arith.constant 0 : index
    %c46 = arith.constant 46 : index
    %48 = vector.load %arg2[%c0_55, %c0_56, %c46] : memref<1x1x512xf32, #tpu.memory_space<vmem>>, vector<1x1x352xf32>
    %49 = vector.shape_cast %48 : vector<1x1x352xf32> to vector<1x352xf32>
    %c16 = arith.constant 16 : index
    %c0_57 = arith.constant 0 : index
    %50 = vector.load %arg8[%c16, %c0_57] : memref<49x352xf32, #tpu.memory_space<vmem>>, vector<1x352xf32>
    tpu.vector_store %arg8[%c16, %c0_57], %49 {strides = array<i32>} : memref<49x352xf32, #tpu.memory_space<vmem>>, vector<1x352xf32>,
    %c0_58 = arith.constant 0 : index
    %c0_59 = arith.constant 0 : index
    %c47 = arith.constant 47 : index
    %51 = vector.load %arg2[%c0_58, %c0_59, %c47] : memref<1x1x512xf32, #tpu.memory_space<vmem>>, vector<1x1x352xf32>
    %52 = vector.shape_cast %51 : vector<1x1x352xf32> to vector<1x352xf32>
    %c17 = arith.constant 17 : index
    %c0_60 = arith.constant 0 : index
    %53 = vector.load %arg8[%c17, %c0_60] : memref<49x352xf32, #tpu.memory_space<vmem>>, vector<1x352xf32>
    tpu.vector_store %arg8[%c17, %c0_60], %52 {strides = array<i32>} : memref<49x352xf32, #tpu.memory_space<vmem>>, vector<1x352xf32>,
    %c0_61 = arith.constant 0 : index
    %c0_62 = arith.constant 0 : index
    %c48 = arith.constant 48 : index
    %54 = vector.load %arg2[%c0_61, %c0_62, %c48] : memref<1x1x512xf32, #tpu.memory_space<vmem>>, vector<1x1x352xf32>
    %55 = vector.shape_cast %54 : vector<1x1x352xf32> to vector<1x352xf32>
    %c18 = arith.constant 18 : index
    %c0_63 = arith.constant 0 : index
    %56 = vector.load %arg8[%c18, %c0_63] : memref<49x352xf32, #tpu.memory_space<vmem>>, vector<1x352xf32>
    tpu.vector_store %arg8[%c18, %c0_63], %55 {strides = array<i32>} : memref<49x352xf32, #tpu.memory_space<vmem>>, vector<1x352xf32>,
    %c0_64 = arith.constant 0 : index
    %c0_65 = arith.constant 0 : index
    %c49 = arith.constant 49 : index
    %57 = vector.load %arg2[%c0_64, %c0_65, %c49] : memref<1x1x512xf32, #tpu.memory_space<vmem>>, vector<1x1x352xf32>
    %58 = vector.shape_cast %57 : vector<1x1x352xf32> to vector<1x352xf32>
    %c19 = arith.constant 19 : index
    %c0_66 = arith.constant 0 : index
    %59 = vector.load %arg8[%c19, %c0_66] : memref<49x352xf32, #tpu.memory_space<vmem>>, vector<1x352xf32>
    tpu.vector_store %arg8[%c19, %c0_66], %58 {strides = array<i32>} : memref<49x352xf32, #tpu.memory_space<vmem>>, vector<1x352xf32>,
    %c0_67 = arith.constant 0 : index
    %c0_68 = arith.constant 0 : index
    %c50 = arith.constant 50 : index
    %60 = vector.load %arg2[%c0_67, %c0_68, %c50] : memref<1x1x512xf32, #tpu.memory_space<vmem>>, vector<1x1x352xf32>
    %61 = vector.shape_cast %60 : vector<1x1x352xf32> to vector<1x352xf32>
    %c20 = arith.constant 20 : index
    %c0_69 = arith.constant 0 : index
    %62 = vector.load %arg8[%c20, %c0_69] : memref<49x352xf32, #tpu.memory_space<vmem>>, vector<1x352xf32>
    tpu.vector_store %arg8[%c20, %c0_69], %61 {strides = array<i32>} : memref<49x352xf32, #tpu.memory_space<vmem>>, vector<1x352xf32>,
    %c0_70 = arith.constant 0 : index
    %c0_71 = arith.constant 0 : index
    %c66 = arith.constant 66 : index
    %63 = vector.load %arg2[%c0_70, %c0_71, %c66] : memref<1x1x512xf32, #tpu.memory_space<vmem>>, vector<1x1x352xf32>
    %64 = vector.shape_cast %63 : vector<1x1x352xf32> to vector<1x352xf32>
    %c21 = arith.constant 21 : index
    %c0_72 = arith.constant 0 : index
    %65 = vector.load %arg8[%c21, %c0_72] : memref<49x352xf32, #tpu.memory_space<vmem>>, vector<1x352xf32>
    tpu.vector_store %arg8[%c21, %c0_72], %64 {strides = array<i32>} : memref<49x352xf32, #tpu.memory_space<vmem>>, vector<1x352xf32>,
    %c0_73 = arith.constant 0 : index
    %c0_74 = arith.constant 0 : index
    %c67 = arith.constant 67 : index
    %66 = vector.load %arg2[%c0_73, %c0_74, %c67] : memref<1x1x512xf32, #tpu.memory_space<vmem>>, vector<1x1x352xf32>
    %67 = vector.shape_cast %66 : vector<1x1x352xf32> to vector<1x352xf32>
    %c22_75 = arith.constant 22 : index
    %c0_76 = arith.constant 0 : index
    %68 = vector.load %arg8[%c22_75, %c0_76] : memref<49x352xf32, #tpu.memory_space<vmem>>, vector<1x352xf32>
    tpu.vector_store %arg8[%c22_75, %c0_76], %67 {strides = array<i32>} : memref<49x352xf32, #tpu.memory_space<vmem>>, vector<1x352xf32>,
    %c0_77 = arith.constant 0 : index
    %c0_78 = arith.constant 0 : index
    %c68 = arith.constant 68 : index
    %69 = vector.load %arg2[%c0_77, %c0_78, %c68] : memref<1x1x512xf32, #tpu.memory_space<vmem>>, vector<1x1x352xf32>
    %70 = vector.shape_cast %69 : vector<1x1x352xf32> to vector<1x352xf32>
    %c23_79 = arith.constant 23 : index
    %c0_80 = arith.constant 0 : index
    %71 = vector.load %arg8[%c23_79, %c0_80] : memref<49x352xf32, #tpu.memory_space<vmem>>, vector<1x352xf32>
    tpu.vector_store %arg8[%c23_79, %c0_80], %70 {strides = array<i32>} : memref<49x352xf32, #tpu.memory_space<vmem>>, vector<1x352xf32>,
    %c0_81 = arith.constant 0 : index
    %c0_82 = arith.constant 0 : index
    %c69 = arith.constant 69 : index
    %72 = vector.load %arg2[%c0_81, %c0_82, %c69] : memref<1x1x512xf32, #tpu.memory_space<vmem>>, vector<1x1x352xf32>
    %73 = vector.shape_cast %72 : vector<1x1x352xf32> to vector<1x352xf32>
    %c24_83 = arith.constant 24 : index
    %c0_84 = arith.constant 0 : index
    %74 = vector.load %arg8[%c24_83, %c0_84] : memref<49x352xf32, #tpu.memory_space<vmem>>, vector<1x352xf32>
    tpu.vector_store %arg8[%c24_83, %c0_84], %73 {strides = array<i32>} : memref<49x352xf32, #tpu.memory_space<vmem>>, vector<1x352xf32>,
    %c0_85 = arith.constant 0 : index
    %c0_86 = arith.constant 0 : index
    %c70 = arith.constant 70 : index
    %75 = vector.load %arg2[%c0_85, %c0_86, %c70] : memref<1x1x512xf32, #tpu.memory_space<vmem>>, vector<1x1x352xf32>
    %76 = vector.shape_cast %75 : vector<1x1x352xf32> to vector<1x352xf32>
    %c25_87 = arith.constant 25 : index
    %c0_88 = arith.constant 0 : index
    %77 = vector.load %arg8[%c25_87, %c0_88] : memref<49x352xf32, #tpu.memory_space<vmem>>, vector<1x352xf32>
    tpu.vector_store %arg8[%c25_87, %c0_88], %76 {strides = array<i32>} : memref<49x352xf32, #tpu.memory_space<vmem>>, vector<1x352xf32>,
    %c0_89 = arith.constant 0 : index
    %c0_90 = arith.constant 0 : index
    %c71 = arith.constant 71 : index
    %78 = vector.load %arg2[%c0_89, %c0_90, %c71] : memref<1x1x512xf32, #tpu.memory_space<vmem>>, vector<1x1x352xf32>
    %79 = vector.shape_cast %78 : vector<1x1x352xf32> to vector<1x352xf32>
    %c26_91 = arith.constant 26 : index
    %c0_92 = arith.constant 0 : index
    %80 = vector.load %arg8[%c26_91, %c0_92] : memref<49x352xf32, #tpu.memory_space<vmem>>, vector<1x352xf32>
    tpu.vector_store %arg8[%c26_91, %c0_92], %79 {strides = array<i32>} : memref<49x352xf32, #tpu.memory_space<vmem>>, vector<1x352xf32>,
    %c0_93 = arith.constant 0 : index
    %c0_94 = arith.constant 0 : index
    %c72 = arith.constant 72 : index
    %81 = vector.load %arg2[%c0_93, %c0_94, %c72] : memref<1x1x512xf32, #tpu.memory_space<vmem>>, vector<1x1x352xf32>
    %82 = vector.shape_cast %81 : vector<1x1x352xf32> to vector<1x352xf32>
    %c27_95 = arith.constant 27 : index
    %c0_96 = arith.constant 0 : index
    %83 = vector.load %arg8[%c27_95, %c0_96] : memref<49x352xf32, #tpu.memory_space<vmem>>, vector<1x352xf32>
    tpu.vector_store %arg8[%c27_95, %c0_96], %82 {strides = array<i32>} : memref<49x352xf32, #tpu.memory_space<vmem>>, vector<1x352xf32>,
    %c0_97 = arith.constant 0 : index
    %c0_98 = arith.constant 0 : index
    %c88 = arith.constant 88 : index
    %84 = vector.load %arg2[%c0_97, %c0_98, %c88] : memref<1x1x512xf32, #tpu.memory_space<vmem>>, vector<1x1x352xf32>
    %85 = vector.shape_cast %84 : vector<1x1x352xf32> to vector<1x352xf32>
    %c28_99 = arith.constant 28 : index
    %c0_100 = arith.constant 0 : index
    %86 = vector.load %arg8[%c28_99, %c0_100] : memref<49x352xf32, #tpu.memory_space<vmem>>, vector<1x352xf32>
    tpu.vector_store %arg8[%c28_99, %c0_100], %85 {strides = array<i32>} : memref<49x352xf32, #tpu.memory_space<vmem>>, vector<1x352xf32>,
    %c0_101 = arith.constant 0 : index
    %c0_102 = arith.constant 0 : index
    %c89 = arith.constant 89 : index
    %87 = vector.load %arg2[%c0_101, %c0_102, %c89] : memref<1x1x512xf32, #tpu.memory_space<vmem>>, vector<1x1x352xf32>
    %88 = vector.shape_cast %87 : vector<1x1x352xf32> to vector<1x352xf32>
    %c29 = arith.constant 29 : index
    %c0_103 = arith.constant 0 : index
    %89 = vector.load %arg8[%c29, %c0_103] : memref<49x352xf32, #tpu.memory_space<vmem>>, vector<1x352xf32>
    tpu.vector_store %arg8[%c29, %c0_103], %88 {strides = array<i32>} : memref<49x352xf32, #tpu.memory_space<vmem>>, vector<1x352xf32>,
    %c0_104 = arith.constant 0 : index
    %c0_105 = arith.constant 0 : index
    %c90 = arith.constant 90 : index
    %90 = vector.load %arg2[%c0_104, %c0_105, %c90] : memref<1x1x512xf32, #tpu.memory_space<vmem>>, vector<1x1x352xf32>
    %91 = vector.shape_cast %90 : vector<1x1x352xf32> to vector<1x352xf32>
    %c30 = arith.constant 30 : index
    %c0_106 = arith.constant 0 : index
    %92 = vector.load %arg8[%c30, %c0_106] : memref<49x352xf32, #tpu.memory_space<vmem>>, vector<1x352xf32>
    tpu.vector_store %arg8[%c30, %c0_106], %91 {strides = array<i32>} : memref<49x352xf32, #tpu.memory_space<vmem>>, vector<1x352xf32>,
    %c0_107 = arith.constant 0 : index
    %c0_108 = arith.constant 0 : index
    %c91 = arith.constant 91 : index
    %93 = vector.load %arg2[%c0_107, %c0_108, %c91] : memref<1x1x512xf32, #tpu.memory_space<vmem>>, vector<1x1x352xf32>
    %94 = vector.shape_cast %93 : vector<1x1x352xf32> to vector<1x352xf32>
    %c31 = arith.constant 31 : index
    %c0_109 = arith.constant 0 : index
    %95 = vector.load %arg8[%c31, %c0_109] : memref<49x352xf32, #tpu.memory_space<vmem>>, vector<1x352xf32>
    tpu.vector_store %arg8[%c31, %c0_109], %94 {strides = array<i32>} : memref<49x352xf32, #tpu.memory_space<vmem>>, vector<1x352xf32>,
    %c0_110 = arith.constant 0 : index
    %c0_111 = arith.constant 0 : index
    %c92 = arith.constant 92 : index
    %96 = vector.load %arg2[%c0_110, %c0_111, %c92] : memref<1x1x512xf32, #tpu.memory_space<vmem>>, vector<1x1x352xf32>
    %97 = vector.shape_cast %96 : vector<1x1x352xf32> to vector<1x352xf32>
    %c32 = arith.constant 32 : index
    %c0_112 = arith.constant 0 : index
    %98 = vector.load %arg8[%c32, %c0_112] : memref<49x352xf32, #tpu.memory_space<vmem>>, vector<1x352xf32>
    tpu.vector_store %arg8[%c32, %c0_112], %97 {strides = array<i32>} : memref<49x352xf32, #tpu.memory_space<vmem>>, vector<1x352xf32>,
    %c0_113 = arith.constant 0 : index
    %c0_114 = arith.constant 0 : index
    %c93 = arith.constant 93 : index
    %99 = vector.load %arg2[%c0_113, %c0_114, %c93] : memref<1x1x512xf32, #tpu.memory_space<vmem>>, vector<1x1x352xf32>
    %100 = vector.shape_cast %99 : vector<1x1x352xf32> to vector<1x352xf32>
    %c33 = arith.constant 33 : index
    %c0_115 = arith.constant 0 : index
    %101 = vector.load %arg8[%c33, %c0_115] : memref<49x352xf32, #tpu.memory_space<vmem>>, vector<1x352xf32>
    tpu.vector_store %arg8[%c33, %c0_115], %100 {strides = array<i32>} : memref<49x352xf32, #tpu.memory_space<vmem>>, vector<1x352xf32>,
    %c0_116 = arith.constant 0 : index
    %c0_117 = arith.constant 0 : index
    %c94 = arith.constant 94 : index
    %102 = vector.load %arg2[%c0_116, %c0_117, %c94] : memref<1x1x512xf32, #tpu.memory_space<vmem>>, vector<1x1x352xf32>
    %103 = vector.shape_cast %102 : vector<1x1x352xf32> to vector<1x352xf32>
    %c34 = arith.constant 34 : index
    %c0_118 = arith.constant 0 : index
    %104 = vector.load %arg8[%c34, %c0_118] : memref<49x352xf32, #tpu.memory_space<vmem>>, vector<1x352xf32>
    tpu.vector_store %arg8[%c34, %c0_118], %103 {strides = array<i32>} : memref<49x352xf32, #tpu.memory_space<vmem>>, vector<1x352xf32>,
    %c0_119 = arith.constant 0 : index
    %c0_120 = arith.constant 0 : index
    %c110 = arith.constant 110 : index
    %105 = vector.load %arg2[%c0_119, %c0_120, %c110] : memref<1x1x512xf32, #tpu.memory_space<vmem>>, vector<1x1x352xf32>
    %106 = vector.shape_cast %105 : vector<1x1x352xf32> to vector<1x352xf32>
    %c35 = arith.constant 35 : index
    %c0_121 = arith.constant 0 : index
    %107 = vector.load %arg8[%c35, %c0_121] : memref<49x352xf32, #tpu.memory_space<vmem>>, vector<1x352xf32>
    tpu.vector_store %arg8[%c35, %c0_121], %106 {strides = array<i32>} : memref<49x352xf32, #tpu.memory_space<vmem>>, vector<1x352xf32>,
    %c0_122 = arith.constant 0 : index
    %c0_123 = arith.constant 0 : index
    %c111 = arith.constant 111 : index
    %108 = vector.load %arg2[%c0_122, %c0_123, %c111] : memref<1x1x512xf32, #tpu.memory_space<vmem>>, vector<1x1x352xf32>
    %109 = vector.shape_cast %108 : vector<1x1x352xf32> to vector<1x352xf32>
    %c36 = arith.constant 36 : index
    %c0_124 = arith.constant 0 : index
    %110 = vector.load %arg8[%c36, %c0_124] : memref<49x352xf32, #tpu.memory_space<vmem>>, vector<1x352xf32>
    tpu.vector_store %arg8[%c36, %c0_124], %109 {strides = array<i32>} : memref<49x352xf32, #tpu.memory_space<vmem>>, vector<1x352xf32>,
    %c0_125 = arith.constant 0 : index
    %c0_126 = arith.constant 0 : index
    %c112 = arith.constant 112 : index
    %111 = vector.load %arg2[%c0_125, %c0_126, %c112] : memref<1x1x512xf32, #tpu.memory_space<vmem>>, vector<1x1x352xf32>
    %112 = vector.shape_cast %111 : vector<1x1x352xf32> to vector<1x352xf32>
    %c37 = arith.constant 37 : index
    %c0_127 = arith.constant 0 : index
    %113 = vector.load %arg8[%c37, %c0_127] : memref<49x352xf32, #tpu.memory_space<vmem>>, vector<1x352xf32>
    tpu.vector_store %arg8[%c37, %c0_127], %112 {strides = array<i32>} : memref<49x352xf32, #tpu.memory_space<vmem>>, vector<1x352xf32>,
    %c0_128 = arith.constant 0 : index
    %c0_129 = arith.constant 0 : index
    %c113 = arith.constant 113 : index
    %114 = vector.load %arg2[%c0_128, %c0_129, %c113] : memref<1x1x512xf32, #tpu.memory_space<vmem>>, vector<1x1x352xf32>
    %115 = vector.shape_cast %114 : vector<1x1x352xf32> to vector<1x352xf32>
    %c38 = arith.constant 38 : index
    %c0_130 = arith.constant 0 : index
    %116 = vector.load %arg8[%c38, %c0_130] : memref<49x352xf32, #tpu.memory_space<vmem>>, vector<1x352xf32>
    tpu.vector_store %arg8[%c38, %c0_130], %115 {strides = array<i32>} : memref<49x352xf32, #tpu.memory_space<vmem>>, vector<1x352xf32>,
    %c0_131 = arith.constant 0 : index
    %c0_132 = arith.constant 0 : index
    %c114 = arith.constant 114 : index
    %117 = vector.load %arg2[%c0_131, %c0_132, %c114] : memref<1x1x512xf32, #tpu.memory_space<vmem>>, vector<1x1x352xf32>
    %118 = vector.shape_cast %117 : vector<1x1x352xf32> to vector<1x352xf32>
    %c39 = arith.constant 39 : index
    %c0_133 = arith.constant 0 : index
    %119 = vector.load %arg8[%c39, %c0_133] : memref<49x352xf32, #tpu.memory_space<vmem>>, vector<1x352xf32>
    tpu.vector_store %arg8[%c39, %c0_133], %118 {strides = array<i32>} : memref<49x352xf32, #tpu.memory_space<vmem>>, vector<1x352xf32>,
    %c0_134 = arith.constant 0 : index
    %c0_135 = arith.constant 0 : index
    %c115 = arith.constant 115 : index
    %120 = vector.load %arg2[%c0_134, %c0_135, %c115] : memref<1x1x512xf32, #tpu.memory_space<vmem>>, vector<1x1x352xf32>
    %121 = vector.shape_cast %120 : vector<1x1x352xf32> to vector<1x352xf32>
    %c40 = arith.constant 40 : index
    %c0_136 = arith.constant 0 : index
    %122 = vector.load %arg8[%c40, %c0_136] : memref<49x352xf32, #tpu.memory_space<vmem>>, vector<1x352xf32>
    tpu.vector_store %arg8[%c40, %c0_136], %121 {strides = array<i32>} : memref<49x352xf32, #tpu.memory_space<vmem>>, vector<1x352xf32>,
    %c0_137 = arith.constant 0 : index
    %c0_138 = arith.constant 0 : index
    %c116 = arith.constant 116 : index
    %123 = vector.load %arg2[%c0_137, %c0_138, %c116] : memref<1x1x512xf32, #tpu.memory_space<vmem>>, vector<1x1x352xf32>
    %124 = vector.shape_cast %123 : vector<1x1x352xf32> to vector<1x352xf32>
    %c41 = arith.constant 41 : index
    %c0_139 = arith.constant 0 : index
    %125 = vector.load %arg8[%c41, %c0_139] : memref<49x352xf32, #tpu.memory_space<vmem>>, vector<1x352xf32>
    tpu.vector_store %arg8[%c41, %c0_139], %124 {strides = array<i32>} : memref<49x352xf32, #tpu.memory_space<vmem>>, vector<1x352xf32>,
    %c0_140 = arith.constant 0 : index
    %c0_141 = arith.constant 0 : index
    %c132 = arith.constant 132 : index
    %126 = vector.load %arg2[%c0_140, %c0_141, %c132] : memref<1x1x512xf32, #tpu.memory_space<vmem>>, vector<1x1x352xf32>
    %127 = vector.shape_cast %126 : vector<1x1x352xf32> to vector<1x352xf32>
    %c42 = arith.constant 42 : index
    %c0_142 = arith.constant 0 : index
    %128 = vector.load %arg8[%c42, %c0_142] : memref<49x352xf32, #tpu.memory_space<vmem>>, vector<1x352xf32>
    tpu.vector_store %arg8[%c42, %c0_142], %127 {strides = array<i32>} : memref<49x352xf32, #tpu.memory_space<vmem>>, vector<1x352xf32>,
    %c0_143 = arith.constant 0 : index
    %c0_144 = arith.constant 0 : index
    %c133 = arith.constant 133 : index
    %129 = vector.load %arg2[%c0_143, %c0_144, %c133] : memref<1x1x512xf32, #tpu.memory_space<vmem>>, vector<1x1x352xf32>
    %130 = vector.shape_cast %129 : vector<1x1x352xf32> to vector<1x352xf32>
    %c43 = arith.constant 43 : index
    %c0_145 = arith.constant 0 : index
    %131 = vector.load %arg8[%c43, %c0_145] : memref<49x352xf32, #tpu.memory_space<vmem>>, vector<1x352xf32>
    tpu.vector_store %arg8[%c43, %c0_145], %130 {strides = array<i32>} : memref<49x352xf32, #tpu.memory_space<vmem>>, vector<1x352xf32>,
    %c0_146 = arith.constant 0 : index
    %c0_147 = arith.constant 0 : index
    %c134 = arith.constant 134 : index
    %132 = vector.load %arg2[%c0_146, %c0_147, %c134] : memref<1x1x512xf32, #tpu.memory_space<vmem>>, vector<1x1x352xf32>
    %133 = vector.shape_cast %132 : vector<1x1x352xf32> to vector<1x352xf32>
    %c44_148 = arith.constant 44 : index
    %c0_149 = arith.constant 0 : index
    %134 = vector.load %arg8[%c44_148, %c0_149] : memref<49x352xf32, #tpu.memory_space<vmem>>, vector<1x352xf32>
    tpu.vector_store %arg8[%c44_148, %c0_149], %133 {strides = array<i32>} : memref<49x352xf32, #tpu.memory_space<vmem>>, vector<1x352xf32>,
    %c0_150 = arith.constant 0 : index
    %c0_151 = arith.constant 0 : index
    %c135 = arith.constant 135 : index
    %135 = vector.load %arg2[%c0_150, %c0_151, %c135] : memref<1x1x512xf32, #tpu.memory_space<vmem>>, vector<1x1x352xf32>
    %136 = vector.shape_cast %135 : vector<1x1x352xf32> to vector<1x352xf32>
    %c45_152 = arith.constant 45 : index
    %c0_153 = arith.constant 0 : index
    %137 = vector.load %arg8[%c45_152, %c0_153] : memref<49x352xf32, #tpu.memory_space<vmem>>, vector<1x352xf32>
    tpu.vector_store %arg8[%c45_152, %c0_153], %136 {strides = array<i32>} : memref<49x352xf32, #tpu.memory_space<vmem>>, vector<1x352xf32>,
    %c0_154 = arith.constant 0 : index
    %c0_155 = arith.constant 0 : index
    %c136 = arith.constant 136 : index
    %138 = vector.load %arg2[%c0_154, %c0_155, %c136] : memref<1x1x512xf32, #tpu.memory_space<vmem>>, vector<1x1x352xf32>
    %139 = vector.shape_cast %138 : vector<1x1x352xf32> to vector<1x352xf32>
    %c46_156 = arith.constant 46 : index
    %c0_157 = arith.constant 0 : index
    %140 = vector.load %arg8[%c46_156, %c0_157] : memref<49x352xf32, #tpu.memory_space<vmem>>, vector<1x352xf32>
    tpu.vector_store %arg8[%c46_156, %c0_157], %139 {strides = array<i32>} : memref<49x352xf32, #tpu.memory_space<vmem>>, vector<1x352xf32>,
    %c0_158 = arith.constant 0 : index
    %c0_159 = arith.constant 0 : index
    %c137 = arith.constant 137 : index
    %141 = vector.load %arg2[%c0_158, %c0_159, %c137] : memref<1x1x512xf32, #tpu.memory_space<vmem>>, vector<1x1x352xf32>
    %142 = vector.shape_cast %141 : vector<1x1x352xf32> to vector<1x352xf32>
    %c47_160 = arith.constant 47 : index
    %c0_161 = arith.constant 0 : index
    %143 = vector.load %arg8[%c47_160, %c0_161] : memref<49x352xf32, #tpu.memory_space<vmem>>, vector<1x352xf32>
    tpu.vector_store %arg8[%c47_160, %c0_161], %142 {strides = array<i32>} : memref<49x352xf32, #tpu.memory_space<vmem>>, vector<1x352xf32>,
    %c0_162 = arith.constant 0 : index
    %c0_163 = arith.constant 0 : index
    %c138 = arith.constant 138 : index
    %144 = vector.load %arg2[%c0_162, %c0_163, %c138] : memref<1x1x512xf32, #tpu.memory_space<vmem>>, vector<1x1x352xf32>
    %145 = vector.shape_cast %144 : vector<1x1x352xf32> to vector<1x352xf32>
    %c48_164 = arith.constant 48 : index
    %c0_165 = arith.constant 0 : index
    %146 = vector.load %arg8[%c48_164, %c0_165] : memref<49x352xf32, #tpu.memory_space<vmem>>, vector<1x352xf32>
    tpu.vector_store %arg8[%c48_164, %c0_165], %145 {strides = array<i32>} : memref<49x352xf32, #tpu.memory_space<vmem>>, vector<1x352xf32>,
    %c0_166 = arith.constant 0 : index
    %c0_167 = arith.constant 0 : index
    %147 = vector.load %arg3[%c0_166, %c0_167] : memref<40x49xf32, #tpu.memory_space<vmem>>, vector<40x49xf32>
    %c0_168 = arith.constant 0 : index
    %c0_169 = arith.constant 0 : index
    %148 = vector.load %arg8[%c0_168, %c0_169] : memref<49x352xf32, #tpu.memory_space<vmem>>, vector<49x352xf32>
    %cst = arith.constant dense<0.000000e+00> : vector<40x352xf32>
    %149 = tpu.matmul %147, %148, %cst {dimension_numbers = #tpu.dot_dimension_numbers<[1], [0], [0], [1], [0, 0, 1, 1], [], []>} : vector<40x49xf32>, vector<49x352xf32>, vector<40x352xf32> -> vector<40x352xf32>
    %c0_170 = arith.constant 0 : index
    %c0_171 = arith.constant 0 : index
    %c0_172 = arith.constant 0 : index
    %150 = vector.load %arg4[%c0_170, %c0_171, %c0_172] : memref<2x40x2xf32, #tpu.memory_space<vmem>>, vector<2x40x2xf32>
    %151 = vector.extract_strided_slice %150 {offsets = [0, 0, 0], sizes = [2, 40, 1], strides = [1, 1, 1]} : vector<2x40x2xf32> to vector<2x40x1xf32>
    %152 = vector.extract_strided_slice %150 {offsets = [0, 0, 1], sizes = [2, 40, 1], strides = [1, 1, 1]} : vector<2x40x2xf32> to vector<2x40x1xf32>
    %cst_173 = arith.constant dense<0.000000e+00> : vector<40x1xf32>
    %153 = vector.multi_reduction <add>, %151, %cst_173 [0] : vector<2x40x1xf32> to vector<40x1xf32>
    %cst_174 = arith.constant 5.120000e+02 : f32
    %154 = vector.broadcast %cst_174 : f32 to vector<40x1xf32>
    %155 = arith.divf %153, %154 : vector<40x1xf32>
    %cst_175 = arith.constant 3.906250e-03 : f32
    %156 = vector.broadcast %cst_175 : f32 to vector<2x40x1xf32>
    %157 = arith.mulf %151, %156 : vector<2x40x1xf32>
    %cst_176 = arith.constant dense<0.000000e+00> : vector<40x1xf32>
    %158 = vector.multi_reduction <add>, %152, %cst_176 [0] : vector<2x40x1xf32> to vector<40x1xf32>
    %159 = vector.shape_cast %155 : vector<40x1xf32> to vector<1x40x1xf32>
    %160 = vector.broadcast %159 : vector<1x40x1xf32> to vector<2x40x1xf32>
    %161 = arith.subf %157, %160 : vector<2x40x1xf32>
    %162 = arith.mulf %161, %161 : vector<2x40x1xf32>
    %cst_177 = arith.constant dense<0.000000e+00> : vector<40x1xf32>
    %163 = vector.multi_reduction <add>, %162, %cst_177 [0] : vector<2x40x1xf32> to vector<40x1xf32>
    %cst_178 = arith.constant 2.560000e+02 : f32
    %164 = vector.broadcast %cst_178 : f32 to vector<40x1xf32>
    %165 = arith.mulf %164, %163 : vector<40x1xf32>
    %166 = arith.addf %158, %165 : vector<40x1xf32>
    %cst_179 = arith.constant 5.120000e+02 : f32
    %167 = vector.broadcast %cst_179 : f32 to vector<40x1xf32>
    %168 = arith.divf %166, %167 : vector<40x1xf32>
    %cst_180 = arith.constant 9.99999974E-6 : f32
    %169 = vector.broadcast %cst_180 : f32 to vector<40x1xf32>
    %170 = arith.addf %168, %169 : vector<40x1xf32>
    %171 = math.rsqrt %170 : vector<40x1xf32>
    %c0_181 = arith.constant 0 : index
    %c0_182 = arith.constant 0 : index
    %172 = vector.load %arg5[%c0_181, %c0_182] : memref<40x1xf32, #tpu.memory_space<vmem>>, vector<40x1xf32>
    %173 = arith.mulf %172, %171 : vector<40x1xf32>
    %c0_183 = arith.constant 0 : index
    %c0_184 = arith.constant 0 : index
    %174 = vector.load %arg6[%c0_183, %c0_184] : memref<40x1xf32, #tpu.memory_space<vmem>>, vector<40x1xf32>
    %175 = arith.mulf %155, %173 : vector<40x1xf32>
    %176 = arith.subf %174, %175 : vector<40x1xf32>
    %177 = vector.broadcast %173 : vector<40x1xf32> to vector<40x352xf32>
    %178 = arith.mulf %149, %177 : vector<40x352xf32>
    %179 = vector.broadcast %176 : vector<40x1xf32> to vector<40x352xf32>
    %180 = arith.addf %178, %179 : vector<40x352xf32>
    %cst_185 = arith.constant 0.000000e+00 : f32
    %181 = vector.broadcast %cst_185 : f32 to vector<40x352xf32>
    %182 = arith.maximumf %180, %181 : vector<40x352xf32>
    %183 = vector.extract_strided_slice %182 {offsets = [0, 0], sizes = [36, 352], strides = [1, 1]} : vector<40x352xf32> to vector<36x352xf32>
    %c0_186 = arith.constant 0 : index
    %c0_187 = arith.constant 0 : index
    %c0_188 = arith.constant 0 : index
    %c0_189 = arith.constant 0 : index
    %184 = vector.load %arg7[%c0_186, %c0_187, %c0_188, %c0_189] : memref<1x1x36x352xf32, #tpu.memory_space<vmem>>, vector<1x1x36x352xf32>
    %185 = vector.shape_cast %184 : vector<1x1x36x352xf32> to vector<36x352xf32>
    %186 = vector.shape_cast %183 : vector<36x352xf32> to vector<1x1x36x352xf32>
    tpu.vector_store %arg7[%c0_186, %c0_187, %c0_188, %c0_189], %186 {strides = array<i32>} : memref<1x1x36x352xf32, #tpu.memory_space<vmem>>, vector<1x1x36x352xf32>,
    return
  }
  func.func @transform_0(%arg0: i32, %arg1: i32) -> (i32, i32, i32) {
    %c0_i32 = arith.constant 0 : i32
    %c0_i32_0 = arith.constant 0 : i32
    %c0_i32_1 = arith.constant 0 : i32
    return %arg0, %c0_i32, %c0_i32_0 : i32, i32, i32
  }
  func.func @transform_1(%arg0: i32, %arg1: i32) -> (i32, i32) {
    %c0_i32 = arith.constant 0 : i32
    %c0_i32_0 = arith.constant 0 : i32
    %c0_i32_1 = arith.constant 0 : i32
    return %c0_i32, %c0_i32_0 : i32, i32
  }
  func.func @transform_2(%arg0: i32, %arg1: i32) -> (i32, i32, i32) {
    %c0_i32 = arith.constant 0 : i32
    %c0_i32_0 = arith.constant 0 : i32
    %c0_i32_1 = arith.constant 0 : i32
    %c0_i32_2 = arith.constant 0 : i32
    return %c0_i32, %c0_i32_0, %c0_i32_1 : i32, i32, i32
  }
  func.func @transform_3(%arg0: i32, %arg1: i32) -> (i32, i32) {
    %c0_i32 = arith.constant 0 : i32
    %c0_i32_0 = arith.constant 0 : i32
    %c0_i32_1 = arith.constant 0 : i32
    return %c0_i32, %c0_i32_0 : i32, i32
  }
  func.func @transform_4(%arg0: i32, %arg1: i32) -> (i32, i32) {
    %c0_i32 = arith.constant 0 : i32
    %c0_i32_0 = arith.constant 0 : i32
    %c0_i32_1 = arith.constant 0 : i32
    return %c0_i32, %c0_i32_0 : i32, i32
  }
  func.func @transform_5(%arg0: i32, %arg1: i32) -> (i32, i32, i32, i32) {
    %c0_i32 = arith.constant 0 : i32
    %c0_i32_0 = arith.constant 0 : i32
    %c0_i32_1 = arith.constant 0 : i32
    return %arg0, %arg1, %c0_i32, %c0_i32_0 : i32, i32, i32, i32
  }
}

</mosaic_0001>

<bundles_post_ra>
// kernel: inception_block.2
= control target key start
LH: loop header
LB: loop body
LE: loop exit
PB: predicated region body
PF: predicated region fallthrough
CT: control target
= control target key end

     0   :  { %s1289_s12 = smov 0   ;;  %s1291_s13 = smov 0   ;;  %s1664_s0 = inlined_call_operand.vmem [shape: f32[2,1,512], index: 0, kind: input, shape index: {}]   ;;  %s1665_s1 = inlined_call_operand.vmem [shape: f32[40,49], index: 1, kind: input, shape index: {}]   ;;  %s1666_s2 = inlined_call_operand.vmem [shape: f32[1,352], index: 2, kind: input, shape index: {}]   ;;  %s1667_s3 = inlined_call_operand.vmem [shape: f32[2,1,40,2], index: 3, kind: output, shape index: {}]  }
   0x1   :  { %s1293_s14 = smov 0  }
   0x2 LB: > { %s25_s15 = sadd.s32 1, %s1218_s13  ;;  %p1093_p0 = scmp.ge.s32.totalorder %s1222_s14, 1  ;;  %s1222_s14 = sphi %s1293_s14, %s13_s14   ;;  %s1218_s13 = sphi %s1291_s13, %s1671_s13   ;;  %s1214_s12 = sphi %s1289_s12, %s1670_s12  }
   0x3   : > { %p27_p1 = scmp.ge.s32.totalorder %s25_s15, 2  ;;  %p150_p2 = scmp.lt.s32.totalorder %s1222_s14, 3 }
   0x5   : > { %s1673_s15 = smov (%p27_p1, %s25_s15), 0  ;;  %p151_p3 = pnand %p1093_p0, %p150_p2 }
   0x6   : > { %p177_p4 = scmp.lt.s32.totalorder (!%p151_p3), %s1214_s12, 1  ;;  %s1224_s20 = smov (!%p151_p3), 118  }
   0x7   : > { %154 = sbr.rel (%p151_p3) target bundleno = 679 (0x2a7), region = 32  ;;  %s1225_s21 = smov (!%p151_p3), 12  }
   0x8   : > { %s1226_s22 = smov (!%p151_p3), 123   ;;  %s1227_s23 = smov (!%p151_p3), 124  }
   0x9   : > { %s1228_s24 = smov (!%p151_p3), 13   ;;  %s1229_s25 = smov (!%p151_p3), 122  }
   0xa   : > { %s1230_s26 = smov (!%p151_p3), 120   ;;  %s1231_s27 = smov (!%p151_p3), 121  }
   0xb   : > { %s1232_s28 = smov (!%p151_p3), 119   ;;  %s1233_s29 = smov (!%p151_p3), 35  }
   0xc   : > { %s1675_s12 = smov (!%p177_p4, %s1214_s12), 1  ;;  %s1234_s30 = smov 36   ;;  %v191_v36 = vlaneseq  ;;  %vm246_vm0 = vcmask 1006592   ;;  %vm257_vm2 = vcmask 998400   ;;  %vm705_vm3 = vcmask 973824   ;;  %v724_v40 = vld [vmem:[%s1665_s1 + $0x10] sm:$0xff] }
   0xd   : > { %s1094_s16 = sshll.u32 %s1675_s12, 2  ;;  %s1235_s4 = smov 34   ;;  %vm716_vm4 = vcmask 965632   ;;  %vm642_vm5 = vcmask 97280   ;;  %vm565_vm6 = vcmask 277504   ;;  %vm235_vm7 = vcmask 1014784  }
   0xe   : > { %s1313_s19 = scalar_lea.vmem %s1664_s0, %s1094_s16  ;;  %s1236_s5 = smov 17   ;;  %vm1356_vm1 = vcmp.lt.s32.totalorder %v191_v36, 352  ;;  %vm631_vm8 = vcmask 105472   ;;  %vm764_vm9 = vcmask 1040384   ;;  %vm598_vm10 = vcmask 130048  }
   0xf   : > { %v711_v0 = vld [vmem:[%s1313_s19 + $0x1] sm:$0x7]  ;;  %s1237_s6 = smov 18   ;;  %s1238_s7 = smov 16   ;;  %vm694_vm11 = vcmask 982016   ;;  %vm683_vm12 = vcmask 990208  }
  0x10   : > { %v637_v1 = vld [vmem:[%s1313_s19] sm:$0xf]  ;;  %713 = vrot.lane.b32.xlu0 %v711_v0, %s1224_s20  ;;  %s1239_s8 = smov 14   ;;  %s1240_s9 = smov 15   ;;  %vm455_vm13 = vcmask 482304   ;;  %vm554_vm14 = vcmask 285696  }
  0x11   : > { %639 = vrot.lane.b32.xlu1 %v637_v1, %s1225_s21  ;;  %v658_v2 = vld [vmem:[%s1313_s19 + $0x1] sm:$0x7]  ;;  %s1241_s10 = smov 59   ;;  %s1242_s11 = smov 57   ;;  %vm543_vm15 = vcmask 293888  }
  0x12   : > { %660 = vrot.lane.b32.xlu2 %v658_v2, %s1226_s22  ;;  %v648_v3 = vld [vmem:[%s1313_s19 + $0x1] sm:$0x7]  ;;  %s1243_s16 = smov 58   ;;  %s1244_s17 = smov 56  }
  0x13   : > { %v626_v4 = vld [vmem:[%s1313_s19] sm:$0xf]  ;;  %s1245_s18 = smov 39   ;;  %s1246_s20 = smov 40  }
  0x14   : > { %v668_v5 = vld [vmem:[%s1313_s19 + $0x1] sm:$0x7]  ;;  %s1247_s21 = smov 38  }
  0x15   : > { %v689_v6 = vld [vmem:[%s1313_s19 + $0x1] sm:$0x7] }
  0x16   : > { %v678_v7 = vld [vmem:[%s1313_s19 + $0x1] sm:$0x7] }
  0x17   : > { %v700_v8 = vld [vmem:[%s1313_s19 + $0x1] sm:$0x7] }
  0x18   : > { %628 = vrot.lane.b32.xlu0 %v626_v4, %s1228_s24  ;;  %v549_v9 = vld [vmem:[%s1313_s19] sm:$0xf]  ;;  %s1248_s24 = smov 37  }
  0x19   : > { %650 = vrot.lane.b32.xlu1 %v648_v3, %s1227_s23  ;;  %v538_v10 = vld [vmem:[%s1313_s19] sm:$0xf] }
  0x1a   : > { %670 = vrot.lane.b32.xlu2 %v668_v5, %s1229_s25  ;;  %v560_v11 = vld [vmem:[%s1313_s19] sm:$0xf] }
  0x1b   : > { %v582_v12 = vld [vmem:[%s1313_s19] sm:$0xf] }
  0x1c   : > { %v571_v13 = vld [vmem:[%s1313_s19] sm:$0xf] }
  0x1d   : > { %v593_v14 = vld [vmem:[%s1313_s19] sm:$0xf] }
  0x1e   : > { %v615_v15 = vld [vmem:[%s1313_s19] sm:$0xf] }
  0x1f   : > { %v604_v16 = vld [vmem:[%s1313_s19] sm:$0xf] }
  0x20   : > { %680 = vrot.lane.b32.xlu0 %v678_v7, %s1231_s27  ;;  %v450_v17 = vld [vmem:[%s1313_s19] sm:$0xf]  ;;  %s1250_s27 = smov 81  }
  0x21   : > { %691 = vrot.lane.b32.xlu1 %v689_v6, %s1230_s26  ;;  %v472_v18 = vld [vmem:[%s1313_s19] sm:$0xf]  ;;  %s1249_s26 = smov 82  }
  0x22   : > { %702 = vrot.lane.b32.xlu2 %v700_v8, %s1232_s28  ;;  %v461_v19 = vld [vmem:[%s1313_s19] sm:$0xf]  ;;  %s1251_s28 = smov 80  }
  0x23   : > { %v483_v20 = vld [vmem:[%s1313_s19] sm:$0xf] }
  0x24   : > { %v505_v21 = vld [vmem:[%s1313_s19] sm:$0xf] }
  0x25   : > { %v494_v22 = vld [vmem:[%s1313_s19] sm:$0xf] }
  0x26   : > { %v516_v23 = vld [vmem:[%s1313_s19] sm:$0xf] }
  0x27   : > { %v527_v24 = vld [vmem:[%s1313_s19] sm:$0xf] }
  0x28   : > { %540 = vrot.lane.b32.xlu0 %v538_v10, %s1234_s30  ;;  %v362_v25 = vld [vmem:[%s1313_s19] sm:$0xf]  ;;  %s1253_s30 = smov 78  }
  0x29   : > { %551 = vrot.lane.b32.xlu1 %v549_v9, %s1233_s29  ;;  %v373_v26 = vld [vmem:[%s1313_s19] sm:$0xf]  ;;  %s1252_s29 = smov 79  }
  0x2a   : > { %562 = vrot.lane.b32.xlu2 %v560_v11, %s1235_s4  ;;  %v384_v27 = vld [vmem:[%s1313_s19] sm:$0xf]  ;;  %s1254_s4 = smov 62  }
  0x2b   : > { %v395_v28 = vld [vmem:[%s1313_s19] sm:$0xf] }
  0x2c   : > { %v406_v29 = vld [vmem:[%s1313_s19] sm:$0xf] }
  0x2d   : > { %v417_v30 = vld [vmem:[%s1313_s19] sm:$0xf] }
  0x2e   : > { %v428_v31 = vld [vmem:[%s1313_s19] sm:$0xf] }
  0x2f   : > { %v439_v32 = vld [vmem:[%s1313_s19] sm:$0xf] }
  0x30   : > { %573 = vrot.lane.b32.xlu0 %v571_v13, %s1237_s6  ;;  %s1256_s6 = smov 60   ;;  %v285_v33 = vld [vmem:[%s1313_s19] sm:$0x7] }
  0x31   : > { %584 = vrot.lane.b32.xlu1 %v582_v12, %s1236_s5  ;;  %s1255_s5 = smov 61   ;;  %v274_v34 = vld [vmem:[%s1313_s19] sm:$0x7] }
  0x32   : > { %595 = vrot.lane.b32.xlu2 %v593_v14, %s1238_s7  ;;  %v296_v35 = vld [vmem:[%s1313_s19] sm:$0x7]  ;;  %s1257_s7 = smov 104  }
  0x33   : > { %v318_v38 = vld [vmem:[%s1313_s19] sm:$0x7] }
  0x34   : > { %v307_v39 = vld [vmem:[%s1313_s19] sm:$0x7] }
  0x35   : > { %v329_v43 = vld [vmem:[%s1313_s19] sm:$0x7] }
  0x36   : > { %v351_v45 = vld [vmem:[%s1313_s19] sm:$0xf] }
  0x37   : > { %v340_v46 = vld [vmem:[%s1313_s19] sm:$0xf] }
  0x38   : > { %606 = vrot.lane.b32.xlu0 %v604_v16, %s1240_s9  ;;  %s1259_s9 = smov 103   ;;  %v197_v49 = vld [vmem:[%s1313_s19] sm:$0x7] }
  0x39   : > { %617 = vrot.lane.b32.xlu1 %v615_v15, %s1239_s8  ;;  %s1258_s8 = smov 105   ;;  %v219_v51 = vld [vmem:[%s1313_s19] sm:$0x7] }
  0x3a   : > { %452 = vrot.lane.b32.xlu2 %v450_v17, %s1241_s10  ;;  %s1260_s10 = smov 101   ;;  %v208_v52 = vld [vmem:[%s1313_s19] sm:$0x7] }
  0x3b   : > { %v230_v55 = vld [vmem:[%s1313_s19] sm:$0x7] }
  0x3c   : > { %v252_v63 = vld [vmem:[%s1313_s19] sm:$0x7] }
  0x3d   : > { %v241_v0 = vld [vmem:[%s1313_s19] sm:$0x7] }
  0x3e   : > { %v263_v3 = vld [vmem:[%s1313_s19] sm:$0x7] }
  0x40   : > { %463 = vrot.lane.b32.xlu0 %v461_v19, %s1243_s16  ;;  %s1262_s16 = smov 100  }
  0x41   : > { %474 = vrot.lane.b32.xlu1 %v472_v18, %s1242_s11  ;;  %s1261_s11 = smov 102  }
  0x42   : > { %485 = vrot.lane.b32.xlu2 %v483_v20, %s1244_s17  ;;  %s1263_s17 = smov 83  }
  0x48   : > { %496 = vrot.lane.b32.xlu0 %v494_v22, %s1246_s20  ;;  %s1265_s20 = smov 127  }
  0x49   : > { %507 = vrot.lane.b32.xlu1 %v505_v21, %s1245_s18  ;;  %s1264_s18 = smov 84  }
  0x4a   : > { %518 = vrot.lane.b32.xlu2 %v516_v23, %s1247_s21  ;;  %s1266_s21 = smov 125  }
  0x50   : > { %529 = vrot.lane.b32.xlu0 %v527_v24, %s1248_s24  ;;  %s1267_s24 = smov 126  }
  0x51   : > { %364 = vrot.lane.b32.xlu1 %v362_v25, %s1249_s26 }
  0x52   : > { %375 = vrot.lane.b32.xlu2 %v373_v26, %s1250_s27 }
  0x58   : > { %386 = vrot.lane.b32.xlu0 %v384_v27, %s1251_s28 }
  0x59   : > { %397 = vrot.lane.b32.xlu1 %v395_v28, %s1252_s29 }
  0x5a   : > { %408 = vrot.lane.b32.xlu2 %v406_v29, %s1253_s30 }
  0x60   : > { %419 = vrot.lane.b32.xlu0 %v417_v30, %s1254_s4 }
  0x61   : > { %430 = vrot.lane.b32.xlu1 %v428_v31, %s1255_s5 }
  0x62   : > { %441 = vrot.lane.b32.xlu2 %v439_v32, %s1256_s6 }
  0x68   : > { %276 = vrot.lane.b32.xlu0 %v274_v34, %s1258_s8  ;;  %s1130_s8 = smul.u32 40, %s1675_s12 }
  0x69   : > { %287 = vrot.lane.b32.xlu1 %v285_v33, %s1257_s7 }
  0x6a   : > { %298 = vrot.lane.b32.xlu2 %v296_v35, %s1259_s9 }
  0x6c   : > { %v661_v37 = vpop.permute.xlu2 %660 }
  0x6d   : > { %v662_v41 = vrot.slane %v661_v37, 1 }
  0x6f   : > { %v663_v42 = vsel %vm246_vm0, %v661_v37, %v662_v41 }
  0x70   : > { %309 = vrot.lane.b32.xlu0 %v307_v39, %s1261_s11  ;;  %666 = vst.msk [vmem:[#allocation2 + $0x7b] ss:$8 sm:$0x7] %vm1356_vm1, %v663_v42  ;;  %s1605_s11 = scalar_lea.vmem %s1667_s3, %s1130_s8 }
  0x71   : > { %320 = vrot.lane.b32.xlu1 %v318_v38, %s1260_s10 }
  0x72   : > { %331 = vrot.lane.b32.xlu2 %v329_v43, %s1262_s16 }
  0x74   : > { %v671_v44 = vpop.permute.xlu2 %670 }
  0x75   : > { %v672_v47 = vrot.slane %v671_v44, 1 }
  0x77   : > { %v673_v48 = vsel %vm257_vm2, %v671_v44, %v672_v47 }
  0x78   : > { %342 = vrot.lane.b32.xlu0 %v340_v46, %s1264_s18  ;;  %676 = vst.msk [vmem:[#allocation2 + $0x7c] ss:$8 sm:$0x7] %vm1356_vm1, %v673_v48 }
  0x79   : > { %353 = vrot.lane.b32.xlu1 %v351_v45, %s1263_s17 }
  0x7a   : > { %199 = vrot.lane.b32.xlu2 %v197_v49, %s1265_s20 }
  0x7c   : > { %v703_v50 = vpop.permute.xlu2 %702 }
  0x7d   : > { %v704_v53 = vrot.slane %v703_v50, 1 }
  0x7f   : > { %v706_v54 = vsel %vm705_vm3, %v703_v50, %v704_v53  ;;  %vm488_vm3 = vcmask 457728  }
  0x80   : > { %210 = vrot.lane.b32.xlu0 %v208_v52, %s1267_s24  ;;  %709 = vst.msk [vmem:[#allocation2 + $0x7f] ss:$8 sm:$0x7] %vm1356_vm1, %v706_v54 }
  0x81   : > { %221 = vrot.lane.b32.xlu1 %v219_v51, %s1266_s21 }
  0x82   : > { %v714_v56 = vpop.permute.xlu0 %713  ;;  %232 = vrot.lane.b32.xlu2 %v230_v55, %s1227_s23  ;;  %s1268_s23 = smov 106  }
  0x83   : > { %v640_v57 = vpop.permute.xlu1 %639  ;;  %v715_v58 = vrot.slane %v714_v56, 1 }
  0x84   : > { %v641_v59 = vrot.slane %v640_v57, 1  ;;  %v563_v60 = vpop.permute.xlu2 %562 }
  0x85   : > { %v717_v61 = vsel %vm716_vm4, %v714_v56, %v715_v58  ;;  %v564_v1 = vrot.slane %v563_v60, 1  ;;  %vm587_vm4 = vcmask 138240  }
  0x86   : > { %v643_v62 = vsel %vm642_vm5, %v640_v57, %v641_v59  ;;  %720 = vst.msk [vmem:[#allocation2 + $0x90] ss:$8 sm:$0x7] %vm1356_vm1, %v717_v61  ;;  %vm576_vm5 = vcmask 146432  }
  0x87   : > { %646 = vst.msk [vmem:[#allocation2 + $0x79] ss:$8 sm:$0x7] %vm1356_vm1, %v643_v62  ;;  %v566_v2 = vsel %vm565_vm6, %v563_v60, %v564_v1  ;;  %vm521_vm6 = vcmask 310272  }
  0x88   : > { %243 = vrot.lane.b32.xlu0 %v241_v0, %s1226_s22  ;;  %569 = vst.msk [vmem:[#allocation2 + $0x62] ss:$8 sm:$0x7] %vm1356_vm1, %v566_v2 }
  0x89   : > { %254 = vrot.lane.b32.xlu1 %v252_v63, %s1229_s25 }
  0x8a   : > { %v629_v5 = vpop.permute.xlu0 %628  ;;  %265 = vrot.lane.b32.xlu2 %v263_v3, %s1268_s23 }
  0x8b   : > { %v651_v4 = vpop.permute.xlu1 %650  ;;  %v630_v7 = vrot.slane %v629_v5, 1 }
  0x8c   : > { %v652_v6 = vrot.slane %v651_v4, 1  ;;  %v596_v8 = vpop.permute.xlu2 %595 }
  0x8d   : > { %v632_v10 = vsel %vm631_vm8, %v629_v5, %v630_v7  ;;  %v745_v11 = vld [vmem:[#allocation2 + $0x90] sm:$0x1]  ;;  %v1388_v12 = vld [vmem:[#allocation2 + $0x98] sm:$0x1]  ;;  %v747_v13 = vld [vmem:[#allocation2 + $0xa0] sm:$0x1] }
  0x8e   : > { %v653_v9 = vsel %vm235_vm7, %v651_v4, %v652_v6  ;;  %1096 = vmatpush.msk.msra.mxu0 %vm764_vm9, %v745_v11  ;;  %1116 = vmatpush.msk.msra.mxu3 %vm764_vm9, %v745_v11  ;;  %v597_v14 = vrot.slane %v596_v8, 1  ;;  %635 = vst.msk [vmem:[#allocation2 + $0x78] ss:$8 sm:$0x7] %vm1356_vm1, %v632_v10  ;;  %vm620_vm8 = vcmask 113664  }
  0x8f   : > { %656 = vst.msk [vmem:[#allocation2 + $0x7a] ss:$8 sm:$0x7] %vm1356_vm1, %v653_v9  ;;  %1123 = vmatpush.msk.msra.mxu1 %vm764_vm9, %v1388_v12  ;;  %1108 = vmatpush.msk.msra.mxu2 %vm764_vm9, %v747_v13 }
  0x90   : > { %v599_v15 = vsel %vm598_vm10, %v596_v8, %v597_v14  ;;  %vm609_vm10 = vcmask 121856  }
  0x91   : > { %602 = vst.msk [vmem:[#allocation2 + $0x65] ss:$8 sm:$0x7] %vm1356_vm1, %v599_v15 }
  0x92   : > { %v681_v17 = vpop.permute.xlu0 %680 }
  0x93   : > { %v692_v16 = vpop.permute.xlu1 %691  ;;  %v682_v19 = vrot.slane %v681_v17, 1 }
  0x94   : > { %v693_v18 = vrot.slane %v692_v16, 1  ;;  %v453_v20 = vpop.permute.xlu2 %452 }
  0x95   : > { %v684_v22 = vsel %vm683_vm12, %v681_v17, %v682_v19  ;;  %v454_v23 = vrot.slane %v453_v20, 1  ;;  %vm477_vm12 = vcmask 465920  }
  0x96   : > { %v695_v21 = vsel %vm694_vm11, %v692_v16, %v693_v18  ;;  %687 = vst.msk [vmem:[#allocation2 + $0x7d] ss:$8 sm:$0x7] %vm1356_vm1, %v684_v22  ;;  %vm378_vm11 = vcmask 662528  }
  0x97   : > { %698 = vst.msk [vmem:[#allocation2 + $0x7e] ss:$8 sm:$0x7] %vm1356_vm1, %v695_v21  ;;  %v456_v24 = vsel %vm455_vm13, %v453_v20, %v454_v23  ;;  %vm466_vm13 = vcmask 474112  }
  0x98   : > { %459 = vst.msk [vmem:[#allocation2 + $0x48] ss:$8 sm:$0x7] %vm1356_vm1, %v456_v24 }
  0x9a   : > { %v541_v26 = vpop.permute.xlu0 %540 }
  0x9b   : > { %v552_v25 = vpop.permute.xlu1 %551  ;;  %v542_v28 = vrot.slane %v541_v26, 1 }
  0x9c   : > { %v553_v27 = vrot.slane %v552_v25, 1  ;;  %v486_v29 = vpop.permute.xlu2 %485 }
  0x9d   : > { %v544_v31 = vsel %vm543_vm15, %v541_v26, %v542_v28  ;;  %v487_v32 = vrot.slane %v486_v29, 1  ;;  %vm510_vm15 = vcmask 318464  }
  0x9e   : > { %v555_v30 = vsel %vm554_vm14, %v552_v25, %v553_v27  ;;  %v742_v33 = vld [vmem:[#allocation2 + $0x78] sm:$0xff]  ;;  %v1409_v34 = vld [vmem:[#allocation2 + $0x80] sm:$0xff]  ;;  %v744_v35 = vld [vmem:[#allocation2 + $0x88] sm:$0xff]  ;;  %547 = vst.msk [vmem:[#allocation2 + $0x60] ss:$8 sm:$0x7] %vm1356_vm1, %v544_v31 }
  0x9f   : > { %558 = vst.msk [vmem:[#allocation2 + $0x61] ss:$8 sm:$0x7] %vm1356_vm1, %v555_v30  ;;  %784 = vmatpush.msra.mxu0 %v742_v33  ;;  %1117 = vmatpush.msra.mxu3 %v742_v33  ;;  %v489_v36 = vsel %vm488_vm3, %v486_v29, %v487_v32  ;;  %vm411_vm14 = vcmask 637952   ;;  %vm499_vm3 = vcmask 326656  }
  0xa0   : > { %1124 = vmatpush.msra.mxu1 %v1409_v34  ;;  %848 = vmatpush.msra.mxu2 %v744_v35  ;;  %492 = vst.msk [vmem:[#allocation2 + $0x4b] ss:$8 sm:$0x7] %vm1356_vm1, %v489_v36 }
  0xa2   : > { %v574_v38 = vpop.permute.xlu0 %573 }
  0xa3   : > { %v585_v37 = vpop.permute.xlu1 %584  ;;  %v575_v41 = vrot.slane %v574_v38, 1 }
  0xa4   : > { %v586_v39 = vrot.slane %v585_v37, 1  ;;  %v519_v42 = vpop.permute.xlu2 %518 }
  0xa5   : > { %v577_v44 = vsel %vm576_vm5, %v574_v38, %v575_v41  ;;  %v520_v45 = vrot.slane %v519_v42, 1  ;;  %vm532_vm5 = vcmask 302080  }
  0xa6   : > { %v588_v43 = vsel %vm587_vm4, %v585_v37, %v586_v39  ;;  %580 = vst.msk [vmem:[#allocation2 + $0x63] ss:$8 sm:$0x7] %vm1356_vm1, %v577_v44  ;;  %vm444_vm4 = vcmask 490496  }
  0xa7   : > { %591 = vst.msk [vmem:[#allocation2 + $0x64] ss:$8 sm:$0x7] %vm1356_vm1, %v588_v43  ;;  %v522_v46 = vsel %vm521_vm6, %v519_v42, %v520_v45  ;;  %vm367_vm6 = vcmask 670720  }
  0xa8   : > { %525 = vst.msk [vmem:[#allocation2 + $0x4e] ss:$8 sm:$0x7] %vm1356_vm1, %v522_v46 }
  0xaa   : > { %v607_v48 = vpop.permute.xlu0 %606 }
  0xab   : > { %v618_v47 = vpop.permute.xlu1 %617  ;;  %v608_v50 = vrot.slane %v607_v48, 1 }
  0xac   : > { %v619_v49 = vrot.slane %v618_v47, 1  ;;  %v376_v51 = vpop.permute.xlu2 %375 }
  0xad   : > { %v610_v53 = vsel %vm609_vm10, %v607_v48, %v608_v50  ;;  %v377_v54 = vrot.slane %v376_v51, 1  ;;  %vm389_vm10 = vcmask 654336  }
  0xae   : > { %v621_v52 = vsel %vm620_vm8, %v618_v47, %v619_v49  ;;  %613 = vst.msk [vmem:[#allocation2 + $0x66] ss:$8 sm:$0x7] %vm1356_vm1, %v610_v53  ;;  %vm301_vm8 = vcmask 842752  }
  0xaf   : > { %624 = vst.msk [vmem:[#allocation2 + $0x67] ss:$8 sm:$0x7] %vm1356_vm1, %v621_v52  ;;  %v379_v55 = vsel %vm378_vm11, %v376_v51, %v377_v54  ;;  %vm400_vm11 = vcmask 646144  }
  0xb0   : > { %382 = vst.msk [vmem:[#allocation2 + $0x31] ss:$8 sm:$0x7] %vm1356_vm1, %v379_v55 }
  0xb2   : > { %v464_v57 = vpop.permute.xlu0 %463 }
  0xb3   : > { %v475_v56 = vpop.permute.xlu1 %474  ;;  %v465_v59 = vrot.slane %v464_v57, 1 }
  0xb4   : > { %v476_v58 = vrot.slane %v475_v56, 1  ;;  %v409_v60 = vpop.permute.xlu2 %408 }
  0xb5   : > { %v467_v62 = vsel %vm466_vm13, %v464_v57, %v465_v59  ;;  %v410_v63 = vrot.slane %v409_v60, 1  ;;  %vm422_vm13 = vcmask 506880  }
  0xb6   : > { %v478_v61 = vsel %vm477_vm12, %v475_v56, %v476_v58  ;;  %v739_v0 = vld [vmem:[#allocation2 + $0x60] sm:$0xff]  ;;  %v1430_v1 = vld [vmem:[#allocation2 + $0x68] sm:$0xff]  ;;  %v741_v2 = vld [vmem:[#allocation2 + $0x70] sm:$0xff]  ;;  %470 = vst.msk [vmem:[#allocation2 + $0x49] ss:$8 sm:$0x7] %vm1356_vm1, %v467_v62 }
  0xb7   : > { %481 = vst.msk [vmem:[#allocation2 + $0x4a] ss:$8 sm:$0x7] %vm1356_vm1, %v478_v61  ;;  %785 = vmatpush.msra.mxu0 %v739_v0  ;;  %1118 = vmatpush.msra.mxu3 %v739_v0  ;;  %v412_v3 = vsel %vm411_vm14, %v409_v60, %v410_v63  ;;  %vm334_vm12 = vcmask 818176   ;;  %vm433_vm14 = vcmask 498688  }
  0xb8   : > { %1125 = vmatpush.msra.mxu1 %v1430_v1  ;;  %849 = vmatpush.msra.mxu2 %v741_v2  ;;  %415 = vst.msk [vmem:[#allocation2 + $0x34] ss:$8 sm:$0x7] %vm1356_vm1, %v412_v3  ;;  %v190_v58 = vld [vmem:[%s1313_s19] sm:$0x7] }
  0xb9   : > { %195 = vst.msk [vmem:[#allocation2] ss:$8 sm:$0x7] %vm1356_vm1, %v190_v58 }
  0xba   : > { %v497_v5 = vpop.permute.xlu0 %496 }
  0xbb   : > { %v508_v4 = vpop.permute.xlu1 %507  ;;  %v498_v7 = vrot.slane %v497_v5, 1 }
  0xbc   : > { %v509_v6 = vrot.slane %v508_v4, 1  ;;  %v442_v8 = vpop.permute.xlu2 %441 }
  0xbd   : > { %v500_v10 = vsel %vm499_vm3, %v497_v5, %v498_v7  ;;  %v443_v11 = vrot.slane %v442_v8, 1  ;;  %vm290_vm3 = vcmask 850944  }
  0xbe   : > { %v511_v9 = vsel %vm510_vm15, %v508_v4, %v509_v6  ;;  %503 = vst.msk [vmem:[#allocation2 + $0x4c] ss:$8 sm:$0x7] %vm1356_vm1, %v500_v10  ;;  %vm202_vm15 = vcmask 1039360  }
  0xbf   : > { %514 = vst.msk [vmem:[#allocation2 + $0x4d] ss:$8 sm:$0x7] %vm1356_vm1, %v511_v9  ;;  %v445_v13 = vsel %vm444_vm4, %v442_v8, %v443_v11  ;;  %vm279_vm4 = vcmask 859136  }
  0xc0   : > { %448 = vst.msk [vmem:[#allocation2 + $0x37] ss:$8 sm:$0x7] %vm1356_vm1, %v445_v13 }
  0xc2   : > { %v530_v14 = vpop.permute.xlu0 %529 }
  0xc3   : > { %v365_v15 = vpop.permute.xlu1 %364  ;;  %v531_v16 = vrot.slane %v530_v14, 1 }
  0xc4   : > { %v366_v17 = vrot.slane %v365_v15, 1  ;;  %v299_v18 = vpop.permute.xlu2 %298 }
  0xc5   : > { %v533_v19 = vsel %vm532_vm5, %v530_v14, %v531_v16  ;;  %v300_v21 = vrot.slane %v299_v18, 1  ;;  %vm323_vm5 = vcmask 826368  }
  0xc6   : > { %v368_v20 = vsel %vm367_vm6, %v365_v15, %v366_v17  ;;  %536 = vst.msk [vmem:[#allocation2 + $0x4f] ss:$8 sm:$0x7] %vm1356_vm1, %v533_v19  ;;  %vm312_vm6 = vcmask 834560  }
  0xc7   : > { %371 = vst.msk [vmem:[#allocation2 + $0x30] ss:$8 sm:$0x7] %vm1356_vm1, %v368_v20  ;;  %v302_v22 = vsel %vm301_vm8, %v299_v18, %v300_v21  ;;  %vm268_vm8 = vcmask 867328  }
  0xc8   : > { %305 = vst.msk [vmem:[#allocation2 + $0x1a] ss:$8 sm:$0x7] %vm1356_vm1, %v302_v22 }
  0xca   : > { %v387_v23 = vpop.permute.xlu0 %386 }
  0xcb   : > { %v398_v24 = vpop.permute.xlu1 %397  ;;  %v388_v25 = vrot.slane %v387_v23, 1 }
  0xcc   : > { %v399_v26 = vrot.slane %v398_v24, 1  ;;  %v332_v27 = vpop.permute.xlu2 %331 }
  0xcd   : > { %v390_v28 = vsel %vm389_vm10, %v387_v23, %v388_v25  ;;  %v736_v30 = vld [vmem:[#allocation2 + $0x48] sm:$0xff]  ;;  %v1449_v31 = vld [vmem:[#allocation2 + $0x50] sm:$0xff]  ;;  %v738_v32 = vld [vmem:[#allocation2 + $0x58] sm:$0xff]  ;;  %v333_v33 = vrot.slane %v332_v27, 1  ;;  %vm345_vm10 = vcmask 687104  }
  0xce   : > { %v401_v29 = vsel %vm400_vm11, %v398_v24, %v399_v26  ;;  %393 = vst.msk [vmem:[#allocation2 + $0x32] ss:$8 sm:$0x7] %vm1356_vm1, %v390_v28  ;;  %786 = vmatpush.msra.mxu0 %v736_v30  ;;  %1119 = vmatpush.msra.mxu3 %v736_v30  ;;  %vm224_vm11 = vcmask 1022976  }
  0xcf   : > { %404 = vst.msk [vmem:[#allocation2 + $0x33] ss:$8 sm:$0x7] %vm1356_vm1, %v401_v29  ;;  %1126 = vmatpush.msra.mxu1 %v1449_v31  ;;  %850 = vmatpush.msra.mxu2 %v738_v32  ;;  %v335_v35 = vsel %vm334_vm12, %v332_v27, %v333_v33  ;;  %vm213_vm12 = vcmask 1031168   ;;  %v722_v27 = vld [vmem:[%s1665_s1] sm:$0xff]  ;;  %v723_v32 = vld [vmem:[%s1665_s1 + $0x8] sm:$0xff] }
  0xd0   : > { %338 = vst.msk [vmem:[#allocation2 + $0x1d] ss:$8 sm:$0x7] %vm1356_vm1, %v335_v35  ;;  %v870_v33 = vld [vmem:[%s1666_s2] sm:$0x7] }
  0xd1   : > { %v1540_v35 = vperm.slane %v870_v33, 0 }
  0xd2   : > { %v420_v36 = vpop.permute.xlu0 %419 }
  0xd3   : > { %v431_v37 = vpop.permute.xlu1 %430  ;;  %v421_v38 = vrot.slane %v420_v36, 1 }
  0xd4   : > { %v432_v39 = vrot.slane %v431_v37, 1  ;;  %v200_v41 = vpop.permute.xlu2 %199 }
  0xd5   : > { %v423_v42 = vsel %vm422_vm13, %v420_v36, %v421_v38  ;;  %v201_v44 = vrot.slane %v200_v41, 1  ;;  %vm748_vm13 = vcmask 400384  }
  0xd6   : > { %v434_v43 = vsel %vm433_vm14, %v431_v37, %v432_v39  ;;  %426 = vst.msk [vmem:[#allocation2 + $0x35] ss:$8 sm:$0x7] %vm1356_vm1, %v423_v42  ;;  %v1544_v37 = vperm.slane %v870_v33, 1  ;;  %v1548_v39 = vperm.slane %v870_v33, 2 }
  0xd7   : > { %437 = vst.msk [vmem:[#allocation2 + $0x36] ss:$8 sm:$0x7] %vm1356_vm1, %v434_v43  ;;  %v203_v45 = vsel %vm202_vm15, %v200_v41, %v201_v44 }
  0xd8   : > { %206 = vst.msk [vmem:[#allocation2 + $0x1] ss:$8 sm:$0x7] %vm1356_vm1, %v203_v45 }
  0xda   : > { %v277_v47 = vpop.permute.xlu0 %276 }
  0xdb   : > { %v288_v46 = vpop.permute.xlu1 %287  ;;  %v278_v49 = vrot.slane %v277_v47, 1 }
  0xdc   : > { %v289_v48 = vrot.slane %v288_v46, 1  ;;  %v233_v50 = vpop.permute.xlu2 %232 }
  0xdd   : > { %v280_v52 = vsel %vm279_vm4, %v277_v47, %v278_v49  ;;  %v234_v53 = vrot.slane %v233_v50, 1 }
  0xde   : > { %v291_v51 = vsel %vm290_vm3, %v288_v46, %v289_v48  ;;  %v733_v54 = vld [vmem:[#allocation2 + $0x30] sm:$0xff]  ;;  %v1466_v55 = vld [vmem:[#allocation2 + $0x38] sm:$0xff]  ;;  %v735_v56 = vld [vmem:[#allocation2 + $0x40] sm:$0xff]  ;;  %283 = vst.msk [vmem:[#allocation2 + $0x18] ss:$8 sm:$0x7] %vm1356_vm1, %v280_v52 }
  0xdf   : > { %294 = vst.msk [vmem:[#allocation2 + $0x19] ss:$8 sm:$0x7] %vm1356_vm1, %v291_v51  ;;  %787 = vmatpush.msra.mxu0 %v733_v54  ;;  %1120 = vmatpush.msra.mxu3 %v733_v54  ;;  %v236_v57 = vsel %vm235_vm7, %v233_v50, %v234_v53  ;;  %vm356_vm7 = vcmask 678912  }
  0xe0   : > { %1127 = vmatpush.msra.mxu1 %v1466_v55  ;;  %851 = vmatpush.msra.mxu2 %v735_v56  ;;  %239 = vst.msk [vmem:[#allocation2 + $0x4] ss:$8 sm:$0x7] %vm1356_vm1, %v236_v57 }
  0xe2   : > { %v310_v60 = vpop.permute.xlu0 %309 }
  0xe3   : > { %v321_v59 = vpop.permute.xlu1 %320  ;;  %v311_v62 = vrot.slane %v310_v60, 1 }
  0xe4   : > { %v322_v61 = vrot.slane %v321_v59, 1  ;;  %v266_v63 = vpop.permute.xlu2 %265 }
  0xe5   : > { %v313_v2 = vsel %vm312_vm6, %v310_v60, %v311_v62  ;;  %v267_v3 = vrot.slane %v266_v63, 1 }
  0xe6   : > { %v324_v0 = vsel %vm323_vm5, %v321_v59, %v322_v61  ;;  %316 = vst.msk [vmem:[#allocation2 + $0x1b] ss:$8 sm:$0x7] %vm1356_vm1, %v313_v2 }
  0xe7   : > { %327 = vst.msk [vmem:[#allocation2 + $0x1c] ss:$8 sm:$0x7] %vm1356_vm1, %v324_v0  ;;  %v269_v4 = vsel %vm268_vm8, %v266_v63, %v267_v3 }
  0xe8   : > { %272 = vst.msk [vmem:[#allocation2 + $0x7] ss:$8 sm:$0x7] %vm1356_vm1, %v269_v4 }
  0xea   : > { %v343_v6 = vpop.permute.xlu0 %342 }
  0xeb   : > { %v354_v5 = vpop.permute.xlu1 %353  ;;  %v344_v8 = vrot.slane %v343_v6, 1 }
  0xec   : > { %v355_v7 = vrot.slane %v354_v5, 1 }
  0xed   : > { %v346_v10 = vsel %vm345_vm10, %v343_v6, %v344_v8 }
  0xee   : > { %v357_v9 = vsel %vm356_vm7, %v354_v5, %v355_v7  ;;  %349 = vst.msk [vmem:[#allocation2 + $0x1e] ss:$8 sm:$0x7] %vm1356_vm1, %v346_v10 }
  0xef   : > { %360 = vst.msk [vmem:[#allocation2 + $0x1f] ss:$8 sm:$0x7] %vm1356_vm1, %v357_v9 }
  0xf2   : > { %v211_v13 = vpop.permute.xlu0 %210 }
  0xf3   : > { %v222_v11 = vpop.permute.xlu1 %221  ;;  %v212_v15 = vrot.slane %v211_v13, 1 }
  0xf4   : > { %v223_v14 = vrot.slane %v222_v11, 1 }
  0xf5   : > { %v214_v17 = vsel %vm213_vm12, %v211_v13, %v212_v15 }
  0xf6   : > { %v225_v16 = vsel %vm224_vm11, %v222_v11, %v223_v14  ;;  %v730_v18 = vld [vmem:[#allocation2 + $0x18] sm:$0xff]  ;;  %v731_v19 = vld [vmem:[#allocation2 + $0x20] sm:$0xff]  ;;  %v732_v20 = vld [vmem:[#allocation2 + $0x28] sm:$0xff]  ;;  %217 = vst.msk [vmem:[#allocation2 + $0x2] ss:$8 sm:$0x7] %vm1356_vm1, %v214_v17 }
  0xf7   : > { %228 = vst.msk [vmem:[#allocation2 + $0x3] ss:$8 sm:$0x7] %vm1356_vm1, %v225_v16  ;;  %788 = vmatpush.msra.mxu0 %v730_v18  ;;  %1121 = vmatpush.msra.mxu3 %v730_v18 }
  0xf8   : > { %1128 = vmatpush.msra.mxu1 %v731_v19  ;;  %852 = vmatpush.msra.mxu2 %v732_v20 }
  0xfa   : > { %v244_v22 = vpop.permute.xlu0 %243 }
  0xfb   : > { %v255_v21 = vpop.permute.xlu1 %254  ;;  %v245_v24 = vrot.slane %v244_v22, 1 }
  0xfc   : > { %v256_v23 = vrot.slane %v255_v21, 1 }
  0xfd   : > { %v247_v26 = vsel %vm246_vm0, %v244_v22, %v245_v24  ;;  %vm894_vm0 = vcmask 785408  }
  0xfe   : > { %v258_v25 = vsel %vm257_vm2, %v255_v21, %v256_v23  ;;  %250 = vst.msk [vmem:[#allocation2 + $0x5] ss:$8 sm:$0x7] %vm1356_vm1, %v247_v26  ;;  %vm1000_vm2 = vcmask 15368  }
  0xff   : > { %261 = vst.msk [vmem:[#allocation2 + $0x6] ss:$8 sm:$0x7] %vm1356_vm1, %v258_v25  ;;  %vm994_vm1 = vcmask 7168  }
 0x106   : > { %v727_v28 = vld [vmem:[#allocation2] sm:$0xff]  ;;  %v728_v29 = vld [vmem:[#allocation2 + $0x8] sm:$0xff]  ;;  %v729_v30 = vld [vmem:[#allocation2 + $0x10] sm:$0xff] }
 0x107   : > { %789 = vmatpush.msra.mxu0 %v727_v28  ;;  %1122 = vmatpush.msra.mxu3 %v727_v28 }
 0x108   : > { %1129 = vmatpush.msra.mxu1 %v728_v29  ;;  %853 = vmatpush.msra.mxu2 %v729_v30 }
 0x109   : > { %1102 = vmatpush.msk.msrb.mxu0 %vm764_vm9, %v1388_v12  ;;  %1109 = vmatmul.msk.f32.vlgmr.msra.gmra.mxu2 %vm748_vm13, %v722_v27  ;;  %v725_v12 = vld [vmem:[%s1665_s1 + $0x18] sm:$0xff] }
 0x10a   : > { %1097 = vmatmul.msk.f32.vlgmr.msra.gmra.mxu0 %vm748_vm13, %v722_v27  ;;  %1098 = vmatmul.msk.f32.vlgmr.msra.gmra.mxu3 %vm748_vm13, %v723_v32 }
 0x10b   : > { %816 = vmatpush.msrb.mxu0 %v1409_v34  ;;  %1104 = vmatmul.msk.f32.vlgmr.msra.gmra.mxu1 %vm748_vm13, %v723_v32  ;;  %v726_v34 = vld [vmem:[%s1665_s1 + $0x20] sm:$0xff] }
 0x10d   : > { %817 = vmatpush.msrb.mxu0 %v1430_v1 }
 0x10f   : > { %818 = vmatpush.msrb.mxu0 %v1449_v31 }
 0x111   : > { %819 = vmatpush.msrb.mxu0 %v1466_v55  ;;  %1110 = vmatmul.msk.f32.gmra.mxu2 %vm748_vm13, %v723_v32 }
 0x112   : > { %1099 = vmatmul.msk.f32.gmra.mxu3 %vm748_vm13, %v724_v40 }
 0x113   : > { %820 = vmatpush.msrb.mxu0 %v731_v19  ;;  %1105 = vmatmul.msk.f32.gmra.mxu1 %vm748_vm13, %v724_v40 }
 0x115   : > { %821 = vmatpush.msrb.mxu0 %v728_v29 }
 0x116   : > { %1103 = vmatmul.msk.f32.vlgmr.msrb.gmra.mxu0 %vm748_vm13, %v722_v27 }
 0x119   : > { %1111 = vmatmul.msk.f32.gmra.mxu2 %vm748_vm13, %v724_v40 }
 0x11a   : > { %1100 = vmatmul.msk.f32.gmra.mxu3 %vm748_vm13, %v725_v12 }
 0x11b   : > { %1106 = vmatmul.msk.f32.gmra.mxu1 %vm748_vm13, %v725_v12 }
 0x121   : > { %1112 = vmatmul.msk.f32.gmra.mxu2 %vm748_vm13, %v725_v12 }
 0x122   : > { %1101 = vmatmul.msk.f32.gmra.mxu3 %vm748_vm13, %v726_v34 }
 0x123   : > { %1107 = vmatmul.msk.f32.gmra.mxu1 %vm748_vm13, %v726_v34 }
 0x129   : > { %1113 = vmatmul.msk.f32.gmra.mxu2 %vm748_vm13, %v726_v34 }
 0x187   : > { %v1535_v31 = vpop.f32.mrf.mxu0 }
 0x188   : > { %v1533_v1 = vpop.f32.mrf.mxu1  ;;  %v878_v44 = vmul.f32 %v1540_v35, %v1535_v31 }
 0x189   : > { %v882_v42 = vmul.f32 %v1544_v37, %v1533_v1 }
 0x18c   : > { %v1542_v36 = vpop.f32.mrf.mxu2 }
 0x18d   : > { %v1546_v38 = vpop.f32.mrf.mxu3  ;;  %v880_v45 = vmul.f32 %v1548_v39, %v1542_v36 }
 0x18e   : > { %v881_v41 = vmul.f32 %v1540_v35, %v1546_v38 }
 0x18f   : > { %v895_v54 = vsel %vm894_vm0, %v880_v45, 0.0 }
 0x190   : > { %v1554_v43 = vpop.f32.mrf.mxu1  ;;  %v899_v49 = vadd.f32 %v882_v42, %v881_v41 }
 0x191   : > { %v885_v58 = vmul.f32 %v1544_v37, %v1554_v43 }
 0x193   : > { %v823_v46 = vpop.f32.mrf.mxu0 }
 0x194   : > { %v879_v47 = vmul.f32 %v1544_v37, %v823_v46  ;;  %v858_v48 = vpop.f32.mrf.mxu2 }
 0x195   : > { %v883_v50 = vmul.f32 %v1548_v39, %v858_v48  ;;  %v1562_v51 = vpop.f32.mrf.mxu3 }
 0x196   : > { %v893_v52 = vadd.f32 %v879_v47, %v878_v44  ;;  %v884_v57 = vmul.f32 %v1540_v35, %v1562_v51 }
 0x197   : > { %v900_v53 = vsel %vm894_vm0, %v883_v50, 0.0 }
 0x198   : > { %v901_v55 = vadd.f32 %v900_v53, %v899_v49  ;;  %v896_v56 = vadd.f32 %v895_v54, %v893_v52  ;;  %v1570_v59 = vpop.f32.mrf.mxu1  ;;  %v904_v61 = vadd.f32 %v885_v58, %v884_v57 }
 0x199   : > { %v888_v4 = vmul.f32 %v1544_v37, %v1570_v59 }
 0x19a   : > { %902 = vadd.xlane.f32.xlu1 %v901_v55  ;;  %897 = vadd.xlane.f32.xlu0 %v896_v56 }
 0x19c   : > { %v1572_v60 = vpop.f32.mrf.mxu2 }
 0x19d   : > { %v886_v62 = vmul.f32 %v1548_v39, %v1572_v60  ;;  %v1576_v63 = vpop.f32.mrf.mxu3 }
 0x19e   : > { %v887_v3 = vmul.f32 %v1540_v35, %v1576_v63 }
 0x19f   : > { %v905_v0 = vsel %vm894_vm0, %v886_v62, 0.0 }
 0x1a0   : > { %v906_v2 = vadd.f32 %v905_v0, %v904_v61  ;;  %v909_v6 = vadd.f32 %v888_v4, %v887_v3  ;;  %v1589_v9 = vpop.f32.mrf.mxu1 }
 0x1a1   : > { %v891_v14 = vmul.f32 %v1544_v37, %v1589_v9 }
 0x1a2   : > { %907 = vadd.xlane.f32.xlu2 %v906_v2 }
 0x1a4   : > { %v1583_v5 = vpop.f32.mrf.mxu2 }
 0x1a5   : > { %v889_v7 = vmul.f32 %v1548_v39, %v1583_v5  ;;  %v1587_v8 = vpop.f32.mrf.mxu3 }
 0x1a6   : > { %v890_v13 = vmul.f32 %v1540_v35, %v1587_v8 }
 0x1a7   : > { %v910_v10 = vsel %vm894_vm0, %v889_v7, 0.0 }
 0x1a8   : > { %v911_v11 = vadd.f32 %v910_v10, %v909_v6  ;;  %v914_v15 = vadd.f32 %v891_v14, %v890_v13 }
 0x1aa   : > { %912 = vadd.xlane.f32.xlu2 %v911_v11 }
 0x1ac   : > { %v1596_v16 = vpop.f32.mrf.mxu2 }
 0x1ad   : > { %v892_v17 = vmul.f32 %v1548_v39, %v1596_v16 }
 0x1af   : > { %v915_v18 = vsel %vm894_vm0, %v892_v17, 0.0 }
 0x1b0   : > { %v916_v19 = vadd.f32 %v915_v18, %v914_v15 }
 0x1b2   : > { %917 = vadd.xlane.f32.xlu0 %v916_v19 }
 0x20d   : > { %v903_v20 = vpop.xlane.xlu1 %902  ;;  %v898_v21 = vpop.xlane.xlu0 %897 }
 0x20e   : > { %v920_v22 = vmul.f32 0.00390625, %v903_v20  ;;  %996 = vst.msk [vmem:[%s1605_s11 + $0x8] sm:$0xff] %vm994_vm1, %v903_v20  ;;  %v919_v23 = vmul.f32 0.00390625, %v898_v21 }
 0x20f   : > { %995 = vst.msk [vmem:[%s1605_s11] sm:$0xff] %vm994_vm1, %v898_v21 }
 0x210   : > { %v927_v24 = vsub.f32 %v1546_v38, %v920_v22  ;;  %v928_v25 = vsub.f32 %v1533_v1, %v920_v22  ;;  %v929_v26 = vsub.f32 %v858_v48, %v920_v22  ;;  %v924_v27 = vsub.f32 %v1535_v31, %v919_v23 }
 0x211   : > { %v925_v28 = vsub.f32 %v823_v46, %v919_v23  ;;  %v926_v29 = vsub.f32 %v1542_v36, %v919_v23 }
 0x212   : > { %v942_v30 = vmul.f32 %v927_v24, %v1540_v35  ;;  %v943_v32 = vmul.f32 %v928_v25, %v1544_v37  ;;  %v944_v40 = vmul.f32 %v929_v26, %v1548_v39  ;;  %v939_v12 = vmul.f32 %v924_v27, %v1540_v35 }
 0x213   : > { %v940_v34 = vmul.f32 %v925_v28, %v1544_v37  ;;  %v941_v33 = vmul.f32 %v926_v29, %v1548_v39 }
 0x214   : > { %v957_v1 = vmul.f32 %v942_v30, %v942_v30  ;;  %v958_v38 = vmul.f32 %v943_v32, %v943_v32  ;;  %v959_v41 = vmul.f32 %v944_v40, %v944_v40  ;;  %v954_v31 = vmul.f32 %v939_v12, %v939_v12 }
 0x215   : > { %v908_v42 = vpop.xlane.xlu2 %907  ;;  %v955_v44 = vmul.f32 %v940_v34, %v940_v34  ;;  %v956_v45 = vmul.f32 %v941_v33, %v941_v33 }
 0x216   : > { %v921_v36 = vmul.f32 0.00390625, %v908_v42  ;;  %997 = vst.msk [vmem:[%s1605_s11 + $0x10] sm:$0xff] %vm994_vm1, %v908_v42  ;;  %v974_v46 = vadd.f32 %v958_v38, %v957_v1  ;;  %v975_v47 = vsel %vm894_vm0, %v959_v41, 0.0 }
 0x217   : > { %v969_v48 = vadd.f32 %v955_v44, %v954_v31  ;;  %v970_v49 = vsel %vm894_vm0, %v956_v45, 0.0 }
 0x218   : > { %v930_v50 = vsub.f32 %v1562_v51, %v921_v36  ;;  %v931_v52 = vsub.f32 %v1554_v43, %v921_v36  ;;  %v932_v53 = vsub.f32 %v1572_v60, %v921_v36  ;;  %v976_v54 = vadd.f32 %v975_v47, %v974_v46 }
 0x219   : > { %v971_v55 = vadd.f32 %v970_v49, %v969_v48 }
 0x21a   : > { %977 = vadd.xlane.f32.xlu2 %v976_v54  ;;  %v945_v56 = vmul.f32 %v930_v50, %v1540_v35  ;;  %v946_v57 = vmul.f32 %v931_v52, %v1544_v37  ;;  %v947_v58 = vmul.f32 %v932_v53, %v1548_v39 }
 0x21b   : > { %972 = vadd.xlane.f32.xlu1 %v971_v55 }
 0x21c   : > { %v960_v61 = vmul.f32 %v945_v56, %v945_v56  ;;  %v961_v62 = vmul.f32 %v946_v57, %v946_v57  ;;  %v962_v0 = vmul.f32 %v947_v58, %v947_v58 }
 0x21d   : > { %v913_v2 = vpop.xlane.xlu2 %912 }
 0x21e   : > { %v922_v3 = vmul.f32 0.00390625, %v913_v2  ;;  %998 = vst.msk [vmem:[%s1605_s11 + $0x18] sm:$0xff] %vm994_vm1, %v913_v2  ;;  %v979_v43 = vadd.f32 %v961_v62, %v960_v61  ;;  %v980_v51 = vsel %vm894_vm0, %v962_v0, 0.0 }
 0x220   : > { %v933_v60 = vsub.f32 %v1576_v63, %v922_v3  ;;  %v934_v4 = vsub.f32 %v1570_v59, %v922_v3  ;;  %v935_v6 = vsub.f32 %v1583_v5, %v922_v3  ;;  %v981_v7 = vadd.f32 %v980_v51, %v979_v43 }
 0x222   : > { %982 = vadd.xlane.f32.xlu0 %v981_v7  ;;  %v948_v10 = vmul.f32 %v933_v60, %v1540_v35  ;;  %v949_v11 = vmul.f32 %v934_v4, %v1544_v37  ;;  %v950_v13 = vmul.f32 %v935_v6, %v1548_v39 }
 0x224   : > { %v963_v14 = vmul.f32 %v948_v10, %v948_v10  ;;  %v964_v15 = vmul.f32 %v949_v11, %v949_v11  ;;  %v965_v17 = vmul.f32 %v950_v13, %v950_v13 }
 0x225   : > { %v918_v18 = vpop.xlane.xlu0 %917 }
 0x226   : > { %v923_v19 = vmul.f32 0.00390625, %v918_v18  ;;  %999 = vst.msk [vmem:[%s1605_s11 + $0x20] sm:$0xff] %vm994_vm1, %v918_v18  ;;  %v984_v63 = vadd.f32 %v964_v15, %v963_v14  ;;  %v985_v59 = vsel %vm894_vm0, %v965_v17, 0.0 }
 0x228   : > { %v936_v5 = vsub.f32 %v1587_v8, %v923_v19  ;;  %v937_v20 = vsub.f32 %v1589_v9, %v923_v19  ;;  %v938_v21 = vsub.f32 %v1596_v16, %v923_v19  ;;  %v986_v22 = vadd.f32 %v985_v59, %v984_v63 }
 0x22a   : > { %987 = vadd.xlane.f32.xlu1 %v986_v22  ;;  %v951_v23 = vmul.f32 %v936_v5, %v1540_v35  ;;  %v952_v24 = vmul.f32 %v937_v20, %v1544_v37  ;;  %v953_v25 = vmul.f32 %v938_v21, %v1548_v39 }
 0x22c   : > { %v966_v26 = vmul.f32 %v951_v23, %v951_v23  ;;  %v967_v27 = vmul.f32 %v952_v24, %v952_v24  ;;  %v968_v8 = vmul.f32 %v953_v25, %v953_v25 }
 0x22e   : > { %v989_v28 = vadd.f32 %v967_v27, %v966_v26  ;;  %v990_v9 = vsel %vm894_vm0, %v968_v8, 0.0 }
 0x230   : > { %v991_v29 = vadd.f32 %v990_v9, %v989_v28 }
 0x232   : > { %992 = vadd.xlane.f32.xlu2 %v991_v29 }
 0x28d   : > { %v978_v16 = vpop.xlane.xlu2 %977 }
 0x28e   : > { %1002 = vst.msk [vmem:[%s1605_s11 + $0x8] sm:$0xff] %vm1000_vm2, %v978_v16  ;;  %v973_v30 = vpop.xlane.xlu1 %972 }
 0x28f   : > { %1001 = vst.msk [vmem:[%s1605_s11] sm:$0xff] %vm1000_vm2, %v973_v30 }
 0x295   : > { %v983_v35 = vpop.xlane.xlu0 %982 }
 0x296   : > { %1003 = vst.msk [vmem:[%s1605_s11 + $0x10] sm:$0xff] %vm1000_vm2, %v983_v35 }
 0x29d   : > { %v988_v37 = vpop.xlane.xlu1 %987 }
 0x29e   : > { %1004 = vst.msk [vmem:[%s1605_s11 + $0x18] sm:$0xff] %vm1000_vm2, %v988_v37 }
 0x2a5   : > { %v993_v39 = vpop.xlane.xlu2 %992 }
 0x2a6   : > { %1005 = vst.msk [vmem:[%s1605_s11 + $0x20] sm:$0xff] %vm1000_vm2, %v993_v39 }
 0x2a7 PF: > { %s13_s14 = sadd.s32 1, %s1222_s14   ;;  %s1670_s12 = smov %s1218_s13 }
 0x2a8   : > { %p10_p5 = scmp.ge.s32.totalorder %s13_s14, 4   ;;  %s1671_s13 = smov %s1673_s15 }
 0x2aa   :  { %12 = sbr.rel (!%p10_p5) target bundleno = 2 (0x2), region = 110 }

// kernel: inception_block.3
= control target key start
LH: loop header
LB: loop body
LE: loop exit
PB: predicated region body
PF: predicated region fallthrough
CT: control target
= control target key end

     0   :  { %s1584_s18 = smov 0   ;;  %s1586_s19 = smov 0   ;;  %s2053_s0 = inlined_call_operand.vmem [shape: f32[2,1,512], index: 0, kind: input, shape index: {}]   ;;  %s2054_s1 = inlined_call_operand.vmem [shape: f32[40,49], index: 1, kind: input, shape index: {}]   ;;  %s2055_s2 = inlined_call_operand.vmem [shape: f32[2,40,2], index: 2, kind: input, shape index: {}]   ;;  %s2056_s3 = inlined_call_operand.vmem [shape: f32[40,1], index: 3, kind: input, shape index: {}]   ;;  %s2057_s4 = inlined_call_operand.vmem [shape: f32[40,1], index: 4, kind: input, shape index: {}]   ;;  %s2058_s5 = inlined_call_operand.vmem [shape: f32[2,1,36,352], index: 5, kind: output, shape index: {}]  }
   0x1   :  { %s1588_s20 = smov 0  }
   0x2 LB: > { %s27_s21 = sadd.s32 1, %s1500_s19  ;;  %p1357_p0 = scmp.ge.s32.totalorder %s1504_s20, 1  ;;  %s1504_s20 = sphi %s1588_s20, %s15_s20   ;;  %s1500_s19 = sphi %s1586_s19, %s2062_s19   ;;  %s1496_s18 = sphi %s1584_s18, %s2061_s18  }
   0x3   : > { %p29_p1 = scmp.ge.s32.totalorder %s27_s21, 2  ;;  %p200_p2 = scmp.lt.s32.totalorder %s1504_s20, 3 }
   0x5   : > { %s2064_s21 = smov (%p29_p1, %s27_s21), 0  ;;  %p201_p3 = pnand %p1357_p0, %p200_p2 }
   0x6   : > { %p231_p4 = scmp.lt.s32.totalorder (!%p201_p3), %s1496_s18, 1  ;;  %s1506_s26 = smov (!%p201_p3), 118  }
   0x7   : > { %204 = sbr.rel (%p201_p3) target bundleno = 526 (0x20e), region = 40  ;;  %s1507_s27 = smov (!%p201_p3), 123  }
   0x8   : > { %s1508_s28 = smov (!%p201_p3), 12   ;;  %s1509_s29 = smov (!%p201_p3), 122  }
   0x9   : > { %s1510_s30 = smov (!%p201_p3), 13   ;;  %s1511_s6 = smov (!%p201_p3), 124  }
   0xa   : > { %s1512_s7 = smov (!%p201_p3), 119   ;;  %s1513_s8 = smov (!%p201_p3), 121  }
   0xb   : > { %s1514_s9 = smov (!%p201_p3), 120   ;;  %s1515_s10 = smov (!%p201_p3), 34  }
   0xc   : > { %s2066_s18 = smov (!%p231_p4, %s1496_s18), 1  ;;  %s1516_s11 = smov 36   ;;  %v1536_v30 = vmov 512.0   ;;  %v245_v39 = vlaneseq  ;;  %vm300_vm0 = vcmask 1006592   ;;  %v1657_v46 = vld [vmem:[%s2055_s2 + $0x8] sm:$0xff]  ;;  %v1662_v47 = vld [vmem:[%s2055_s2 + $0x30] sm:$0xff] }
   0xd   : > { %s1358_s22 = sshll.u32 %s2066_s18, 2  ;;  %s1517_s12 = smov 35   ;;  %1470 = vrcp.f32 %v1536_v30  ;;  %vm934_vm2 = vcmask 7168   ;;  %v1669_v50 = vld [vmem:[%s2055_s2] sm:$0xff]  ;;  %v1674_v51 = vld [vmem:[%s2055_s2 + $0x28] sm:$0xff]  ;;  %v1686_v56 = vld [vmem:[%s2055_s2 + $0x10] sm:$0xff] }
   0xe   : > { %s1608_s25 = scalar_lea.vmem %s2053_s0, %s1358_s22  ;;  %s1518_s13 = smov 16   ;;  %vm1649_vm1 = vcmp.lt.s32.totalorder %v245_v39, 352  ;;  %v938_v53 = vsel %vm934_vm2, %v1657_v46, 0.0  ;;  %v939_v54 = vsel %vm934_vm2, %v1662_v47, 0.0  ;;  %v1691_v57 = vld [vmem:[%s2055_s2 + $0x38] sm:$0xff]  ;;  %v935_v58 = vsel %vm934_vm2, %v1669_v50, 0.0 }
   0xf   : > { %v765_v0 = vld [vmem:[%s1608_s25 + $0x1] sm:$0x7]  ;;  %s1519_s14 = smov 18   ;;  %s1520_s15 = smov 17   ;;  %v936_v59 = vsel %vm934_vm2, %v1674_v51, 0.0  ;;  %vm311_vm4 = vcmask 998400   ;;  %v940_v61 = vadd.f32 %v939_v54, %v938_v53 }
  0x10   : > { %v712_v1 = vld [vmem:[%s1608_s25 + $0x1] sm:$0x7]  ;;  %767 = vrot.lane.b32.xlu0 %v765_v0, %s1506_s26  ;;  %s1521_s16 = smov 15   ;;  %s1522_s17 = smov 59   ;;  %v941_v62 = vsel %vm934_vm2, %v1686_v56, 0.0  ;;  %v942_v63 = vsel %vm934_vm2, %v1691_v57, 0.0 }
  0x11   : > { %v691_v2 = vld [vmem:[%s1608_s25] sm:$0xf]  ;;  %714 = vrot.lane.b32.xlu2 %v712_v1, %s1507_s27  ;;  %s1523_s22 = smov 14   ;;  %s1524_s23 = smov 58   ;;  %vm759_vm5 = vcmask 973824   ;;  %vm770_vm6 = vcmask 965632  }
  0x12   : > { %693 = vrot.lane.b32.xlu1 %v691_v2, %s1508_s28  ;;  %v722_v3 = vld [vmem:[%s1608_s25 + $0x1] sm:$0x7]  ;;  %s1525_s24 = smov 56   ;;  %s1526_s26 = smov 57   ;;  %v937_v2 = vadd.f32 %v936_v59, %v935_v58  ;;  %vm696_vm7 = vcmask 97280   ;;  %vm619_vm8 = vcmask 277504  }
  0x13   : > { %v680_v4 = vld [vmem:[%s1608_s25] sm:$0xf]  ;;  %s1527_s28 = smov 40   ;;  %v1471_v34 = vpop.eup %1470  ;;  %vm289_vm9 = vcmask 1014784   ;;  %vm685_vm10 = vcmask 105472   ;;  %vm652_vm11 = vcmask 130048  }
  0x14   : > { %v702_v5 = vld [vmem:[%s1608_s25 + $0x1] sm:$0x7]  ;;  %v951_v35 = vmul.f32 512.0, %v1471_v34  ;;  %vm955_vm3 = vweird.f32 %v1471_v34  ;;  %vm818_vm12 = vcmask 1040384   ;;  %vm737_vm13 = vcmask 990208  }
  0x15   : > { %v754_v6 = vld [vmem:[%s1608_s25 + $0x1] sm:$0x7]  ;;  %vm509_vm14 = vcmask 482304   ;;  %vm748_vm15 = vcmask 982016  }
  0x16   : > { %v732_v7 = vld [vmem:[%s1608_s25 + $0x1] sm:$0x7]  ;;  %v952_v40 = vsub.f32 1.0, %v951_v35 }
  0x17   : > { %v743_v8 = vld [vmem:[%s1608_s25 + $0x1] sm:$0x7] }
  0x18   : > { %682 = vrot.lane.b32.xlu0 %v680_v4, %s1510_s30  ;;  %v614_v9 = vld [vmem:[%s1608_s25] sm:$0xf]  ;;  %s1528_s30 = smov 38   ;;  %v953_v44 = vmul.f32 %v1471_v34, %v952_v40 }
  0x19   : > { %724 = vrot.lane.b32.xlu2 %v722_v3, %s1509_s29  ;;  %v592_v10 = vld [vmem:[%s1608_s25] sm:$0xf] }
  0x1a   : > { %704 = vrot.lane.b32.xlu1 %v702_v5, %s1511_s6  ;;  %v603_v11 = vld [vmem:[%s1608_s25] sm:$0xf]  ;;  %v954_v55 = vadd.f32 %v1471_v34, %v953_v44 }
  0x1b   : > { %v647_v12 = vld [vmem:[%s1608_s25] sm:$0xf] }
  0x1c   : > { %v625_v13 = vld [vmem:[%s1608_s25] sm:$0xf]  ;;  %v1701_v1 = vsel %vm955_vm3, %v1471_v34, %v954_v55  ;;  %vm542_vm3 = vcmask 457728  }
  0x1d   : > { %v636_v14 = vld [vmem:[%s1608_s25] sm:$0xf] }
  0x1e   : > { %v658_v15 = vld [vmem:[%s1608_s25] sm:$0xf] }
  0x1f   : > { %v504_v16 = vld [vmem:[%s1608_s25] sm:$0xf] }
  0x20   : > { %734 = vrot.lane.b32.xlu0 %v732_v7, %s1513_s8  ;;  %v669_v17 = vld [vmem:[%s1608_s25] sm:$0xf]  ;;  %s1530_s8 = smov 37   ;;  %v963_v7 = vmul.f32 0.00390625, %v1657_v46 }
  0x21   : > { %756 = vrot.lane.b32.xlu2 %v754_v6, %s1512_s7  ;;  %v515_v18 = vld [vmem:[%s1608_s25] sm:$0xf]  ;;  %s1529_s7 = smov 39  }
  0x22   : > { %745 = vrot.lane.b32.xlu1 %v743_v8, %s1514_s9  ;;  %v537_v19 = vld [vmem:[%s1608_s25] sm:$0xf]  ;;  %s1531_s9 = smov 81   ;;  %v943_v8 = vadd.f32 %v942_v63, %v941_v62 }
  0x23   : > { %v526_v20 = vld [vmem:[%s1608_s25] sm:$0xf] }
  0x24   : > { %v548_v21 = vld [vmem:[%s1608_s25] sm:$0xf] }
  0x25   : > { %v570_v22 = vld [vmem:[%s1608_s25] sm:$0xf] }
  0x26   : > { %v559_v23 = vld [vmem:[%s1608_s25] sm:$0xf] }
  0x27   : > { %v581_v24 = vld [vmem:[%s1608_s25] sm:$0xf] }
  0x28   : > { %594 = vrot.lane.b32.xlu0 %v592_v10, %s1516_s11  ;;  %v427_v25 = vld [vmem:[%s1608_s25] sm:$0xf]  ;;  %s1533_s11 = smov 80   ;;  %v968_v10 = vmul.f32 0.00390625, %v1662_v47 }
  0x29   : > { %616 = vrot.lane.b32.xlu2 %v614_v9, %s1515_s10  ;;  %v416_v26 = vld [vmem:[%s1608_s25] sm:$0xf]  ;;  %s1532_s10 = smov 82   ;;  %v1711_v9 = vmul.f32 %v1701_v1, %v940_v61 }
  0x2a   : > { %605 = vrot.lane.b32.xlu1 %v603_v11, %s1517_s12  ;;  %v438_v27 = vld [vmem:[%s1608_s25] sm:$0xf]  ;;  %s1534_s12 = smov 78   ;;  %v1717_v11 = vld [vmem:[%s2055_s2 + $0x18] sm:$0xff] }
  0x2b   : > { %v460_v28 = vld [vmem:[%s1608_s25] sm:$0xf] }
  0x2c   : > { %v449_v29 = vld [vmem:[%s1608_s25] sm:$0xf] }
  0x2d   : > { %v471_v31 = vld [vmem:[%s1608_s25] sm:$0xf] }
  0x2e   : > { %v493_v32 = vld [vmem:[%s1608_s25] sm:$0xf] }
  0x2f   : > { %v482_v33 = vld [vmem:[%s1608_s25] sm:$0xf] }
  0x30   : > { %627 = vrot.lane.b32.xlu0 %v625_v13, %s1519_s14  ;;  %s1537_s14 = smov 62   ;;  %v350_v36 = vld [vmem:[%s1608_s25] sm:$0x7]  ;;  %v1725_v13 = vmul.f32 %v1701_v1, %v937_v2 }
  0x31   : > { %649 = vrot.lane.b32.xlu2 %v647_v12, %s1518_s13  ;;  %s1535_s13 = smov 79   ;;  %v328_v37 = vld [vmem:[%s1608_s25] sm:$0x7] }
  0x32   : > { %638 = vrot.lane.b32.xlu1 %v636_v14, %s1520_s15  ;;  %s1538_s15 = smov 60   ;;  %v339_v38 = vld [vmem:[%s1608_s25] sm:$0x7]  ;;  %v962_v14 = vmul.f32 0.00390625, %v1669_v50 }
  0x33   : > { %v383_v45 = vld [vmem:[%s1608_s25] sm:$0x7] }
  0x34   : > { %v361_v49 = vld [vmem:[%s1608_s25] sm:$0x7] }
  0x35   : > { %v372_v52 = vld [vmem:[%s1608_s25] sm:$0x7] }
  0x36   : > { %v405_v3 = vld [vmem:[%s1608_s25] sm:$0xf] }
  0x37   : > { %v394_v5 = vld [vmem:[%s1608_s25] sm:$0xf] }
  0x38   : > { %660 = vrot.lane.b32.xlu0 %v658_v15, %s1521_s16  ;;  %s1539_s16 = smov 61   ;;  %v251_v6 = vld [vmem:[%s1608_s25] sm:$0x7]  ;;  %v967_v15 = vmul.f32 0.00390625, %v1674_v51 }
  0x39   : > { %506 = vrot.lane.b32.xlu2 %v504_v16, %s1522_s17  ;;  %s1540_s17 = smov 103   ;;  %v1722_v12 = vld [vmem:[%s2055_s2 + $0x40] sm:$0xff]  ;;  %v964_v16 = vmul.f32 0.00390625, %v1686_v56 }
  0x3a   : > { %671 = vrot.lane.b32.xlu1 %v669_v17, %s1523_s22  ;;  %s1541_s22 = smov 105   ;;  %v1734_v17 = vld [vmem:[%s2055_s2 + $0x20] sm:$0xff]  ;;  %v993_v30 = vsub.f32 %v967_v15, %v1725_v13 }
  0x3b   : > { %v284_v34 = vld [vmem:[%s1608_s25] sm:$0x7]  ;;  %v966_v59 = vmul.f32 0.00390625, %v1734_v17 }
  0x40   : > { %517 = vrot.lane.b32.xlu0 %v515_v18, %s1524_s23  ;;  %s1542_s23 = smov 104   ;;  %v1739_v18 = vld [vmem:[%s2055_s2 + $0x48] sm:$0xff] }
  0x41   : > { %539 = vrot.lane.b32.xlu2 %v537_v19, %s1525_s24  ;;  %v1742_v19 = vmul.f32 %v1701_v1, %v943_v8 }
  0x42   : > { %528 = vrot.lane.b32.xlu1 %v526_v20, %s1526_s26  ;;  %v969_v20 = vmul.f32 0.00390625, %v1691_v57  ;;  %s1394_s26 = smul.u32 120, %s2066_s18 }
  0x43   : > { %v990_v35 = vsub.f32 %v964_v16, %v1742_v19 }
  0x48   : > { %550 = vrot.lane.b32.xlu0 %v548_v21, %s1527_s28  ;;  %s1546_s28 = smov 84   ;;  %v944_v21 = vsel %vm934_vm2, %v1717_v11, 0.0 }
  0x49   : > { %572 = vrot.lane.b32.xlu2 %v570_v22, %s1528_s30  ;;  %s1547_s30 = smov 127   ;;  %v945_v22 = vsel %vm934_vm2, %v1722_v12, 0.0 }
  0x4a   : > { %561 = vrot.lane.b32.xlu1 %v559_v23, %s1529_s7 }
  0x50   : > { %583 = vrot.lane.b32.xlu0 %v581_v24, %s1530_s8  ;;  %v989_v24 = vsub.f32 %v963_v7, %v1711_v9  ;;  %s2023_s8 = scalar_lea.vmem %s2058_s5, %s1394_s26 }
  0x51   : > { %429 = vrot.lane.b32.xlu2 %v427_v25, %s1531_s9  ;;  %v994_v25 = vsub.f32 %v968_v10, %v1711_v9  ;;  %v295_v10 = vld [vmem:[%s1608_s25] sm:$0x7] }
  0x52   : > { %418 = vrot.lane.b32.xlu1 %v416_v26, %s1532_s10 }
  0x53   : > { %v1004_v40 = vmul.f32 %v994_v25, %v994_v25 }
  0x58   : > { %440 = vrot.lane.b32.xlu0 %v438_v27, %s1533_s11  ;;  %s1548_s11 = smov 83   ;;  %v988_v27 = vsub.f32 %v962_v14, %v1725_v13  ;;  %v317_v14 = vld [vmem:[%s1608_s25] sm:$0x7] }
  0x59   : > { %462 = vrot.lane.b32.xlu2 %v460_v28, %s1534_s12  ;;  %v947_v28 = vsel %vm934_vm2, %v1734_v17, 0.0  ;;  %s1549_s12 = smov 126  }
  0x5a   : > { %451 = vrot.lane.b32.xlu1 %v449_v29, %s1535_s13  ;;  %v948_v29 = vsel %vm934_vm2, %v1739_v18, 0.0  ;;  %s1550_s13 = smov 125  }
  0x5b   : > { %v949_v39 = vadd.f32 %v948_v29, %v947_v28 }
  0x5d   : > { %v1772_v58 = vmul.f32 %v1701_v1, %v949_v39 }
  0x60   : > { %473 = vrot.lane.b32.xlu0 %v471_v31, %s1537_s14  ;;  %v946_v31 = vadd.f32 %v945_v22, %v944_v21  ;;  %v306_v21 = vld [vmem:[%s1608_s25] sm:$0x7]  ;;  %v992_v22 = vsub.f32 %v966_v59, %v1772_v58 }
  0x61   : > { %495 = vrot.lane.b32.xlu2 %v493_v32, %s1538_s15  ;;  %s1543_s15 = smov 100  }
  0x62   : > { %484 = vrot.lane.b32.xlu1 %v482_v33, %s1539_s16  ;;  %s1544_s16 = smov 102   ;;  %v262_v33 = vld [vmem:[%s1608_s25] sm:$0x7]  ;;  %v1766_v44 = vmul.f32 %v1701_v1, %v946_v31  ;;  %v1002_v31 = vmul.f32 %v992_v22, %v992_v22 }
  0x68   : > { %330 = vrot.lane.b32.xlu0 %v328_v37, %s1541_s22  ;;  %v273_v37 = vld [vmem:[%s1608_s25] sm:$0x7] }
  0x69   : > { %352 = vrot.lane.b32.xlu2 %v350_v36, %s1540_s17  ;;  %s1545_s17 = smov 101   ;;  %v995_v36 = vsub.f32 %v969_v20, %v1742_v19 }
  0x6a   : > { %341 = vrot.lane.b32.xlu1 %v339_v38, %s1542_s23  ;;  %v999_v38 = vmul.f32 %v989_v24, %v989_v24 }
  0x6b   : > { %v715_v41 = vpop.permute.xlu2 %714 }
  0x6c   : > { %v716_v43 = vrot.slane %v715_v41, 1  ;;  %v1011_v55 = vsel %vm934_vm2, %v999_v38, 0.0 }
  0x6e   : > { %v717_v48 = vsel %vm300_vm0, %v715_v41, %v716_v43  ;;  %v998_v41 = vmul.f32 %v988_v27, %v988_v27  ;;  %v1003_v43 = vmul.f32 %v993_v30, %v993_v30 }
  0x6f   : > { %720 = vst.msk [vmem:[#allocation2 + $0x7b] ss:$8 sm:$0x7] %vm1649_vm1, %v717_v48  ;;  %v970_v48 = vmul.f32 0.00390625, %v1722_v12 }
  0x70   : > { %363 = vrot.lane.b32.xlu0 %v361_v49, %s1544_s16  ;;  %v1000_v49 = vmul.f32 %v990_v35, %v990_v35  ;;  %v1008_v2 = vsel %vm934_vm2, %v998_v41, 0.0 }
  0x71   : > { %385 = vrot.lane.b32.xlu2 %v383_v45, %s1543_s15  ;;  %v965_v45 = vmul.f32 0.00390625, %v1717_v11 }
  0x72   : > { %374 = vrot.lane.b32.xlu1 %v372_v52, %s1545_s17  ;;  %v1005_v52 = vmul.f32 %v995_v36, %v995_v36  ;;  %v1014_v15 = vsel %vm934_vm2, %v1000_v49, 0.0 }
  0x73   : > { %v725_v60 = vpop.permute.xlu2 %724 }
  0x74   : > { %v726_v0 = vrot.slane %v725_v60, 1  ;;  %v1015_v16 = vsel %vm934_vm2, %v1005_v52, 0.0 }
  0x76   : > { %v727_v4 = vsel %vm311_vm4, %v725_v60, %v726_v0  ;;  %v971_v60 = vmul.f32 0.00390625, %v1739_v18  ;;  %v1012_v0 = vsel %vm934_vm2, %v1004_v40, 0.0 }
  0x77   : > { %730 = vst.msk [vmem:[#allocation2 + $0x7c] ss:$8 sm:$0x7] %vm1649_vm1, %v727_v4  ;;  %v1009_v4 = vsel %vm934_vm2, %v1003_v43, 0.0  ;;  %v1013_v24 = vadd.f32 %v1012_v0, %v1011_v55 }
  0x78   : > { %396 = vrot.lane.b32.xlu0 %v394_v5, %s1546_s28  ;;  %v991_v5 = vsub.f32 %v965_v45, %v1766_v44  ;;  %v1010_v25 = vadd.f32 %v1009_v4, %v1008_v2 }
  0x79   : > { %253 = vrot.lane.b32.xlu2 %v251_v6, %s1547_s30  ;;  %v996_v6 = vsub.f32 %v970_v48, %v1766_v44  ;;  %v1024_v36 = vmul.f32 256.0, %v1013_v24 }
  0x7a   : > { %407 = vrot.lane.b32.xlu1 %v405_v3, %s1548_s11  ;;  %v1001_v27 = vmul.f32 %v991_v5, %v991_v5 }
  0x7b   : > { %v757_v23 = vpop.permute.xlu2 %756  ;;  %v1006_v28 = vmul.f32 %v996_v6, %v996_v6 }
  0x7c   : > { %v758_v26 = vrot.slane %v757_v23, 1  ;;  %v1017_v40 = vsel %vm934_vm2, %v1001_v27, 0.0 }
  0x7d   : > { %v1018_v41 = vsel %vm934_vm2, %v1006_v28, 0.0 }
  0x7e   : > { %v760_v32 = vsel %vm759_vm5, %v757_v23, %v758_v26  ;;  %v997_v23 = vsub.f32 %v971_v60, %v1772_v58  ;;  %v1016_v26 = vadd.f32 %v1015_v16, %v1014_v15  ;;  %v1019_v59 = vadd.f32 %v1018_v41, %v1017_v40 }
  0x7f   : > { %763 = vst.msk [vmem:[#allocation2 + $0x7f] ss:$8 sm:$0x7] %vm1649_vm1, %v760_v32  ;;  %vm608_vm5 = vcmask 285696  }
  0x80   : > { %264 = vrot.lane.b32.xlu0 %v262_v33, %s1549_s12  ;;  %v1007_v32 = vmul.f32 %v997_v23, %v997_v23  ;;  %v1025_v39 = vmul.f32 256.0, %v1016_v26  ;;  %v1026_v4 = vmul.f32 256.0, %v1019_v59 }
  0x81   : > { %286 = vrot.lane.b32.xlu2 %v284_v34, %s1511_s6  ;;  %s1551_s6 = smov 106  }
  0x82   : > { %275 = vrot.lane.b32.xlu1 %v273_v37, %s1550_s13  ;;  %v768_v53 = vpop.permute.xlu0 %767  ;;  %v1023_v37 = vmul.f32 256.0, %v1010_v25  ;;  %v1021_v55 = vsel %vm934_vm2, %v1007_v32, 0.0 }
  0x83   : > { %v617_v54 = vpop.permute.xlu2 %616  ;;  %v769_v61 = vrot.slane %v768_v53, 1 }
  0x84   : > { %v694_v62 = vpop.permute.xlu1 %693  ;;  %v618_v63 = vrot.slane %v617_v54, 1 }
  0x85   : > { %v695_v3 = vrot.slane %v694_v62, 1  ;;  %v771_v7 = vsel %vm770_vm6, %v768_v53, %v769_v61  ;;  %vm630_vm6 = vcmask 146432  }
  0x86   : > { %v620_v8 = vsel %vm619_vm8, %v617_v54, %v618_v63  ;;  %774 = vst.msk [vmem:[#allocation2 + $0x90] ss:$8 sm:$0x7] %vm1649_vm1, %v771_v7  ;;  %v1020_v54 = vsel %vm934_vm2, %v1002_v31, 0.0  ;;  %vm597_vm2 = vcmask 293888   ;;  %vm641_vm8 = vcmask 138240  }
  0x87   : > { %v697_v20 = vsel %vm696_vm7, %v694_v62, %v695_v3  ;;  %623 = vst.msk [vmem:[#allocation2 + $0x62] ss:$8 sm:$0x7] %vm1649_vm1, %v620_v8  ;;  %v1022_v60 = vadd.f32 %v1021_v55, %v1020_v54  ;;  %vm575_vm7 = vcmask 310272  }
  0x88   : > { %700 = vst.msk [vmem:[#allocation2 + $0x79] ss:$8 sm:$0x7] %vm1649_vm1, %v697_v20  ;;  %297 = vrot.lane.b32.xlu0 %v295_v10, %s1507_s27  ;;  %s1552_s27 = smov 1  }
  0x89   : > { %319 = vrot.lane.b32.xlu2 %v317_v14, %s1551_s6  ;;  %v1027_v7 = vmul.f32 256.0, %v1022_v60 }
  0x8a   : > { %308 = vrot.lane.b32.xlu1 %v306_v21, %s1509_s29  ;;  %v683_v29 = vpop.permute.xlu0 %682 }
  0x8b   : > { %v650_v30 = vpop.permute.xlu2 %649  ;;  %v684_v34 = vrot.slane %v683_v29, 1 }
  0x8c   : > { %v705_v33 = vpop.permute.xlu1 %704  ;;  %v651_v35 = vrot.slane %v650_v30, 1 }
  0x8d   : > { %v706_v38 = vrot.slane %v705_v33, 1  ;;  %v686_v43 = vsel %vm685_vm10, %v683_v29, %v684_v34  ;;  %v799_v48 = vld [vmem:[#allocation2 + $0x90] sm:$0x1]  ;;  %v1802_v49 = vld [vmem:[#allocation2 + $0x98] sm:$0x1]  ;;  %vm663_vm10 = vcmask 121856  }
  0x8e   : > { %v653_v45 = vsel %vm652_vm11, %v650_v30, %v651_v35  ;;  %v801_v52 = vld [vmem:[#allocation2 + $0xa0] sm:$0x1]  ;;  %689 = vst.msk [vmem:[#allocation2 + $0x78] ss:$8 sm:$0x7] %vm1649_vm1, %v686_v43  ;;  %1360 = vmatpush.msk.msra.mxu0 %vm818_vm12, %v799_v48  ;;  %1380 = vmatpush.msk.msra.mxu3 %vm818_vm12, %v799_v48  ;;  %vm432_vm11 = vcmask 662528  }
  0x8f   : > { %v707_v53 = vsel %vm289_vm9, %v705_v33, %v706_v38  ;;  %1387 = vmatpush.msk.msra.mxu1 %vm818_vm12, %v1802_v49  ;;  %1372 = vmatpush.msk.msra.mxu2 %vm818_vm12, %v801_v52  ;;  %656 = vst.msk [vmem:[#allocation2 + $0x65] ss:$8 sm:$0x7] %vm1649_vm1, %v653_v45 }
  0x90   : > { %710 = vst.msk [vmem:[#allocation2 + $0x7a] ss:$8 sm:$0x7] %vm1649_vm1, %v707_v53  ;;  %1033 = vrot.lane.b32.xlu0 %v1023_v37, %s1552_s27 }
  0x91   : > { %1037 = vrot.lane.b32.xlu2 %v1025_v39, %s1552_s27 }
  0x92   : > { %1035 = vrot.lane.b32.xlu1 %v1024_v36, %s1552_s27  ;;  %v735_v61 = vpop.permute.xlu0 %734 }
  0x93   : > { %v507_v62 = vpop.permute.xlu2 %506  ;;  %v736_v0 = vrot.slane %v735_v61, 1 }
  0x94   : > { %v746_v63 = vpop.permute.xlu1 %745  ;;  %v508_v2 = vrot.slane %v507_v62, 1 }
  0x95   : > { %v747_v3 = vrot.slane %v746_v63, 1  ;;  %v738_v5 = vsel %vm737_vm13, %v735_v61, %v736_v0  ;;  %vm674_vm13 = vcmask 113664  }
  0x96   : > { %v510_v6 = vsel %vm509_vm14, %v507_v62, %v508_v2  ;;  %741 = vst.msk [vmem:[#allocation2 + $0x7d] ss:$8 sm:$0x7] %vm1649_vm1, %v738_v5  ;;  %vm520_vm14 = vcmask 474112  }
  0x97   : > { %v749_v8 = vsel %vm748_vm15, %v746_v63, %v747_v3  ;;  %513 = vst.msk [vmem:[#allocation2 + $0x48] ss:$8 sm:$0x7] %vm1649_vm1, %v510_v6  ;;  %vm465_vm15 = vcmask 637952  }
  0x98   : > { %752 = vst.msk [vmem:[#allocation2 + $0x7e] ss:$8 sm:$0x7] %vm1649_vm1, %v749_v8  ;;  %1039 = vrot.lane.b32.xlu0 %v1026_v4, %s1552_s27 }
  0x9a   : > { %1041 = vrot.lane.b32.xlu1 %v1027_v7, %s1552_s27  ;;  %v595_v10 = vpop.permute.xlu0 %594 }
  0x9b   : > { %v540_v14 = vpop.permute.xlu2 %539  ;;  %v596_v16 = vrot.slane %v595_v10, 1 }
  0x9c   : > { %v606_v15 = vpop.permute.xlu1 %605  ;;  %v541_v20 = vrot.slane %v540_v14, 1 }
  0x9d   : > { %v607_v21 = vrot.slane %v606_v15, 1  ;;  %v598_v22 = vsel %vm597_vm2, %v595_v10, %v596_v16  ;;  %vm531_vm2 = vcmask 465920  }
  0x9e   : > { %v543_v23 = vsel %vm542_vm3, %v540_v14, %v541_v20  ;;  %601 = vst.msk [vmem:[#allocation2 + $0x60] ss:$8 sm:$0x7] %vm1649_vm1, %v598_v22  ;;  %vm553_vm3 = vcmask 326656  }
  0x9f   : > { %v609_v24 = vsel %vm608_vm5, %v606_v15, %v607_v21  ;;  %v796_v25 = vld [vmem:[#allocation2 + $0x78] sm:$0xff]  ;;  %v1826_v26 = vld [vmem:[#allocation2 + $0x80] sm:$0xff]  ;;  %v798_v27 = vld [vmem:[#allocation2 + $0x88] sm:$0xff]  ;;  %546 = vst.msk [vmem:[#allocation2 + $0x4b] ss:$8 sm:$0x7] %vm1649_vm1, %v543_v23 }
  0xa0   : > { %612 = vst.msk [vmem:[#allocation2 + $0x61] ss:$8 sm:$0x7] %vm1649_vm1, %v609_v24  ;;  %838 = vmatpush.msra.mxu0 %v796_v25  ;;  %1381 = vmatpush.msra.mxu3 %v796_v25  ;;  %vm498_vm5 = vcmask 490496  }
  0xa1   : > { %1388 = vmatpush.msra.mxu1 %v1826_v26  ;;  %902 = vmatpush.msra.mxu2 %v798_v27 }
  0xa2   : > { %v628_v28 = vpop.permute.xlu0 %627 }
  0xa3   : > { %v573_v29 = vpop.permute.xlu2 %572  ;;  %v629_v31 = vrot.slane %v628_v28, 1 }
  0xa4   : > { %v639_v30 = vpop.permute.xlu1 %638  ;;  %v574_v32 = vrot.slane %v573_v29, 1 }
  0xa5   : > { %v640_v33 = vrot.slane %v639_v30, 1  ;;  %v631_v34 = vsel %vm630_vm6, %v628_v28, %v629_v31  ;;  %vm564_vm6 = vcmask 318464  }
  0xa6   : > { %v576_v35 = vsel %vm575_vm7, %v573_v29, %v574_v32  ;;  %634 = vst.msk [vmem:[#allocation2 + $0x63] ss:$8 sm:$0x7] %vm1649_vm1, %v631_v34  ;;  %vm586_vm7 = vcmask 302080  }
  0xa7   : > { %v642_v36 = vsel %vm641_vm8, %v639_v30, %v640_v33  ;;  %579 = vst.msk [vmem:[#allocation2 + $0x4e] ss:$8 sm:$0x7] %vm1649_vm1, %v576_v35  ;;  %vm355_vm8 = vcmask 842752  }
  0xa8   : > { %645 = vst.msk [vmem:[#allocation2 + $0x64] ss:$8 sm:$0x7] %vm1649_vm1, %v642_v36 }
  0xaa   : > { %v661_v37 = vpop.permute.xlu0 %660 }
  0xab   : > { %v430_v38 = vpop.permute.xlu2 %429  ;;  %v662_v40 = vrot.slane %v661_v37, 1 }
  0xac   : > { %v672_v39 = vpop.permute.xlu1 %671  ;;  %v431_v41 = vrot.slane %v430_v38, 1 }
  0xad   : > { %v673_v43 = vrot.slane %v672_v39, 1  ;;  %v664_v45 = vsel %vm663_vm10, %v661_v37, %v662_v40  ;;  %vm421_vm10 = vcmask 670720  }
  0xae   : > { %v433_v48 = vsel %vm432_vm11, %v430_v38, %v431_v41  ;;  %667 = vst.msk [vmem:[#allocation2 + $0x66] ss:$8 sm:$0x7] %vm1649_vm1, %v664_v45  ;;  %vm443_vm11 = vcmask 654336  }
  0xaf   : > { %v675_v52 = vsel %vm674_vm13, %v672_v39, %v673_v43  ;;  %436 = vst.msk [vmem:[#allocation2 + $0x31] ss:$8 sm:$0x7] %vm1649_vm1, %v433_v48  ;;  %vm388_vm13 = vcmask 818176  }
  0xb0   : > { %678 = vst.msk [vmem:[#allocation2 + $0x67] ss:$8 sm:$0x7] %vm1649_vm1, %v675_v52 }
  0xb2   : > { %v518_v53 = vpop.permute.xlu0 %517 }
  0xb3   : > { %v463_v54 = vpop.permute.xlu2 %462  ;;  %v519_v59 = vrot.slane %v518_v53, 1 }
  0xb4   : > { %v529_v55 = vpop.permute.xlu1 %528  ;;  %v464_v60 = vrot.slane %v463_v54, 1 }
  0xb5   : > { %v530_v61 = vrot.slane %v529_v55, 1  ;;  %v521_v62 = vsel %vm520_vm14, %v518_v53, %v519_v59  ;;  %vm454_vm14 = vcmask 646144  }
  0xb6   : > { %v466_v63 = vsel %vm465_vm15, %v463_v54, %v464_v60  ;;  %524 = vst.msk [vmem:[#allocation2 + $0x49] ss:$8 sm:$0x7] %vm1649_vm1, %v521_v62  ;;  %vm476_vm15 = vcmask 506880  }
  0xb7   : > { %v532_v0 = vsel %vm531_vm2, %v529_v55, %v530_v61  ;;  %v793_v2 = vld [vmem:[#allocation2 + $0x60] sm:$0xff]  ;;  %v1847_v3 = vld [vmem:[#allocation2 + $0x68] sm:$0xff]  ;;  %v795_v4 = vld [vmem:[#allocation2 + $0x70] sm:$0xff]  ;;  %469 = vst.msk [vmem:[#allocation2 + $0x34] ss:$8 sm:$0x7] %vm1649_vm1, %v466_v63 }
  0xb8   : > { %535 = vst.msk [vmem:[#allocation2 + $0x4a] ss:$8 sm:$0x7] %vm1649_vm1, %v532_v0  ;;  %839 = vmatpush.msra.mxu0 %v793_v2  ;;  %1382 = vmatpush.msra.mxu3 %v793_v2  ;;  %vm256_vm2 = vcmask 1039360  }
  0xb9   : > { %1389 = vmatpush.msra.mxu1 %v1847_v3  ;;  %903 = vmatpush.msra.mxu2 %v795_v4 }
  0xba   : > { %v551_v5 = vpop.permute.xlu0 %550 }
  0xbb   : > { %v496_v6 = vpop.permute.xlu2 %495  ;;  %v552_v8 = vrot.slane %v551_v5, 1 }
  0xbc   : > { %v562_v7 = vpop.permute.xlu1 %561  ;;  %v497_v10 = vrot.slane %v496_v6, 1 }
  0xbd   : > { %v563_v14 = vrot.slane %v562_v7, 1  ;;  %v554_v15 = vsel %vm553_vm3, %v551_v5, %v552_v8  ;;  %vm487_vm3 = vcmask 498688  }
  0xbe   : > { %v499_v16 = vsel %vm498_vm5, %v496_v6, %v497_v10  ;;  %557 = vst.msk [vmem:[#allocation2 + $0x4c] ss:$8 sm:$0x7] %vm1649_vm1, %v554_v15  ;;  %vm333_vm5 = vcmask 859136  }
  0xbf   : > { %v565_v20 = vsel %vm564_vm6, %v562_v7, %v563_v14  ;;  %502 = vst.msk [vmem:[#allocation2 + $0x37] ss:$8 sm:$0x7] %vm1649_vm1, %v499_v16  ;;  %vm344_vm6 = vcmask 850944   ;;  %v244_v16 = vld [vmem:[%s1608_s25] sm:$0x7] }
  0xc0   : > { %568 = vst.msk [vmem:[#allocation2 + $0x4d] ss:$8 sm:$0x7] %vm1649_vm1, %v565_v20 }
  0xc1   : > { %249 = vst.msk [vmem:[#allocation2] ss:$8 sm:$0x7] %vm1649_vm1, %v244_v16 }
  0xc2   : > { %v584_v21 = vpop.permute.xlu0 %583 }
  0xc3   : > { %v353_v22 = vpop.permute.xlu2 %352  ;;  %v585_v23 = vrot.slane %v584_v21, 1 }
  0xc4   : > { %v419_v24 = vpop.permute.xlu1 %418  ;;  %v354_v25 = vrot.slane %v353_v22, 1 }
  0xc5   : > { %v420_v27 = vrot.slane %v419_v24, 1  ;;  %v587_v28 = vsel %vm586_vm7, %v584_v21, %v585_v23  ;;  %vm366_vm7 = vcmask 834560  }
  0xc6   : > { %v356_v29 = vsel %vm355_vm8, %v353_v22, %v354_v25  ;;  %590 = vst.msk [vmem:[#allocation2 + $0x4f] ss:$8 sm:$0x7] %vm1649_vm1, %v587_v28  ;;  %vm322_vm8 = vcmask 867328  }
  0xc7   : > { %v422_v30 = vsel %vm421_vm10, %v419_v24, %v420_v27  ;;  %359 = vst.msk [vmem:[#allocation2 + $0x1a] ss:$8 sm:$0x7] %vm1649_vm1, %v356_v29  ;;  %vm377_vm10 = vcmask 826368  }
  0xc8   : > { %425 = vst.msk [vmem:[#allocation2 + $0x30] ss:$8 sm:$0x7] %vm1649_vm1, %v422_v30 }
  0xca   : > { %v441_v31 = vpop.permute.xlu0 %440 }
  0xcb   : > { %v386_v32 = vpop.permute.xlu2 %385  ;;  %v442_v33 = vrot.slane %v441_v31, 1 }
  0xcc   : > { %v452_v34 = vpop.permute.xlu1 %451  ;;  %v387_v35 = vrot.slane %v386_v32, 1 }
  0xcd   : > { %v453_v36 = vrot.slane %v452_v34, 1  ;;  %v444_v37 = vsel %vm443_vm11, %v441_v31, %v442_v33  ;;  %v790_v39 = vld [vmem:[#allocation2 + $0x48] sm:$0xff]  ;;  %v1866_v40 = vld [vmem:[#allocation2 + $0x50] sm:$0xff]  ;;  %v792_v41 = vld [vmem:[#allocation2 + $0x58] sm:$0xff]  ;;  %vm399_vm11 = vcmask 687104  }
  0xce   : > { %v389_v38 = vsel %vm388_vm13, %v386_v32, %v387_v35  ;;  %447 = vst.msk [vmem:[#allocation2 + $0x32] ss:$8 sm:$0x7] %vm1649_vm1, %v444_v37  ;;  %840 = vmatpush.msra.mxu0 %v790_v39  ;;  %1383 = vmatpush.msra.mxu3 %v790_v39  ;;  %vm410_vm13 = vcmask 678912  }
  0xcf   : > { %v455_v43 = vsel %vm454_vm14, %v452_v34, %v453_v36  ;;  %1390 = vmatpush.msra.mxu1 %v1866_v40  ;;  %904 = vmatpush.msra.mxu2 %v792_v41  ;;  %392 = vst.msk [vmem:[#allocation2 + $0x1d] ss:$8 sm:$0x7] %vm1649_vm1, %v389_v38  ;;  %vm267_vm14 = vcmask 1031168  }
  0xd0   : > { %458 = vst.msk [vmem:[#allocation2 + $0x33] ss:$8 sm:$0x7] %vm1649_vm1, %v455_v43 }
  0xd2   : > { %v474_v45 = vpop.permute.xlu0 %473 }
  0xd3   : > { %v254_v48 = vpop.permute.xlu2 %253  ;;  %v475_v52 = vrot.slane %v474_v45, 1 }
  0xd4   : > { %v485_v53 = vpop.permute.xlu1 %484  ;;  %v255_v54 = vrot.slane %v254_v48, 1 }
  0xd5   : > { %v486_v55 = vrot.slane %v485_v53, 1  ;;  %v477_v59 = vsel %vm476_vm15, %v474_v45, %v475_v52  ;;  %vm278_vm15 = vcmask 1022976  }
  0xd6   : > { %v257_v60 = vsel %vm256_vm2, %v254_v48, %v255_v54  ;;  %480 = vst.msk [vmem:[#allocation2 + $0x35] ss:$8 sm:$0x7] %vm1649_vm1, %v477_v59 }
  0xd7   : > { %v488_v61 = vsel %vm487_vm3, %v485_v53, %v486_v55  ;;  %260 = vst.msk [vmem:[#allocation2 + $0x1] ss:$8 sm:$0x7] %vm1649_vm1, %v257_v60 }
  0xd8   : > { %491 = vst.msk [vmem:[#allocation2 + $0x36] ss:$8 sm:$0x7] %vm1649_vm1, %v488_v61 }
  0xda   : > { %v331_v62 = vpop.permute.xlu0 %330 }
  0xdb   : > { %v287_v63 = vpop.permute.xlu2 %286  ;;  %v332_v2 = vrot.slane %v331_v62, 1 }
  0xdc   : > { %v342_v0 = vpop.permute.xlu1 %341  ;;  %v288_v4 = vrot.slane %v287_v63, 1 }
  0xdd   : > { %v343_v5 = vrot.slane %v342_v0, 1  ;;  %v334_v6 = vsel %vm333_vm5, %v331_v62, %v332_v2 }
  0xde   : > { %v290_v7 = vsel %vm289_vm9, %v287_v63, %v288_v4  ;;  %337 = vst.msk [vmem:[#allocation2 + $0x18] ss:$8 sm:$0x7] %vm1649_vm1, %v334_v6  ;;  %vm972_vm9 = vcmask 15368  }
  0xdf   : > { %v345_v8 = vsel %vm344_vm6, %v342_v0, %v343_v5  ;;  %v787_v10 = vld [vmem:[#allocation2 + $0x30] sm:$0xff]  ;;  %v1884_v14 = vld [vmem:[#allocation2 + $0x38] sm:$0xff]  ;;  %v789_v15 = vld [vmem:[#allocation2 + $0x40] sm:$0xff]  ;;  %293 = vst.msk [vmem:[#allocation2 + $0x4] ss:$8 sm:$0x7] %vm1649_vm1, %v290_v7 }
  0xe0   : > { %348 = vst.msk [vmem:[#allocation2 + $0x19] ss:$8 sm:$0x7] %vm1649_vm1, %v345_v8  ;;  %841 = vmatpush.msra.mxu0 %v787_v10  ;;  %1384 = vmatpush.msra.mxu3 %v787_v10  ;;  %v979_v27 = vsel %vm972_vm9, %v1686_v56, 0.0  ;;  %v980_v28 = vsel %vm972_vm9, %v1691_v57, 0.0  ;;  %v973_v5 = vsel %vm972_vm9, %v1669_v50, 0.0 }
  0xe1   : > { %1391 = vmatpush.msra.mxu1 %v1884_v14  ;;  %905 = vmatpush.msra.mxu2 %v789_v15  ;;  %v981_v32 = vadd.f32 %v980_v28, %v979_v27  ;;  %v974_v6 = vsel %vm972_vm9, %v1674_v51, 0.0  ;;  %v976_v15 = vsel %vm972_vm9, %v1657_v46, 0.0  ;;  %v977_v16 = vsel %vm972_vm9, %v1662_v47, 0.0 }
  0xe2   : > { %v364_v20 = vpop.permute.xlu0 %363  ;;  %v975_v51 = vadd.f32 %v974_v6, %v973_v5  ;;  %v982_v27 = vsel %vm972_vm9, %v1717_v11, 0.0  ;;  %v983_v28 = vsel %vm972_vm9, %v1722_v12, 0.0 }
  0xe3   : > { %v320_v21 = vpop.permute.xlu2 %319  ;;  %v365_v23 = vrot.slane %v364_v20, 1  ;;  %v984_v12 = vadd.f32 %v983_v28, %v982_v27 }
  0xe4   : > { %v375_v22 = vpop.permute.xlu1 %374  ;;  %v321_v24 = vrot.slane %v320_v21, 1 }
  0xe5   : > { %v376_v25 = vrot.slane %v375_v22, 1  ;;  %v367_v29 = vsel %vm366_vm7, %v364_v20, %v365_v23 }
  0xe6   : > { %v323_v30 = vsel %vm322_vm8, %v320_v21, %v321_v24  ;;  %370 = vst.msk [vmem:[#allocation2 + $0x1b] ss:$8 sm:$0x7] %vm1649_vm1, %v367_v29  ;;  %v978_v21 = vadd.f32 %v977_v16, %v976_v15  ;;  %v985_v29 = vsel %vm972_vm9, %v1734_v17, 0.0  ;;  %v777_v17 = vld [vmem:[%s2054_s1 + $0x8] sm:$0xff] }
  0xe7   : > { %v378_v31 = vsel %vm377_vm10, %v375_v22, %v376_v25  ;;  %326 = vst.msk [vmem:[#allocation2 + $0x7] ss:$8 sm:$0x7] %vm1649_vm1, %v323_v30  ;;  %v986_v30 = vsel %vm972_vm9, %v1739_v18, 0.0 }
  0xe8   : > { %381 = vst.msk [vmem:[#allocation2 + $0x1c] ss:$8 sm:$0x7] %vm1649_vm1, %v378_v31  ;;  %v776_v31 = vld [vmem:[%s2054_s1] sm:$0xff]  ;;  %v987_v18 = vadd.f32 %v986_v30, %v985_v29  ;;  %v1116_v29 = vld [vmem:[%s2056_s3 + $0x18] sm:$0xff]  ;;  %v1145_v30 = vld [vmem:[%s2057_s4 + $0x10] sm:$0xff] }
  0xea   : > { %v397_v33 = vpop.permute.xlu0 %396 }
  0xeb   : > { %v1038_v34 = vpop.permute.xlu2 %1037  ;;  %v398_v35 = vrot.slane %v397_v33, 1 }
  0xec   : > { %v408_v56 = vpop.permute.xlu1 %407  ;;  %v1050_v57 = vadd.f32 %v1038_v34, %v981_v32 }
  0xed   : > { %v409_v36 = vrot.slane %v408_v56, 1  ;;  %v400_v37 = vsel %vm399_vm11, %v397_v33, %v398_v35 }
  0xee   : > { %v1055_v38 = vmul.f32 %v1050_v57, %v1701_v1  ;;  %403 = vst.msk [vmem:[#allocation2 + $0x1e] ss:$8 sm:$0x7] %vm1649_vm1, %v400_v37 }
  0xef   : > { %v411_v39 = vsel %vm410_vm13, %v408_v56, %v409_v36 }
  0xf0   : > { %414 = vst.msk [vmem:[#allocation2 + $0x1f] ss:$8 sm:$0x7] %vm1649_vm1, %v411_v39  ;;  %v1060_v41 = vadd.f32 1e-05, %v1055_v38 }
  0xf2   : > { %1472 = vrsqrt.f32 %v1060_v41  ;;  %v265_v43 = vpop.permute.xlu0 %264  ;;  %vm1089_vm2 = vweird.f32 %v1060_v41 }
  0xf3   : > { %v266_v48 = vrot.slane %v265_v43, 1 }
  0xf4   : > { %v276_v45 = vpop.permute.xlu1 %275 }
  0xf5   : > { %v277_v52 = vrot.slane %v276_v45, 1  ;;  %v268_v53 = vsel %vm267_vm14, %v265_v43, %v266_v48 }
  0xf6   : > { %271 = vst.msk [vmem:[#allocation2 + $0x2] ss:$8 sm:$0x7] %vm1649_vm1, %v268_v53 }
  0xf7   : > { %v279_v54 = vsel %vm278_vm15, %v276_v45, %v277_v52  ;;  %v784_v55 = vld [vmem:[#allocation2 + $0x18] sm:$0xff]  ;;  %v1911_v59 = vld [vmem:[#allocation2 + $0x20] sm:$0xff]  ;;  %v786_v60 = vld [vmem:[#allocation2 + $0x28] sm:$0xff] }
  0xf8   : > { %v1473_v61 = vpop.eup %1472  ;;  %282 = vst.msk [vmem:[#allocation2 + $0x3] ss:$8 sm:$0x7] %vm1649_vm1, %v279_v54  ;;  %842 = vmatpush.msra.mxu0 %v784_v55  ;;  %1385 = vmatpush.msra.mxu3 %v784_v55  ;;  %v778_v45 = vld [vmem:[%s2054_s1 + $0x10] sm:$0xff] }
  0xf9   : > { %v1084_v62 = vmul.f32 %v1473_v61, %v1060_v41  ;;  %1392 = vmatpush.msra.mxu1 %v1911_v59  ;;  %906 = vmatpush.msra.mxu2 %v786_v60  ;;  %vm1090_vm3 = vweird.f32 %v1473_v61 }
  0xfa   : > { %v298_v63 = vpop.permute.xlu0 %297  ;;  %vm1091_vm5 = vmor %vm1089_vm2, %vm1090_vm3  ;;  %vm1255_vm2 = vcmask 785408   ;;  %vm1268_vm3 = vcmask 781312  }
  0xfb   : > { %v1085_v0 = vmul.f32 %v1473_v61, %v1084_v62  ;;  %v299_v4 = vrot.slane %v298_v63, 1 }
  0xfc   : > { %v309_v2 = vpop.permute.xlu1 %308 }
  0xfd   : > { %v310_v7 = vrot.slane %v309_v2, 1  ;;  %v1086_v8 = vmul.f32 0.5, %v1085_v0  ;;  %v301_v10 = vsel %vm300_vm0, %v298_v63, %v299_v4  ;;  %vm802_vm0 = vcmask 400384  }
  0xfe   : > { %304 = vst.msk [vmem:[#allocation2 + $0x5] ss:$8 sm:$0x7] %vm1649_vm1, %v301_v10 }
  0xff   : > { %v312_v20 = vsel %vm311_vm4, %v309_v2, %v310_v7  ;;  %v1087_v50 = vsub.f32 1.5, %v1086_v8 }
 0x100   : > { %315 = vst.msk [vmem:[#allocation2 + $0x6] ss:$8 sm:$0x7] %vm1649_vm1, %v312_v20  ;;  %v780_v20 = vld [vmem:[%s2054_s1 + $0x20] sm:$0xff] }
 0x101   : > { %v1088_v22 = vmul.f32 %v1473_v61, %v1087_v50 }
 0x102   : > { %v1034_v23 = vpop.permute.xlu0 %1033 }
 0x103   : > { %v1092_v24 = vsel %vm1091_vm5, %v1473_v61, %v1088_v22  ;;  %v1048_v46 = vadd.f32 %v1034_v23, %v975_v51  ;;  %v779_v61 = vld [vmem:[%s2054_s1 + $0x18] sm:$0xff]  ;;  %v1553_v23 = vmov 0  }
 0x104   : > { %v1036_v25 = vpop.permute.xlu1 %1035  ;;  %1127 = vrot.lane.b32.xlu1 %v1092_v24, %s1547_s30  ;;  %1469 = vset.pattern.permute.xlu0 %v1553_v23  ;;  %v1115_v24 = vld [vmem:[%s2056_s3 + $0x10] sm:$0xff] }
 0x105   : > { %v1049_v47 = vadd.f32 %v1036_v25, %v978_v21  ;;  %v1053_v42 = vmul.f32 %v1048_v46, %v1701_v1  ;;  %1467 = vset.pattern.permute.xlu1 %v1553_v23  ;;  %1468 = vset.pattern.permute.xlu2 %v1553_v23  ;;  %v1113_v25 = vld [vmem:[%s2056_s3] sm:$0xff] }
 0x107   : > { %v1054_v32 = vmul.f32 %v1049_v47, %v1701_v1  ;;  %v781_v33 = vld [vmem:[#allocation2] sm:$0xff]  ;;  %v782_v34 = vld [vmem:[#allocation2 + $0x8] sm:$0xff]  ;;  %v783_v11 = vld [vmem:[#allocation2 + $0x10] sm:$0xff]  ;;  %v1058_v56 = vadd.f32 1e-05, %v1053_v42 }
 0x108   : > { %843 = vmatpush.msra.mxu0 %v781_v33  ;;  %1386 = vmatpush.msra.mxu3 %v781_v33 }
 0x109   : > { %v1059_v35 = vadd.f32 1e-05, %v1054_v32  ;;  %1393 = vmatpush.msra.mxu1 %v782_v34  ;;  %907 = vmatpush.msra.mxu2 %v783_v11  ;;  %1474 = vrsqrt.f32 %v1058_v56  ;;  %v1143_v11 = vld [vmem:[%s2057_s4] sm:$0xff] }
 0x10a   : > { %1366 = vmatpush.msk.msrb.mxu0 %vm818_vm12, %v1802_v49  ;;  %1373 = vmatmul.msk.f32.vlgmr.msra.gmra.mxu2 %vm802_vm0, %v776_v31  ;;  %v1040_v57 = vpop.permute.xlu0 %1039  ;;  %vm1069_vm12 = vweird.f32 %v1058_v56 }
 0x10b   : > { %1476 = vrsqrt.f32 %v1059_v35  ;;  %1362 = vmatmul.msk.f32.vlgmr.msra.gmra.mxu3 %vm802_vm0, %v777_v17  ;;  %1368 = vmatmul.msk.f32.vlgmr.msra.gmra.mxu1 %vm802_vm0, %v777_v17  ;;  %v1051_v37 = vadd.f32 %v1040_v57, %v984_v12  ;;  %vm1079_vm6 = vweird.f32 %v1059_v35  ;;  %v1146_v12 = vld [vmem:[%s2057_s4 + $0x18] sm:$0xff] }
 0x10c   : > { %870 = vmatpush.msrb.mxu0 %v1826_v26  ;;  %v1042_v36 = vpop.permute.xlu1 %1041 }
 0x10d   : > { %v1052_v38 = vadd.f32 %v1042_v36, %v987_v18  ;;  %1361 = vmatmul.msk.f32.vlgmr.msra.gmra.mxu0 %vm802_vm0, %v776_v31  ;;  %v1056_v39 = vmul.f32 %v1051_v37, %v1701_v1 }
 0x10e   : > { %871 = vmatpush.msrb.mxu0 %v1847_v3 }
 0x10f   : > { %v1057_v49 = vmul.f32 %v1052_v38, %v1701_v1  ;;  %v1475_v41 = vpop.eup %1474  ;;  %v1061_v43 = vadd.f32 1e-05, %v1056_v39  ;;  %v1144_v38 = vld [vmem:[%s2057_s4 + $0x8] sm:$0xff] }
 0x110   : > { %872 = vmatpush.msrb.mxu0 %v1866_v40  ;;  %v1064_v48 = vmul.f32 %v1475_v41, %v1058_v56  ;;  %vm1070_vm1 = vweird.f32 %v1475_v41 }
 0x111   : > { %v1477_v26 = vpop.eup %1476  ;;  %v1062_v52 = vadd.f32 1e-05, %v1057_v49  ;;  %1478 = vrsqrt.f32 %v1061_v43  ;;  %vm1071_vm9 = vmor %vm1069_vm12, %vm1070_vm1  ;;  %vm1099_vm11 = vweird.f32 %v1061_v43 }
 0x112   : > { %v1074_v53 = vmul.f32 %v1477_v26, %v1059_v35  ;;  %873 = vmatpush.msrb.mxu0 %v1884_v14  ;;  %1374 = vmatmul.msk.f32.gmra.mxu2 %vm802_vm0, %v777_v17  ;;  %v1065_v3 = vmul.f32 %v1475_v41, %v1064_v48  ;;  %vm1080_vm4 = vweird.f32 %v1477_v26  ;;  %v1114_v17 = vld [vmem:[%s2056_s3 + $0x8] sm:$0xff] }
 0x113   : > { %1480 = vrsqrt.f32 %v1062_v52  ;;  %1363 = vmatmul.msk.f32.gmra.mxu3 %vm802_vm0, %v778_v45  ;;  %1369 = vmatmul.msk.f32.gmra.mxu1 %vm802_vm0, %v778_v45  ;;  %vm1081_vm7 = vmor %vm1079_vm6, %vm1080_vm4  ;;  %vm1109_vm13 = vweird.f32 %v1062_v52 }
 0x114   : > { %874 = vmatpush.msrb.mxu0 %v1911_v59  ;;  %v1075_v1 = vmul.f32 %v1477_v26, %v1074_v53  ;;  %v1066_v40 = vmul.f32 0.5, %v1065_v3 }
 0x116   : > { %875 = vmatpush.msrb.mxu0 %v782_v34  ;;  %v1076_v54 = vmul.f32 0.5, %v1075_v1  ;;  %v1067_v55 = vsub.f32 1.5, %v1066_v40 }
 0x117   : > { %1367 = vmatmul.msk.f32.vlgmr.msrb.gmra.mxu0 %vm802_vm0, %v776_v31  ;;  %v1479_v60 = vpop.eup %1478 }
 0x118   : > { %v1077_v14 = vsub.f32 1.5, %v1076_v54  ;;  %v1094_v63 = vmul.f32 %v1479_v60, %v1061_v43  ;;  %v1068_v0 = vmul.f32 %v1475_v41, %v1067_v55  ;;  %vm1100_vm8 = vweird.f32 %v1479_v60 }
 0x119   : > { %v1481_v62 = vpop.eup %1480  ;;  %vm1101_vm14 = vmor %vm1099_vm11, %vm1100_vm8 }
 0x11a   : > { %v1104_v59 = vmul.f32 %v1481_v62, %v1062_v52  ;;  %v1078_v2 = vmul.f32 %v1477_v26, %v1077_v14  ;;  %1375 = vmatmul.msk.f32.gmra.mxu2 %vm802_vm0, %v778_v45  ;;  %v1072_v4 = vsel %vm1071_vm9, %v1475_v41, %v1068_v0  ;;  %v1095_v5 = vmul.f32 %v1479_v60, %v1094_v63  ;;  %v1147_v41 = vld [vmem:[%s2057_s4 + $0x20] sm:$0xff] }
 0x11b   : > { %1364 = vmatmul.msk.f32.gmra.mxu3 %vm802_vm0, %v779_v61  ;;  %1370 = vmatmul.msk.f32.gmra.mxu1 %vm802_vm0, %v779_v61  ;;  %vm1110_vm10 = vweird.f32 %v1481_v62 }
 0x11c   : > { %v1082_v6 = vsel %vm1081_vm7, %v1477_v26, %v1078_v2  ;;  %1123 = vrot.lane.b32.xlu2 %v1072_v4, %s1547_s30  ;;  %v1105_v7 = vmul.f32 %v1481_v62, %v1104_v59  ;;  %v1096_v8 = vmul.f32 0.5, %v1095_v5  ;;  %vm1111_vm15 = vmor %vm1109_vm13, %vm1110_vm10 }
 0x11d   : > { %1125 = vrot.lane.b32.xlu0 %v1082_v6, %s1547_s30 }
 0x11e   : > { %v1106_v10 = vmul.f32 0.5, %v1105_v7  ;;  %v1097_v15 = vsub.f32 1.5, %v1096_v8 }
 0x120   : > { %v1107_v16 = vsub.f32 1.5, %v1106_v10  ;;  %v1098_v50 = vmul.f32 %v1479_v60, %v1097_v15 }
 0x122   : > { %v1108_v51 = vmul.f32 %v1481_v62, %v1107_v16  ;;  %1376 = vmatmul.msk.f32.gmra.mxu2 %vm802_vm0, %v779_v61  ;;  %v1102_v21 = vsel %vm1101_vm14, %v1479_v60, %v1098_v50 }
 0x123   : > { %1365 = vmatmul.msk.f32.gmra.mxu3 %vm802_vm0, %v780_v20  ;;  %1371 = vmatmul.msk.f32.gmra.mxu1 %vm802_vm0, %v780_v20 }
 0x124   : > { %v1112_v22 = vsel %vm1111_vm15, %v1481_v62, %v1108_v51  ;;  %1129 = vrot.lane.b32.xlu2 %v1102_v21, %s1547_s30 }
 0x125   : > { %1131 = vrot.lane.b32.xlu0 %v1112_v22, %s1547_s30 }
 0x12a   : > { %1377 = vmatmul.msk.f32.gmra.mxu2 %vm802_vm0, %v780_v20 }
 0x176   : > { %v1128_v46 = vpop.permute.xlu1 %1127  ;;  %v1124_v47 = vpop.permute.xlu2 %1123 }
 0x177   : > { %v1140_v27 = vmul.f32 %v1128_v46, %v1115_v24  ;;  %v1138_v28 = vmul.f32 %v1124_v47, %v1113_v25 }
 0x179   : > { %1170 = vperm.xlu0 %1469, %v1140_v27   ;;  %1160 = vperm.xlu1 %1467, %v1138_v28   ;;  %v1150_v42 = vmul.f32 %v1140_v27, %v1742_v19  ;;  %v1148_v34 = vmul.f32 %v1138_v28, %v1725_v13  ;;  %v1117_v13 = vld [vmem:[%s2056_s3 + $0x20] sm:$0xff] }
 0x17b   : > { %v1155_v33 = vsub.f32 %v1145_v30, %v1150_v42  ;;  %v1153_v19 = vsub.f32 %v1143_v11, %v1148_v34 }
 0x17e   : > { %v1130_v31 = vpop.permute.xlu2 %1129 }
 0x17f   : > { %v1141_v32 = vmul.f32 %v1130_v31, %v1116_v29 }
 0x181   : > { %1210 = vperm.xlu0 %1469, %v1155_v33   ;;  %1175 = vperm.xlu1 %1467, %v1141_v32   ;;  %v1151_v56 = vmul.f32 %v1141_v32, %v1766_v44 }
 0x183   : > { %v1156_v18 = vsub.f32 %v1146_v12, %v1151_v56 }
 0x188   : > { %v880_v48 = vpop.f32.mrf.mxu1 }
 0x189   : > { %1200 = vperm.xlu1 %1467, %v1153_v19  }
 0x18a   : > { %v845_v55 = vpop.f32.mrf.mxu0 }
 0x18d   : > { %v909_v45 = vpop.f32.mrf.mxu2 }
 0x18e   : > { %v848_v26 = vpop.f32.mrf.mxu3 }
 0x18f   : > { %v1126_v35 = vpop.permute.xlu0 %1125 }
 0x190   : > { %v1139_v57 = vmul.f32 %v1126_v35, %v1114_v17  ;;  %v883_v53 = vpop.f32.mrf.mxu1 }
 0x191   : > { %1215 = vperm.xlu1 %1467, %v1156_v18  }
 0x192   : > { %1165 = vperm.xlu2 %1468, %v1139_v57   ;;  %v1149_v44 = vmul.f32 %v1139_v57, %v1711_v9 }
 0x194   : > { %v1154_v39 = vsub.f32 %v1144_v38, %v1149_v44  ;;  %v877_v15 = vpop.f32.mrf.mxu0 }
 0x195   : > { %v912_v52 = vpop.f32.mrf.mxu2 }
 0x196   : > { %v851_v9 = vpop.f32.mrf.mxu3 }
 0x197   : > { %v1132_v36 = vpop.permute.xlu0 %1131 }
 0x198   : > { %v1142_v37 = vmul.f32 %v1132_v36, %v1117_v13  ;;  %v886_v5 = vpop.f32.mrf.mxu1 }
 0x19a   : > { %1180 = vperm.xlu2 %1468, %v1142_v37   ;;  %v1152_v49 = vmul.f32 %v1142_v37, %v1772_v58 }
 0x19c   : > { %v1157_v43 = vsub.f32 %v1147_v41, %v1152_v49 }
 0x19d   : > { %v915_v40 = vpop.f32.mrf.mxu2 }
 0x19e   : > { %v854_v4 = vpop.f32.mrf.mxu3 }
 0x1a0   : > { %v889_v34 = vpop.f32.mrf.mxu1 }
 0x1a2   : > { %1205 = vperm.xlu2 %1468, %v1154_v39  }
 0x1a5   : > { %v918_v6 = vpop.f32.mrf.mxu2 }
 0x1a6   : > { %v857_v32 = vpop.f32.mrf.mxu3 }
 0x1aa   : > { %1220 = vperm.xlu2 %1468, %v1157_v43  }
 0x1ad   : > { %v921_v11 = vpop.f32.mrf.mxu2 }
 0x1eb   : > { %v1171_v3 = vpop.permute.xlu0 %1170  ;;  %v1161_v1 = vpop.permute.xlu1 %1160 }
 0x1ec   : > { %v1166_v54 = vpop.permute.xlu2 %1165  ;;  %v1189_v60 = vmul.f32 %v1171_v3, %v851_v9  ;;  %v1190_v58 = vmul.f32 %v1171_v3, %v883_v53  ;;  %v1191_v14 = vmul.f32 %v1171_v3, %v915_v40  ;;  %v1183_v16 = vmul.f32 %v1161_v1, %v845_v55 }
 0x1ed   : > { %v1185_v20 = vmul.f32 %v1161_v1, %v909_v45  ;;  %v1184_v50 = vmul.f32 %v1161_v1, %v877_v15  ;;  %v1186_v51 = vmul.f32 %v1166_v54, %v848_v26  ;;  %v1187_v21 = vmul.f32 %v1166_v54, %v880_v48 }
 0x1ee   : > { %v1188_v22 = vmul.f32 %v1166_v54, %v912_v52 }
 0x1f3   : > { %v1211_v61 = vpop.permute.xlu0 %1210  ;;  %v1176_v62 = vpop.permute.xlu1 %1175 }
 0x1f4   : > { %v1229_v63 = vadd.f32 %v1211_v61, %v1189_v60  ;;  %v1230_v0 = vadd.f32 %v1211_v61, %v1190_v58  ;;  %v1231_v59 = vadd.f32 %v1211_v61, %v1191_v14  ;;  %v1181_v2 = vpop.permute.xlu2 %1180  ;;  %v1192_v12 = vmul.f32 %v1176_v62, %v854_v4 }
 0x1f5   : > { %v1193_v17 = vmul.f32 %v1176_v62, %v886_v5  ;;  %v1194_v35 = vmul.f32 %v1176_v62, %v918_v6  ;;  %v1195_v18 = vmul.f32 %v1181_v2, %v857_v32  ;;  %v1196_v57 = vmul.f32 %v1181_v2, %v889_v34 }
 0x1f6   : > { %v1244_v7 = vmax.f32 %v1229_v63, 0.0  ;;  %v1245_v8 = vmax.f32 %v1230_v0, 0.0  ;;  %v1246_v10 = vmax.f32 %v1231_v59, 0.0  ;;  %v1197_v13 = vmul.f32 %v1181_v2, %v921_v11 }
 0x1f8   : > { %1260 = vst [vmem:[%s2023_s8 + $0x30] sm:$0xff] %v1244_v7 }
 0x1f9   : > { %1261 = vst [vmem:[%s2023_s8 + $0x38] sm:$0xff] %v1245_v8 }
 0x1fa   : > { %1262 = vst.msk [vmem:[%s2023_s8 + $0x40] sm:$0xff] %vm1255_vm2, %v1246_v10 }
 0x1fb   : > { %v1201_v23 = vpop.permute.xlu1 %1200 }
 0x1fc   : > { %v1223_v24 = vadd.f32 %v1201_v23, %v1183_v16  ;;  %v1224_v25 = vadd.f32 %v1201_v23, %v1184_v50  ;;  %v1225_v46 = vadd.f32 %v1201_v23, %v1185_v20  ;;  %v1206_v47 = vpop.permute.xlu2 %1205 }
 0x1fd   : > { %v1226_v27 = vadd.f32 %v1206_v47, %v1186_v51  ;;  %v1227_v28 = vadd.f32 %v1206_v47, %v1187_v21  ;;  %v1228_v42 = vadd.f32 %v1206_v47, %v1188_v22 }
 0x1fe   : > { %v1238_v29 = vmax.f32 %v1223_v24, 0.0  ;;  %v1239_v30 = vmax.f32 %v1224_v25, 0.0  ;;  %v1240_v31 = vmax.f32 %v1225_v46, 0.0 }
 0x1ff   : > { %v1241_v33 = vmax.f32 %v1226_v27, 0.0  ;;  %v1242_v19 = vmax.f32 %v1227_v28, 0.0  ;;  %v1243_v56 = vmax.f32 %v1228_v42, 0.0 }
 0x200   : > { %1253 = vst [vmem:[%s2023_s8] sm:$0xff] %v1238_v29 }
 0x201   : > { %1254 = vst [vmem:[%s2023_s8 + $0x8] sm:$0xff] %v1239_v30 }
 0x202   : > { %1256 = vst.msk [vmem:[%s2023_s8 + $0x10] sm:$0xff] %vm1255_vm2, %v1240_v31 }
 0x203   : > { %1257 = vst [vmem:[%s2023_s8 + $0x18] sm:$0xff] %v1241_v33  ;;  %v1216_v36 = vpop.permute.xlu1 %1215 }
 0x204   : > { %1258 = vst [vmem:[%s2023_s8 + $0x20] sm:$0xff] %v1242_v19  ;;  %v1232_v37 = vadd.f32 %v1216_v36, %v1192_v12  ;;  %v1233_v44 = vadd.f32 %v1216_v36, %v1193_v17  ;;  %v1234_v38 = vadd.f32 %v1216_v36, %v1194_v35  ;;  %v1221_v39 = vpop.permute.xlu2 %1220 }
 0x205   : > { %1259 = vst.msk [vmem:[%s2023_s8 + $0x28] sm:$0xff] %vm1255_vm2, %v1243_v56  ;;  %v1235_v49 = vadd.f32 %v1221_v39, %v1195_v18  ;;  %v1236_v41 = vadd.f32 %v1221_v39, %v1196_v57  ;;  %v1237_v43 = vadd.f32 %v1221_v39, %v1197_v13 }
 0x206   : > { %v1247_v45 = vmax.f32 %v1232_v37, 0.0  ;;  %v1248_v26 = vmax.f32 %v1233_v44, 0.0  ;;  %v1249_v48 = vmax.f32 %v1234_v38, 0.0 }
 0x207   : > { %v1250_v52 = vmax.f32 %v1235_v49, 0.0  ;;  %v1251_v9 = vmax.f32 %v1236_v41, 0.0  ;;  %v1252_v53 = vmax.f32 %v1237_v43, 0.0 }
 0x208   : > { %1263 = vst [vmem:[%s2023_s8 + $0x48] sm:$0xff] %v1247_v45 }
 0x209   : > { %1264 = vst [vmem:[%s2023_s8 + $0x50] sm:$0xff] %v1248_v26 }
 0x20a   : > { %1265 = vst.msk [vmem:[%s2023_s8 + $0x58] sm:$0xff] %vm1255_vm2, %v1249_v48 }
 0x20b   : > { %1266 = vst [vmem:[%s2023_s8 + $0x60] sm:$0xf] %v1250_v52 }
 0x20c   : > { %1267 = vst [vmem:[%s2023_s8 + $0x68] sm:$0xf] %v1251_v9 }
 0x20d   : > { %1269 = vst.msk [vmem:[%s2023_s8 + $0x70] sm:$0xf] %vm1268_vm3, %v1252_v53 }
 0x20e PF: > { %s15_s20 = sadd.s32 1, %s1504_s20   ;;  %s2061_s18 = smov %s1500_s19 }
 0x20f   : > { %p12_p5 = scmp.ge.s32.totalorder %s15_s20, 4   ;;  %s2062_s19 = smov %s2064_s21 }
 0x211   :  { %14 = sbr.rel (!%p12_p5) target bundleno = 2 (0x2), region = 118 }

</bundles_post_ra>
